<compile_context>
chip_gen: v6e
topology: v6e:2x2x1
jax: 0.10.0
libtpu: 0.0.40
codegen_flags: <defaults>
</compile_context>

<pallas_src>
import jax
import jax.numpy as jnp
from jax.experimental import pallas as pl
from jax.experimental.pallas import tpu as pltpu

EPS = 1e-5  # PyTorch BatchNorm2d default eps


# ----------------------------- fused Pallas kernel ---------------------------

def _build_kernel(Cin, Cout, H, W):
    """Builds the fused per-image kernel for static (Cin, Cout, H, W)."""
    Hp, Wp = H + 4, W + 4            # frame padded by 2 on each spatial side
    Np = Hp * Wp                     # flattened padded frame length
    q0 = Wp + 1                      # first "safe" frame column for 3x3 taps
    L = Np - 2 * (Wp + 1)            # compute-domain width (all taps in-bounds)
    offs = tuple((dh - 1) * Wp + (dw - 1) for dh in range(3) for dw in range(3))

    # packed SMEM parameter vector layout
    n_w1 = 9 * Cout * Cin
    n_w2 = 9 * Cout * Cout
    o_w1 = 0
    o_b1 = o_w1 + n_w1
    o_w2 = o_b1 + Cout
    o_b2 = o_w2 + n_w2
    o_w3 = o_b2 + Cout
    o_s3 = o_w3 + Cout
    o_t3 = o_s3 + Cin
    n_params = o_t3 + Cin

    def kernel(xp_ref, mask_ref, p_ref, o_ref, y1_ref, of_ref):
        f32 = jnp.float32
        mask = mask_ref[:, q0:q0 + L]                      # (1, L) interior mask

        # ---- conv1 block 1: 3x3 conv (BN1 scale folded into weights) + shift + ReLU
        y1_ref[...] = jnp.zeros_like(y1_ref)               # zero frame borders
        accs = [jnp.zeros((1, L), f32) for _ in range(Cout)]
        for k in range(9):
            a = q0 + offs[k]
            for ci in range(Cin):
                t = xp_ref[ci:ci + 1, a:a + L]             # shifted lane slice
                for co in range(Cout):
                    w = p_ref[o_w1 + (k * Cout + co) * Cin + ci]
                    accs[co] = accs[co] + w * t
        for co in range(Cout):
            # mask -> only true HxW pixels stay nonzero (= zero padding for conv #2)
            y = jnp.maximum(accs[co] + p_ref[o_b1 + co], 0.0) * mask
            y1_ref[co:co + 1, q0:q0 + L] = y

        # ---- conv1 block 2: 3x3 conv on y1 frame + shift + ReLU (kept as values)
        accs = [jnp.zeros((1, L), f32) for _ in range(Cout)]
        for k in range(9):
            a = q0 + offs[k]
            for ci in range(Cout):
                t = y1_ref[ci:ci + 1, a:a + L]
                for co in range(Cout):
                    w = p_ref[o_w2 + (k * Cout + co) * Cout + ci]
                    accs[co] = accs[co] + w * t
        y2 = [jnp.maximum(accs[co] + p_ref[o_b2 + co], 0.0) for co in range(Cout)]

        # ---- conv2 (1x1 -> 1 chan) + sigmoid + x*act + bncombine + ReLU
        sp = p_ref[o_w3 + 0] * y2[0]
        for co in range(1, Cout):
            sp = sp + p_ref[o_w3 + co] * y2[co]
        act = pl.reciprocal(1.0 + jnp.exp(-sp), approx=True)   # sigmoid on the EUP

        for ci in range(Cin):
            xc = xp_ref[ci:ci + 1, q0:q0 + L]
            z = p_ref[o_s3 + ci] * (xc * act) + p_ref[o_t3 + ci]
            of_ref[ci:ci + 1, :] = jnp.maximum(z, 0.0)

        # gather the H interior runs of W pixels into the dense (C, H*W) output
        for h in range(H):
            col = (h + 2) * Wp + 2 - q0
            o_ref[:, h * W:(h + 1) * W] = of_ref[:, col:col + W]

    return kernel, n_params, (Hp, Wp, Np, L)


# ------------------------------ host-side glue --------------------------------

def fold_bn(gamma, beta, mean, var):
    # TODO(synk): PyTorch BatchNorm2d defaults to training mode (batch stats);
    # here we implement eval-mode BN with deterministic running stats.
    scale = gamma / jnp.sqrt(var + EPS)
    shift = beta - mean * scale
    return scale.astype(jnp.float32), shift.astype(jnp.float32)


def _pack_params(params):
    """Folds BN scales into conv weights and packs everything into one SMEM vector."""
    w1, w2, w3 = params["w1"], params["w2"], params["w3"]
    s1, b1 = params["bn1"]
    s2, b2 = params["bn2"]
    s3, b3 = params["bn3"]
    # reorder to (tap, co, ci) and fold the eval-mode BN scale over co
    w1f = jnp.transpose(w1, (0, 1, 3, 2)) * s1[None, None, :, None]
    w2f = jnp.transpose(w2, (0, 1, 3, 2)) * s2[None, None, :, None]
    return jnp.concatenate(
        [w1f.reshape(-1), b1, w2f.reshape(-1), b2, w3, s3, b3]).astype(jnp.float32)


def init_params(key, cin, cout):
    assert cin == cout, "bncombine(out_channel) is applied to x*act (in_channel chans)"
    ks = jax.random.split(key, 15)

    def bn_params(k0, k1, k2, k3, c):
        gamma = 1.0 + 0.1 * jax.random.normal(k0, (c,), jnp.float32)
        beta = 0.1 * jax.random.normal(k1, (c,), jnp.float32)
        mean = 0.1 * jax.random.normal(k2, (c,), jnp.float32)
        var = 1.0 + 0.5 * jax.random.uniform(k3, (c,), jnp.float32)
        return fold_bn(gamma, beta, mean, var)

    w1 = jax.random.normal(ks[0], (3, 3, cin, cout), jnp.float32) * (2.0 / (9 * cin)) ** 0.5
    w2 = jax.random.normal(ks[1], (3, 3, cout, cout), jnp.float32) * (2.0 / (9 * cout)) ** 0.5
    w3 = jax.random.normal(ks[2], (cout,), jnp.float32) * (1.0 / cout) ** 0.5
    return dict(
        w1=w1,                                           # (3,3,Cin,Cout) = (dh,dw,ci,co)
        bn1=bn_params(ks[3], ks[4], ks[5], ks[6], cout),
        w2=w2,                                           # (3,3,Cout,Cout)
        bn2=bn_params(ks[7], ks[8], ks[9], ks[10], cout),
        w3=w3,                                           # conv2: 1x1, Cout -> 1
        bn3=bn_params(ks[11], ks[12], ks[13], ks[14], cin),   # bncombine
    )


def spatial_attention_forward(x_nchw, params):
    B, Cin, H, W = x_nchw.shape
    Cout = params["w1"].shape[3]
    assert Cin == Cout

    kernel, n_params, (Hp, Wp, Np, L) = _build_kernel(Cin, Cout, H, W)

    # cheap host prep: pad-by-2, flatten pixels (stays channel-major = NCHW order)
    xpad = jnp.pad(x_nchw.astype(jnp.float32), ((0, 0), (0, 0), (2, 2), (2, 2)))
    xpad = xpad.reshape(B, Cin, Np)

    # interior mask over the padded frame (1 at original HxW pixel positions)
    mask = jnp.zeros((Hp, Wp), jnp.float32).at[2:2 + H, 2:2 + W].set(1.0).reshape(1, Np)

    pvec = _pack_params(params)
    assert pvec.shape == (n_params,)

    out = pl.pallas_call(
        kernel,
        out_shape=jax.ShapeDtypeStruct((B, Cin, H * W), jnp.float32),
        grid=(B,),
        in_specs=[
            pl.BlockSpec((None, Cin, Np), lambda b: (b, 0, 0)),          # per-image frame
            pl.BlockSpec((1, Np), lambda b: (0, 0)),                     # interior mask
            pl.BlockSpec(memory_space=pltpu.MemorySpace.SMEM),           # packed params
        ],
        out_specs=pl.BlockSpec((None, Cin, H * W), lambda b: (b, 0, 0)),
        scratch_shapes=[
            pltpu.VMEM((Cout, Np), jnp.float32),   # y1 frame (stays on-chip)
            pltpu.VMEM((Cin, L), jnp.float32),     # output staging frame
        ],
        compiler_params=pltpu.CompilerParams(
            dimension_semantics=("parallel",)),     # batch axis -> both TCs on v7x
    )(xpad, mask, pvec)
    return out.reshape(B, Cin, H, W)


# ----------------- pure-JAX reference (same math, no Pallas) ------------------

def im2col_3x3(x_nhwc):
    b, h, w, c = x_nhwc.shape
    xp = jnp.pad(x_nhwc, ((0, 0), (1, 1), (1, 1), (0, 0)))
    cols = [xp[:, dh:dh + h, dw:dw + w, :] for dh in range(3) for dw in range(3)]
    return jnp.concatenate(cols, axis=-1).reshape(b * h * w, 9 * c)


def reference_forward(x_nchw, params):
    b, cin, h, w = x_nchw.shape
    cout = params["w1"].shape[3]
    x = jnp.transpose(x_nchw, (0, 2, 3, 1)).astype(jnp.float32)
    n = b * h * w

    def cbr(xmap, wconv, bn):
        s, sh = bn
        wmat = wconv.reshape(9 * wconv.shape[2], wconv.shape[3])
        y = im2col_3x3(xmap) @ wmat
        return jnp.maximum(y * s[None, :] + sh[None, :], 0.0)

    y1 = cbr(x, params["w1"], params["bn1"]).reshape(b, h, w, cout)
    y2 = cbr(y1, params["w2"], params["bn2"])
    sp = y2 @ params["w3"][:, None]
    act = jax.nn.sigmoid(sp)
    s3, b3 = params["bn3"]
    out2d = jnp.maximum(x.reshape(n, cin) * act * s3[None, :] + b3[None, :], 0.0)
    return out2d.reshape(b, h, w, cin).transpose(0, 3, 1, 2)


if __name__ == "__main__":
    key = jax.random.PRNGKey(0)
    kx, kp = jax.random.split(key)

    B, C, H, W = 2, 4, 16, 16   # in_channel == out_channel == 4 (required by bncombine)
    x = jax.random.normal(kx, (B, C, H, W), jnp.float32)
    params = init_params(kp, C, C)

    out = jax.jit(spatial_attention_forward)(x, params)
    out = jax.block_until_ready(out)
    assert out.shape == (B, C, H, W)

    ref = reference_forward(x, params)
    max_err = float(jnp.max(jnp.abs(out - ref)))
    assert jnp.allclose(out, ref, atol=2e-2, rtol=2e-2), max_err

    print("KERNEL_OK")
</pallas_src>

<mosaic_0001>
module attributes {stable_mosaic.version = 11 : i64} {
  func.func @kernel(%arg0: i32, %arg1: memref<1x4x400xf32, #tpu.memory_space<vmem>>, %arg2: memref<1x400xf32, #tpu.memory_space<vmem>>, %arg3: memref<308xf32, #tpu.memory_space<smem>>, %arg4: memref<1x4x256xf32, #tpu.memory_space<vmem>>, %arg5: memref<4x400xf32, #tpu.memory_space<vmem>>, %arg6: memref<4x358xf32, #tpu.memory_space<vmem>>) attributes {dimension_semantics = [#tpu.dimension_semantics<parallel>], iteration_bounds = array<i64: 2>, scalar_prefetch = 0 : i64, scratch_operands = 2 : i64, tpu.core_type = #tpu.core_type<tc>, window_params = [{transform_indices = @transform_0, window_bounds = array<i64: 1, 4, 400>}, {pipeline_mode = #tpu.pipeline_mode<synchronous>, transform_indices = @transform_1, window_bounds = array<i64: 1, 400>}, {transform_indices = @transform_2, window_bounds = array<i64: 308>}, {transform_indices = @transform_3, window_bounds = array<i64: 1, 4, 256>}]} {
    %c0 = arith.constant 0 : index
    %c21 = arith.constant 21 : index
    %0 = vector.load %arg2[%c0, %c21] : memref<1x400xf32, #tpu.memory_space<vmem>>, vector<1x358xf32>
    %cst = arith.constant 0.000000e+00 : f32
    %1 = vector.broadcast %cst : f32 to vector<4x400xf32>
    %c0_0 = arith.constant 0 : index
    %c0_1 = arith.constant 0 : index
    %2 = vector.load %arg5[%c0_0, %c0_1] : memref<4x400xf32, #tpu.memory_space<vmem>>, vector<4x400xf32>
    tpu.vector_store %arg5[%c0_0, %c0_1], %1 {strides = array<i32>} : memref<4x400xf32, #tpu.memory_space<vmem>>, vector<4x400xf32>,
    %cst_2 = arith.constant 0.000000e+00 : f32
    %3 = vector.broadcast %cst_2 : f32 to vector<1x358xf32>
    %cst_3 = arith.constant 0.000000e+00 : f32
    %4 = vector.broadcast %cst_3 : f32 to vector<1x358xf32>
    %cst_4 = arith.constant 0.000000e+00 : f32
    %5 = vector.broadcast %cst_4 : f32 to vector<1x358xf32>
    %cst_5 = arith.constant 0.000000e+00 : f32
    %6 = vector.broadcast %cst_5 : f32 to vector<1x358xf32>
    %c0_6 = arith.constant 0 : index
    %c0_7 = arith.constant 0 : index
    %c0_8 = arith.constant 0 : index
    %7 = vector.load %arg1[%c0_6, %c0_7, %c0_8] : memref<1x4x400xf32, #tpu.memory_space<vmem>>, vector<1x1x358xf32>
    %8 = vector.shape_cast %7 : vector<1x1x358xf32> to vector<1x358xf32>
    %c0_9 = arith.constant 0 : index
    %9 = memref.load %arg3[%c0_9] : memref<308xf32, #tpu.memory_space<smem>>
    %10 = vector.broadcast %9 : f32 to vector<1x358xf32>
    %11 = arith.mulf %10, %8 : vector<1x358xf32>
    %12 = arith.addf %3, %11 : vector<1x358xf32>
    %c4 = arith.constant 4 : index
    %13 = memref.load %arg3[%c4] : memref<308xf32, #tpu.memory_space<smem>>
    %14 = vector.broadcast %13 : f32 to vector<1x358xf32>
    %15 = arith.mulf %14, %8 : vector<1x358xf32>
    %16 = arith.addf %4, %15 : vector<1x358xf32>
    %c8 = arith.constant 8 : index
    %17 = memref.load %arg3[%c8] : memref<308xf32, #tpu.memory_space<smem>>
    %18 = vector.broadcast %17 : f32 to vector<1x358xf32>
    %19 = arith.mulf %18, %8 : vector<1x358xf32>
    %20 = arith.addf %5, %19 : vector<1x358xf32>
    %c12 = arith.constant 12 : index
    %21 = memref.load %arg3[%c12] : memref<308xf32, #tpu.memory_space<smem>>
    %22 = vector.broadcast %21 : f32 to vector<1x358xf32>
    %23 = arith.mulf %22, %8 : vector<1x358xf32>
    %24 = arith.addf %6, %23 : vector<1x358xf32>
    %c0_10 = arith.constant 0 : index
    %c1 = arith.constant 1 : index
    %c0_11 = arith.constant 0 : index
    %25 = vector.load %arg1[%c0_10, %c1, %c0_11] : memref<1x4x400xf32, #tpu.memory_space<vmem>>, vector<1x1x358xf32>
    %26 = vector.shape_cast %25 : vector<1x1x358xf32> to vector<1x358xf32>
    %c1_12 = arith.constant 1 : index
    %27 = memref.load %arg3[%c1_12] : memref<308xf32, #tpu.memory_space<smem>>
    %28 = vector.broadcast %27 : f32 to vector<1x358xf32>
    %29 = arith.mulf %28, %26 : vector<1x358xf32>
    %30 = arith.addf %12, %29 : vector<1x358xf32>
    %c5 = arith.constant 5 : index
    %31 = memref.load %arg3[%c5] : memref<308xf32, #tpu.memory_space<smem>>
    %32 = vector.broadcast %31 : f32 to vector<1x358xf32>
    %33 = arith.mulf %32, %26 : vector<1x358xf32>
    %34 = arith.addf %16, %33 : vector<1x358xf32>
    %c9 = arith.constant 9 : index
    %35 = memref.load %arg3[%c9] : memref<308xf32, #tpu.memory_space<smem>>
    %36 = vector.broadcast %35 : f32 to vector<1x358xf32>
    %37 = arith.mulf %36, %26 : vector<1x358xf32>
    %38 = arith.addf %20, %37 : vector<1x358xf32>
    %c13 = arith.constant 13 : index
    %39 = memref.load %arg3[%c13] : memref<308xf32, #tpu.memory_space<smem>>
    %40 = vector.broadcast %39 : f32 to vector<1x358xf32>
    %41 = arith.mulf %40, %26 : vector<1x358xf32>
    %42 = arith.addf %24, %41 : vector<1x358xf32>
    %c0_13 = arith.constant 0 : index
    %c2 = arith.constant 2 : index
    %c0_14 = arith.constant 0 : index
    %43 = vector.load %arg1[%c0_13, %c2, %c0_14] : memref<1x4x400xf32, #tpu.memory_space<vmem>>, vector<1x1x358xf32>
    %44 = vector.shape_cast %43 : vector<1x1x358xf32> to vector<1x358xf32>
    %c2_15 = arith.constant 2 : index
    %45 = memref.load %arg3[%c2_15] : memref<308xf32, #tpu.memory_space<smem>>
    %46 = vector.broadcast %45 : f32 to vector<1x358xf32>
    %47 = arith.mulf %46, %44 : vector<1x358xf32>
    %48 = arith.addf %30, %47 : vector<1x358xf32>
    %c6 = arith.constant 6 : index
    %49 = memref.load %arg3[%c6] : memref<308xf32, #tpu.memory_space<smem>>
    %50 = vector.broadcast %49 : f32 to vector<1x358xf32>
    %51 = arith.mulf %50, %44 : vector<1x358xf32>
    %52 = arith.addf %34, %51 : vector<1x358xf32>
    %c10 = arith.constant 10 : index
    %53 = memref.load %arg3[%c10] : memref<308xf32, #tpu.memory_space<smem>>
    %54 = vector.broadcast %53 : f32 to vector<1x358xf32>
    %55 = arith.mulf %54, %44 : vector<1x358xf32>
    %56 = arith.addf %38, %55 : vector<1x358xf32>
    %c14 = arith.constant 14 : index
    %57 = memref.load %arg3[%c14] : memref<308xf32, #tpu.memory_space<smem>>
    %58 = vector.broadcast %57 : f32 to vector<1x358xf32>
    %59 = arith.mulf %58, %44 : vector<1x358xf32>
    %60 = arith.addf %42, %59 : vector<1x358xf32>
    %c0_16 = arith.constant 0 : index
    %c3 = arith.constant 3 : index
    %c0_17 = arith.constant 0 : index
    %61 = vector.load %arg1[%c0_16, %c3, %c0_17] : memref<1x4x400xf32, #tpu.memory_space<vmem>>, vector<1x1x358xf32>
    %62 = vector.shape_cast %61 : vector<1x1x358xf32> to vector<1x358xf32>
    %c3_18 = arith.constant 3 : index
    %63 = memref.load %arg3[%c3_18] : memref<308xf32, #tpu.memory_space<smem>>
    %64 = vector.broadcast %63 : f32 to vector<1x358xf32>
    %65 = arith.mulf %64, %62 : vector<1x358xf32>
    %66 = arith.addf %48, %65 : vector<1x358xf32>
    %c7 = arith.constant 7 : index
    %67 = memref.load %arg3[%c7] : memref<308xf32, #tpu.memory_space<smem>>
    %68 = vector.broadcast %67 : f32 to vector<1x358xf32>
    %69 = arith.mulf %68, %62 : vector<1x358xf32>
    %70 = arith.addf %52, %69 : vector<1x358xf32>
    %c11 = arith.constant 11 : index
    %71 = memref.load %arg3[%c11] : memref<308xf32, #tpu.memory_space<smem>>
    %72 = vector.broadcast %71 : f32 to vector<1x358xf32>
    %73 = arith.mulf %72, %62 : vector<1x358xf32>
    %74 = arith.addf %56, %73 : vector<1x358xf32>
    %c15 = arith.constant 15 : index
    %75 = memref.load %arg3[%c15] : memref<308xf32, #tpu.memory_space<smem>>
    %76 = vector.broadcast %75 : f32 to vector<1x358xf32>
    %77 = arith.mulf %76, %62 : vector<1x358xf32>
    %78 = arith.addf %60, %77 : vector<1x358xf32>
    %c0_19 = arith.constant 0 : index
    %c0_20 = arith.constant 0 : index
    %c1_21 = arith.constant 1 : index
    %79 = vector.load %arg1[%c0_19, %c0_20, %c1_21] : memref<1x4x400xf32, #tpu.memory_space<vmem>>, vector<1x1x358xf32>
    %80 = vector.shape_cast %79 : vector<1x1x358xf32> to vector<1x358xf32>
    %c16 = arith.constant 16 : index
    %81 = memref.load %arg3[%c16] : memref<308xf32, #tpu.memory_space<smem>>
    %82 = vector.broadcast %81 : f32 to vector<1x358xf32>
    %83 = arith.mulf %82, %80 : vector<1x358xf32>
    %84 = arith.addf %66, %83 : vector<1x358xf32>
    %c20 = arith.constant 20 : index
    %85 = memref.load %arg3[%c20] : memref<308xf32, #tpu.memory_space<smem>>
    %86 = vector.broadcast %85 : f32 to vector<1x358xf32>
    %87 = arith.mulf %86, %80 : vector<1x358xf32>
    %88 = arith.addf %70, %87 : vector<1x358xf32>
    %c24 = arith.constant 24 : index
    %89 = memref.load %arg3[%c24] : memref<308xf32, #tpu.memory_space<smem>>
    %90 = vector.broadcast %89 : f32 to vector<1x358xf32>
    %91 = arith.mulf %90, %80 : vector<1x358xf32>
    %92 = arith.addf %74, %91 : vector<1x358xf32>
    %c28 = arith.constant 28 : index
    %93 = memref.load %arg3[%c28] : memref<308xf32, #tpu.memory_space<smem>>
    %94 = vector.broadcast %93 : f32 to vector<1x358xf32>
    %95 = arith.mulf %94, %80 : vector<1x358xf32>
    %96 = arith.addf %78, %95 : vector<1x358xf32>
    %c0_22 = arith.constant 0 : index
    %c1_23 = arith.constant 1 : index
    %c1_24 = arith.constant 1 : index
    %97 = vector.load %arg1[%c0_22, %c1_23, %c1_24] : memref<1x4x400xf32, #tpu.memory_space<vmem>>, vector<1x1x358xf32>
    %98 = vector.shape_cast %97 : vector<1x1x358xf32> to vector<1x358xf32>
    %c17 = arith.constant 17 : index
    %99 = memref.load %arg3[%c17] : memref<308xf32, #tpu.memory_space<smem>>
    %100 = vector.broadcast %99 : f32 to vector<1x358xf32>
    %101 = arith.mulf %100, %98 : vector<1x358xf32>
    %102 = arith.addf %84, %101 : vector<1x358xf32>
    %c21_25 = arith.constant 21 : index
    %103 = memref.load %arg3[%c21_25] : memref<308xf32, #tpu.memory_space<smem>>
    %104 = vector.broadcast %103 : f32 to vector<1x358xf32>
    %105 = arith.mulf %104, %98 : vector<1x358xf32>
    %106 = arith.addf %88, %105 : vector<1x358xf32>
    %c25 = arith.constant 25 : index
    %107 = memref.load %arg3[%c25] : memref<308xf32, #tpu.memory_space<smem>>
    %108 = vector.broadcast %107 : f32 to vector<1x358xf32>
    %109 = arith.mulf %108, %98 : vector<1x358xf32>
    %110 = arith.addf %92, %109 : vector<1x358xf32>
    %c29 = arith.constant 29 : index
    %111 = memref.load %arg3[%c29] : memref<308xf32, #tpu.memory_space<smem>>
    %112 = vector.broadcast %111 : f32 to vector<1x358xf32>
    %113 = arith.mulf %112, %98 : vector<1x358xf32>
    %114 = arith.addf %96, %113 : vector<1x358xf32>
    %c0_26 = arith.constant 0 : index
    %c2_27 = arith.constant 2 : index
    %c1_28 = arith.constant 1 : index
    %115 = vector.load %arg1[%c0_26, %c2_27, %c1_28] : memref<1x4x400xf32, #tpu.memory_space<vmem>>, vector<1x1x358xf32>
    %116 = vector.shape_cast %115 : vector<1x1x358xf32> to vector<1x358xf32>
    %c18 = arith.constant 18 : index
    %117 = memref.load %arg3[%c18] : memref<308xf32, #tpu.memory_space<smem>>
    %118 = vector.broadcast %117 : f32 to vector<1x358xf32>
    %119 = arith.mulf %118, %116 : vector<1x358xf32>
    %120 = arith.addf %102, %119 : vector<1x358xf32>
    %c22 = arith.constant 22 : index
    %121 = memref.load %arg3[%c22] : memref<308xf32, #tpu.memory_space<smem>>
    %122 = vector.broadcast %121 : f32 to vector<1x358xf32>
    %123 = arith.mulf %122, %116 : vector<1x358xf32>
    %124 = arith.addf %106, %123 : vector<1x358xf32>
    %c26 = arith.constant 26 : index
    %125 = memref.load %arg3[%c26] : memref<308xf32, #tpu.memory_space<smem>>
    %126 = vector.broadcast %125 : f32 to vector<1x358xf32>
    %127 = arith.mulf %126, %116 : vector<1x358xf32>
    %128 = arith.addf %110, %127 : vector<1x358xf32>
    %c30 = arith.constant 30 : index
    %129 = memref.load %arg3[%c30] : memref<308xf32, #tpu.memory_space<smem>>
    %130 = vector.broadcast %129 : f32 to vector<1x358xf32>
    %131 = arith.mulf %130, %116 : vector<1x358xf32>
    %132 = arith.addf %114, %131 : vector<1x358xf32>
    %c0_29 = arith.constant 0 : index
    %c3_30 = arith.constant 3 : index
    %c1_31 = arith.constant 1 : index
    %133 = vector.load %arg1[%c0_29, %c3_30, %c1_31] : memref<1x4x400xf32, #tpu.memory_space<vmem>>, vector<1x1x358xf32>
    %134 = vector.shape_cast %133 : vector<1x1x358xf32> to vector<1x358xf32>
    %c19 = arith.constant 19 : index
    %135 = memref.load %arg3[%c19] : memref<308xf32, #tpu.memory_space<smem>>
    %136 = vector.broadcast %135 : f32 to vector<1x358xf32>
    %137 = arith.mulf %136, %134 : vector<1x358xf32>
    %138 = arith.addf %120, %137 : vector<1x358xf32>
    %c23 = arith.constant 23 : index
    %139 = memref.load %arg3[%c23] : memref<308xf32, #tpu.memory_space<smem>>
    %140 = vector.broadcast %139 : f32 to vector<1x358xf32>
    %141 = arith.mulf %140, %134 : vector<1x358xf32>
    %142 = arith.addf %124, %141 : vector<1x358xf32>
    %c27 = arith.constant 27 : index
    %143 = memref.load %arg3[%c27] : memref<308xf32, #tpu.memory_space<smem>>
    %144 = vector.broadcast %143 : f32 to vector<1x358xf32>
    %145 = arith.mulf %144, %134 : vector<1x358xf32>
    %146 = arith.addf %128, %145 : vector<1x358xf32>
    %c31 = arith.constant 31 : index
    %147 = memref.load %arg3[%c31] : memref<308xf32, #tpu.memory_space<smem>>
    %148 = vector.broadcast %147 : f32 to vector<1x358xf32>
    %149 = arith.mulf %148, %134 : vector<1x358xf32>
    %150 = arith.addf %132, %149 : vector<1x358xf32>
    %c0_32 = arith.constant 0 : index
    %c0_33 = arith.constant 0 : index
    %c2_34 = arith.constant 2 : index
    %151 = vector.load %arg1[%c0_32, %c0_33, %c2_34] : memref<1x4x400xf32, #tpu.memory_space<vmem>>, vector<1x1x358xf32>
    %152 = vector.shape_cast %151 : vector<1x1x358xf32> to vector<1x358xf32>
    %c32 = arith.constant 32 : index
    %153 = memref.load %arg3[%c32] : memref<308xf32, #tpu.memory_space<smem>>
    %154 = vector.broadcast %153 : f32 to vector<1x358xf32>
    %155 = arith.mulf %154, %152 : vector<1x358xf32>
    %156 = arith.addf %138, %155 : vector<1x358xf32>
    %c36 = arith.constant 36 : index
    %157 = memref.load %arg3[%c36] : memref<308xf32, #tpu.memory_space<smem>>
    %158 = vector.broadcast %157 : f32 to vector<1x358xf32>
    %159 = arith.mulf %158, %152 : vector<1x358xf32>
    %160 = arith.addf %142, %159 : vector<1x358xf32>
    %c40 = arith.constant 40 : index
    %161 = memref.load %arg3[%c40] : memref<308xf32, #tpu.memory_space<smem>>
    %162 = vector.broadcast %161 : f32 to vector<1x358xf32>
    %163 = arith.mulf %162, %152 : vector<1x358xf32>
    %164 = arith.addf %146, %163 : vector<1x358xf32>
    %c44 = arith.constant 44 : index
    %165 = memref.load %arg3[%c44] : memref<308xf32, #tpu.memory_space<smem>>
    %166 = vector.broadcast %165 : f32 to vector<1x358xf32>
    %167 = arith.mulf %166, %152 : vector<1x358xf32>
    %168 = arith.addf %150, %167 : vector<1x358xf32>
    %c0_35 = arith.constant 0 : index
    %c1_36 = arith.constant 1 : index
    %c2_37 = arith.constant 2 : index
    %169 = vector.load %arg1[%c0_35, %c1_36, %c2_37] : memref<1x4x400xf32, #tpu.memory_space<vmem>>, vector<1x1x358xf32>
    %170 = vector.shape_cast %169 : vector<1x1x358xf32> to vector<1x358xf32>
    %c33 = arith.constant 33 : index
    %171 = memref.load %arg3[%c33] : memref<308xf32, #tpu.memory_space<smem>>
    %172 = vector.broadcast %171 : f32 to vector<1x358xf32>
    %173 = arith.mulf %172, %170 : vector<1x358xf32>
    %174 = arith.addf %156, %173 : vector<1x358xf32>
    %c37 = arith.constant 37 : index
    %175 = memref.load %arg3[%c37] : memref<308xf32, #tpu.memory_space<smem>>
    %176 = vector.broadcast %175 : f32 to vector<1x358xf32>
    %177 = arith.mulf %176, %170 : vector<1x358xf32>
    %178 = arith.addf %160, %177 : vector<1x358xf32>
    %c41 = arith.constant 41 : index
    %179 = memref.load %arg3[%c41] : memref<308xf32, #tpu.memory_space<smem>>
    %180 = vector.broadcast %179 : f32 to vector<1x358xf32>
    %181 = arith.mulf %180, %170 : vector<1x358xf32>
    %182 = arith.addf %164, %181 : vector<1x358xf32>
    %c45 = arith.constant 45 : index
    %183 = memref.load %arg3[%c45] : memref<308xf32, #tpu.memory_space<smem>>
    %184 = vector.broadcast %183 : f32 to vector<1x358xf32>
    %185 = arith.mulf %184, %170 : vector<1x358xf32>
    %186 = arith.addf %168, %185 : vector<1x358xf32>
    %c0_38 = arith.constant 0 : index
    %c2_39 = arith.constant 2 : index
    %c2_40 = arith.constant 2 : index
    %187 = vector.load %arg1[%c0_38, %c2_39, %c2_40] : memref<1x4x400xf32, #tpu.memory_space<vmem>>, vector<1x1x358xf32>
    %188 = vector.shape_cast %187 : vector<1x1x358xf32> to vector<1x358xf32>
    %c34 = arith.constant 34 : index
    %189 = memref.load %arg3[%c34] : memref<308xf32, #tpu.memory_space<smem>>
    %190 = vector.broadcast %189 : f32 to vector<1x358xf32>
    %191 = arith.mulf %190, %188 : vector<1x358xf32>
    %192 = arith.addf %174, %191 : vector<1x358xf32>
    %c38 = arith.constant 38 : index
    %193 = memref.load %arg3[%c38] : memref<308xf32, #tpu.memory_space<smem>>
    %194 = vector.broadcast %193 : f32 to vector<1x358xf32>
    %195 = arith.mulf %194, %188 : vector<1x358xf32>
    %196 = arith.addf %178, %195 : vector<1x358xf32>
    %c42 = arith.constant 42 : index
    %197 = memref.load %arg3[%c42] : memref<308xf32, #tpu.memory_space<smem>>
    %198 = vector.broadcast %197 : f32 to vector<1x358xf32>
    %199 = arith.mulf %198, %188 : vector<1x358xf32>
    %200 = arith.addf %182, %199 : vector<1x358xf32>
    %c46 = arith.constant 46 : index
    %201 = memref.load %arg3[%c46] : memref<308xf32, #tpu.memory_space<smem>>
    %202 = vector.broadcast %201 : f32 to vector<1x358xf32>
    %203 = arith.mulf %202, %188 : vector<1x358xf32>
    %204 = arith.addf %186, %203 : vector<1x358xf32>
    %c0_41 = arith.constant 0 : index
    %c3_42 = arith.constant 3 : index
    %c2_43 = arith.constant 2 : index
    %205 = vector.load %arg1[%c0_41, %c3_42, %c2_43] : memref<1x4x400xf32, #tpu.memory_space<vmem>>, vector<1x1x358xf32>
    %206 = vector.shape_cast %205 : vector<1x1x358xf32> to vector<1x358xf32>
    %c35 = arith.constant 35 : index
    %207 = memref.load %arg3[%c35] : memref<308xf32, #tpu.memory_space<smem>>
    %208 = vector.broadcast %207 : f32 to vector<1x358xf32>
    %209 = arith.mulf %208, %206 : vector<1x358xf32>
    %210 = arith.addf %192, %209 : vector<1x358xf32>
    %c39 = arith.constant 39 : index
    %211 = memref.load %arg3[%c39] : memref<308xf32, #tpu.memory_space<smem>>
    %212 = vector.broadcast %211 : f32 to vector<1x358xf32>
    %213 = arith.mulf %212, %206 : vector<1x358xf32>
    %214 = arith.addf %196, %213 : vector<1x358xf32>
    %c43 = arith.constant 43 : index
    %215 = memref.load %arg3[%c43] : memref<308xf32, #tpu.memory_space<smem>>
    %216 = vector.broadcast %215 : f32 to vector<1x358xf32>
    %217 = arith.mulf %216, %206 : vector<1x358xf32>
    %218 = arith.addf %200, %217 : vector<1x358xf32>
    %c47 = arith.constant 47 : index
    %219 = memref.load %arg3[%c47] : memref<308xf32, #tpu.memory_space<smem>>
    %220 = vector.broadcast %219 : f32 to vector<1x358xf32>
    %221 = arith.mulf %220, %206 : vector<1x358xf32>
    %222 = arith.addf %204, %221 : vector<1x358xf32>
    %c0_44 = arith.constant 0 : index
    %c0_45 = arith.constant 0 : index
    %c20_46 = arith.constant 20 : index
    %223 = vector.load %arg1[%c0_44, %c0_45, %c20_46] : memref<1x4x400xf32, #tpu.memory_space<vmem>>, vector<1x1x358xf32>
    %224 = vector.shape_cast %223 : vector<1x1x358xf32> to vector<1x358xf32>
    %c48 = arith.constant 48 : index
    %225 = memref.load %arg3[%c48] : memref<308xf32, #tpu.memory_space<smem>>
    %226 = vector.broadcast %225 : f32 to vector<1x358xf32>
    %227 = arith.mulf %226, %224 : vector<1x358xf32>
    %228 = arith.addf %210, %227 : vector<1x358xf32>
    %c52 = arith.constant 52 : index
    %229 = memref.load %arg3[%c52] : memref<308xf32, #tpu.memory_space<smem>>
    %230 = vector.broadcast %229 : f32 to vector<1x358xf32>
    %231 = arith.mulf %230, %224 : vector<1x358xf32>
    %232 = arith.addf %214, %231 : vector<1x358xf32>
    %c56 = arith.constant 56 : index
    %233 = memref.load %arg3[%c56] : memref<308xf32, #tpu.memory_space<smem>>
    %234 = vector.broadcast %233 : f32 to vector<1x358xf32>
    %235 = arith.mulf %234, %224 : vector<1x358xf32>
    %236 = arith.addf %218, %235 : vector<1x358xf32>
    %c60 = arith.constant 60 : index
    %237 = memref.load %arg3[%c60] : memref<308xf32, #tpu.memory_space<smem>>
    %238 = vector.broadcast %237 : f32 to vector<1x358xf32>
    %239 = arith.mulf %238, %224 : vector<1x358xf32>
    %240 = arith.addf %222, %239 : vector<1x358xf32>
    %c0_47 = arith.constant 0 : index
    %c1_48 = arith.constant 1 : index
    %c20_49 = arith.constant 20 : index
    %241 = vector.load %arg1[%c0_47, %c1_48, %c20_49] : memref<1x4x400xf32, #tpu.memory_space<vmem>>, vector<1x1x358xf32>
    %242 = vector.shape_cast %241 : vector<1x1x358xf32> to vector<1x358xf32>
    %c49 = arith.constant 49 : index
    %243 = memref.load %arg3[%c49] : memref<308xf32, #tpu.memory_space<smem>>
    %244 = vector.broadcast %243 : f32 to vector<1x358xf32>
    %245 = arith.mulf %244, %242 : vector<1x358xf32>
    %246 = arith.addf %228, %245 : vector<1x358xf32>
    %c53 = arith.constant 53 : index
    %247 = memref.load %arg3[%c53] : memref<308xf32, #tpu.memory_space<smem>>
    %248 = vector.broadcast %247 : f32 to vector<1x358xf32>
    %249 = arith.mulf %248, %242 : vector<1x358xf32>
    %250 = arith.addf %232, %249 : vector<1x358xf32>
    %c57 = arith.constant 57 : index
    %251 = memref.load %arg3[%c57] : memref<308xf32, #tpu.memory_space<smem>>
    %252 = vector.broadcast %251 : f32 to vector<1x358xf32>
    %253 = arith.mulf %252, %242 : vector<1x358xf32>
    %254 = arith.addf %236, %253 : vector<1x358xf32>
    %c61 = arith.constant 61 : index
    %255 = memref.load %arg3[%c61] : memref<308xf32, #tpu.memory_space<smem>>
    %256 = vector.broadcast %255 : f32 to vector<1x358xf32>
    %257 = arith.mulf %256, %242 : vector<1x358xf32>
    %258 = arith.addf %240, %257 : vector<1x358xf32>
    %c0_50 = arith.constant 0 : index
    %c2_51 = arith.constant 2 : index
    %c20_52 = arith.constant 20 : index
    %259 = vector.load %arg1[%c0_50, %c2_51, %c20_52] : memref<1x4x400xf32, #tpu.memory_space<vmem>>, vector<1x1x358xf32>
    %260 = vector.shape_cast %259 : vector<1x1x358xf32> to vector<1x358xf32>
    %c50 = arith.constant 50 : index
    %261 = memref.load %arg3[%c50] : memref<308xf32, #tpu.memory_space<smem>>
    %262 = vector.broadcast %261 : f32 to vector<1x358xf32>
    %263 = arith.mulf %262, %260 : vector<1x358xf32>
    %264 = arith.addf %246, %263 : vector<1x358xf32>
    %c54 = arith.constant 54 : index
    %265 = memref.load %arg3[%c54] : memref<308xf32, #tpu.memory_space<smem>>
    %266 = vector.broadcast %265 : f32 to vector<1x358xf32>
    %267 = arith.mulf %266, %260 : vector<1x358xf32>
    %268 = arith.addf %250, %267 : vector<1x358xf32>
    %c58 = arith.constant 58 : index
    %269 = memref.load %arg3[%c58] : memref<308xf32, #tpu.memory_space<smem>>
    %270 = vector.broadcast %269 : f32 to vector<1x358xf32>
    %271 = arith.mulf %270, %260 : vector<1x358xf32>
    %272 = arith.addf %254, %271 : vector<1x358xf32>
    %c62 = arith.constant 62 : index
    %273 = memref.load %arg3[%c62] : memref<308xf32, #tpu.memory_space<smem>>
    %274 = vector.broadcast %273 : f32 to vector<1x358xf32>
    %275 = arith.mulf %274, %260 : vector<1x358xf32>
    %276 = arith.addf %258, %275 : vector<1x358xf32>
    %c0_53 = arith.constant 0 : index
    %c3_54 = arith.constant 3 : index
    %c20_55 = arith.constant 20 : index
    %277 = vector.load %arg1[%c0_53, %c3_54, %c20_55] : memref<1x4x400xf32, #tpu.memory_space<vmem>>, vector<1x1x358xf32>
    %278 = vector.shape_cast %277 : vector<1x1x358xf32> to vector<1x358xf32>
    %c51 = arith.constant 51 : index
    %279 = memref.load %arg3[%c51] : memref<308xf32, #tpu.memory_space<smem>>
    %280 = vector.broadcast %279 : f32 to vector<1x358xf32>
    %281 = arith.mulf %280, %278 : vector<1x358xf32>
    %282 = arith.addf %264, %281 : vector<1x358xf32>
    %c55 = arith.constant 55 : index
    %283 = memref.load %arg3[%c55] : memref<308xf32, #tpu.memory_space<smem>>
    %284 = vector.broadcast %283 : f32 to vector<1x358xf32>
    %285 = arith.mulf %284, %278 : vector<1x358xf32>
    %286 = arith.addf %268, %285 : vector<1x358xf32>
    %c59 = arith.constant 59 : index
    %287 = memref.load %arg3[%c59] : memref<308xf32, #tpu.memory_space<smem>>
    %288 = vector.broadcast %287 : f32 to vector<1x358xf32>
    %289 = arith.mulf %288, %278 : vector<1x358xf32>
    %290 = arith.addf %272, %289 : vector<1x358xf32>
    %c63 = arith.constant 63 : index
    %291 = memref.load %arg3[%c63] : memref<308xf32, #tpu.memory_space<smem>>
    %292 = vector.broadcast %291 : f32 to vector<1x358xf32>
    %293 = arith.mulf %292, %278 : vector<1x358xf32>
    %294 = arith.addf %276, %293 : vector<1x358xf32>
    %c0_56 = arith.constant 0 : index
    %c0_57 = arith.constant 0 : index
    %c21_58 = arith.constant 21 : index
    %295 = vector.load %arg1[%c0_56, %c0_57, %c21_58] : memref<1x4x400xf32, #tpu.memory_space<vmem>>, vector<1x1x358xf32>
    %296 = vector.shape_cast %295 : vector<1x1x358xf32> to vector<1x358xf32>
    %c64 = arith.constant 64 : index
    %297 = memref.load %arg3[%c64] : memref<308xf32, #tpu.memory_space<smem>>
    %298 = vector.broadcast %297 : f32 to vector<1x358xf32>
    %299 = arith.mulf %298, %296 : vector<1x358xf32>
    %300 = arith.addf %282, %299 : vector<1x358xf32>
    %c68 = arith.constant 68 : index
    %301 = memref.load %arg3[%c68] : memref<308xf32, #tpu.memory_space<smem>>
    %302 = vector.broadcast %301 : f32 to vector<1x358xf32>
    %303 = arith.mulf %302, %296 : vector<1x358xf32>
    %304 = arith.addf %286, %303 : vector<1x358xf32>
    %c72 = arith.constant 72 : index
    %305 = memref.load %arg3[%c72] : memref<308xf32, #tpu.memory_space<smem>>
    %306 = vector.broadcast %305 : f32 to vector<1x358xf32>
    %307 = arith.mulf %306, %296 : vector<1x358xf32>
    %308 = arith.addf %290, %307 : vector<1x358xf32>
    %c76 = arith.constant 76 : index
    %309 = memref.load %arg3[%c76] : memref<308xf32, #tpu.memory_space<smem>>
    %310 = vector.broadcast %309 : f32 to vector<1x358xf32>
    %311 = arith.mulf %310, %296 : vector<1x358xf32>
    %312 = arith.addf %294, %311 : vector<1x358xf32>
    %c0_59 = arith.constant 0 : index
    %c1_60 = arith.constant 1 : index
    %c21_61 = arith.constant 21 : index
    %313 = vector.load %arg1[%c0_59, %c1_60, %c21_61] : memref<1x4x400xf32, #tpu.memory_space<vmem>>, vector<1x1x358xf32>
    %314 = vector.shape_cast %313 : vector<1x1x358xf32> to vector<1x358xf32>
    %c65 = arith.constant 65 : index
    %315 = memref.load %arg3[%c65] : memref<308xf32, #tpu.memory_space<smem>>
    %316 = vector.broadcast %315 : f32 to vector<1x358xf32>
    %317 = arith.mulf %316, %314 : vector<1x358xf32>
    %318 = arith.addf %300, %317 : vector<1x358xf32>
    %c69 = arith.constant 69 : index
    %319 = memref.load %arg3[%c69] : memref<308xf32, #tpu.memory_space<smem>>
    %320 = vector.broadcast %319 : f32 to vector<1x358xf32>
    %321 = arith.mulf %320, %314 : vector<1x358xf32>
    %322 = arith.addf %304, %321 : vector<1x358xf32>
    %c73 = arith.constant 73 : index
    %323 = memref.load %arg3[%c73] : memref<308xf32, #tpu.memory_space<smem>>
    %324 = vector.broadcast %323 : f32 to vector<1x358xf32>
    %325 = arith.mulf %324, %314 : vector<1x358xf32>
    %326 = arith.addf %308, %325 : vector<1x358xf32>
    %c77 = arith.constant 77 : index
    %327 = memref.load %arg3[%c77] : memref<308xf32, #tpu.memory_space<smem>>
    %328 = vector.broadcast %327 : f32 to vector<1x358xf32>
    %329 = arith.mulf %328, %314 : vector<1x358xf32>
    %330 = arith.addf %312, %329 : vector<1x358xf32>
    %c0_62 = arith.constant 0 : index
    %c2_63 = arith.constant 2 : index
    %c21_64 = arith.constant 21 : index
    %331 = vector.load %arg1[%c0_62, %c2_63, %c21_64] : memref<1x4x400xf32, #tpu.memory_space<vmem>>, vector<1x1x358xf32>
    %332 = vector.shape_cast %331 : vector<1x1x358xf32> to vector<1x358xf32>
    %c66 = arith.constant 66 : index
    %333 = memref.load %arg3[%c66] : memref<308xf32, #tpu.memory_space<smem>>
    %334 = vector.broadcast %333 : f32 to vector<1x358xf32>
    %335 = arith.mulf %334, %332 : vector<1x358xf32>
    %336 = arith.addf %318, %335 : vector<1x358xf32>
    %c70 = arith.constant 70 : index
    %337 = memref.load %arg3[%c70] : memref<308xf32, #tpu.memory_space<smem>>
    %338 = vector.broadcast %337 : f32 to vector<1x358xf32>
    %339 = arith.mulf %338, %332 : vector<1x358xf32>
    %340 = arith.addf %322, %339 : vector<1x358xf32>
    %c74 = arith.constant 74 : index
    %341 = memref.load %arg3[%c74] : memref<308xf32, #tpu.memory_space<smem>>
    %342 = vector.broadcast %341 : f32 to vector<1x358xf32>
    %343 = arith.mulf %342, %332 : vector<1x358xf32>
    %344 = arith.addf %326, %343 : vector<1x358xf32>
    %c78 = arith.constant 78 : index
    %345 = memref.load %arg3[%c78] : memref<308xf32, #tpu.memory_space<smem>>
    %346 = vector.broadcast %345 : f32 to vector<1x358xf32>
    %347 = arith.mulf %346, %332 : vector<1x358xf32>
    %348 = arith.addf %330, %347 : vector<1x358xf32>
    %c0_65 = arith.constant 0 : index
    %c3_66 = arith.constant 3 : index
    %c21_67 = arith.constant 21 : index
    %349 = vector.load %arg1[%c0_65, %c3_66, %c21_67] : memref<1x4x400xf32, #tpu.memory_space<vmem>>, vector<1x1x358xf32>
    %350 = vector.shape_cast %349 : vector<1x1x358xf32> to vector<1x358xf32>
    %c67 = arith.constant 67 : index
    %351 = memref.load %arg3[%c67] : memref<308xf32, #tpu.memory_space<smem>>
    %352 = vector.broadcast %351 : f32 to vector<1x358xf32>
    %353 = arith.mulf %352, %350 : vector<1x358xf32>
    %354 = arith.addf %336, %353 : vector<1x358xf32>
    %c71 = arith.constant 71 : index
    %355 = memref.load %arg3[%c71] : memref<308xf32, #tpu.memory_space<smem>>
    %356 = vector.broadcast %355 : f32 to vector<1x358xf32>
    %357 = arith.mulf %356, %350 : vector<1x358xf32>
    %358 = arith.addf %340, %357 : vector<1x358xf32>
    %c75 = arith.constant 75 : index
    %359 = memref.load %arg3[%c75] : memref<308xf32, #tpu.memory_space<smem>>
    %360 = vector.broadcast %359 : f32 to vector<1x358xf32>
    %361 = arith.mulf %360, %350 : vector<1x358xf32>
    %362 = arith.addf %344, %361 : vector<1x358xf32>
    %c79 = arith.constant 79 : index
    %363 = memref.load %arg3[%c79] : memref<308xf32, #tpu.memory_space<smem>>
    %364 = vector.broadcast %363 : f32 to vector<1x358xf32>
    %365 = arith.mulf %364, %350 : vector<1x358xf32>
    %366 = arith.addf %348, %365 : vector<1x358xf32>
    %c0_68 = arith.constant 0 : index
    %c0_69 = arith.constant 0 : index
    %c22_70 = arith.constant 22 : index
    %367 = vector.load %arg1[%c0_68, %c0_69, %c22_70] : memref<1x4x400xf32, #tpu.memory_space<vmem>>, vector<1x1x358xf32>
    %368 = vector.shape_cast %367 : vector<1x1x358xf32> to vector<1x358xf32>
    %c80 = arith.constant 80 : index
    %369 = memref.load %arg3[%c80] : memref<308xf32, #tpu.memory_space<smem>>
    %370 = vector.broadcast %369 : f32 to vector<1x358xf32>
    %371 = arith.mulf %370, %368 : vector<1x358xf32>
    %372 = arith.addf %354, %371 : vector<1x358xf32>
    %c84 = arith.constant 84 : index
    %373 = memref.load %arg3[%c84] : memref<308xf32, #tpu.memory_space<smem>>
    %374 = vector.broadcast %373 : f32 to vector<1x358xf32>
    %375 = arith.mulf %374, %368 : vector<1x358xf32>
    %376 = arith.addf %358, %375 : vector<1x358xf32>
    %c88 = arith.constant 88 : index
    %377 = memref.load %arg3[%c88] : memref<308xf32, #tpu.memory_space<smem>>
    %378 = vector.broadcast %377 : f32 to vector<1x358xf32>
    %379 = arith.mulf %378, %368 : vector<1x358xf32>
    %380 = arith.addf %362, %379 : vector<1x358xf32>
    %c92 = arith.constant 92 : index
    %381 = memref.load %arg3[%c92] : memref<308xf32, #tpu.memory_space<smem>>
    %382 = vector.broadcast %381 : f32 to vector<1x358xf32>
    %383 = arith.mulf %382, %368 : vector<1x358xf32>
    %384 = arith.addf %366, %383 : vector<1x358xf32>
    %c0_71 = arith.constant 0 : index
    %c1_72 = arith.constant 1 : index
    %c22_73 = arith.constant 22 : index
    %385 = vector.load %arg1[%c0_71, %c1_72, %c22_73] : memref<1x4x400xf32, #tpu.memory_space<vmem>>, vector<1x1x358xf32>
    %386 = vector.shape_cast %385 : vector<1x1x358xf32> to vector<1x358xf32>
    %c81 = arith.constant 81 : index
    %387 = memref.load %arg3[%c81] : memref<308xf32, #tpu.memory_space<smem>>
    %388 = vector.broadcast %387 : f32 to vector<1x358xf32>
    %389 = arith.mulf %388, %386 : vector<1x358xf32>
    %390 = arith.addf %372, %389 : vector<1x358xf32>
    %c85 = arith.constant 85 : index
    %391 = memref.load %arg3[%c85] : memref<308xf32, #tpu.memory_space<smem>>
    %392 = vector.broadcast %391 : f32 to vector<1x358xf32>
    %393 = arith.mulf %392, %386 : vector<1x358xf32>
    %394 = arith.addf %376, %393 : vector<1x358xf32>
    %c89 = arith.constant 89 : index
    %395 = memref.load %arg3[%c89] : memref<308xf32, #tpu.memory_space<smem>>
    %396 = vector.broadcast %395 : f32 to vector<1x358xf32>
    %397 = arith.mulf %396, %386 : vector<1x358xf32>
    %398 = arith.addf %380, %397 : vector<1x358xf32>
    %c93 = arith.constant 93 : index
    %399 = memref.load %arg3[%c93] : memref<308xf32, #tpu.memory_space<smem>>
    %400 = vector.broadcast %399 : f32 to vector<1x358xf32>
    %401 = arith.mulf %400, %386 : vector<1x358xf32>
    %402 = arith.addf %384, %401 : vector<1x358xf32>
    %c0_74 = arith.constant 0 : index
    %c2_75 = arith.constant 2 : index
    %c22_76 = arith.constant 22 : index
    %403 = vector.load %arg1[%c0_74, %c2_75, %c22_76] : memref<1x4x400xf32, #tpu.memory_space<vmem>>, vector<1x1x358xf32>
    %404 = vector.shape_cast %403 : vector<1x1x358xf32> to vector<1x358xf32>
    %c82 = arith.constant 82 : index
    %405 = memref.load %arg3[%c82] : memref<308xf32, #tpu.memory_space<smem>>
    %406 = vector.broadcast %405 : f32 to vector<1x358xf32>
    %407 = arith.mulf %406, %404 : vector<1x358xf32>
    %408 = arith.addf %390, %407 : vector<1x358xf32>
    %c86 = arith.constant 86 : index
    %409 = memref.load %arg3[%c86] : memref<308xf32, #tpu.memory_space<smem>>
    %410 = vector.broadcast %409 : f32 to vector<1x358xf32>
    %411 = arith.mulf %410, %404 : vector<1x358xf32>
    %412 = arith.addf %394, %411 : vector<1x358xf32>
    %c90 = arith.constant 90 : index
    %413 = memref.load %arg3[%c90] : memref<308xf32, #tpu.memory_space<smem>>
    %414 = vector.broadcast %413 : f32 to vector<1x358xf32>
    %415 = arith.mulf %414, %404 : vector<1x358xf32>
    %416 = arith.addf %398, %415 : vector<1x358xf32>
    %c94 = arith.constant 94 : index
    %417 = memref.load %arg3[%c94] : memref<308xf32, #tpu.memory_space<smem>>
    %418 = vector.broadcast %417 : f32 to vector<1x358xf32>
    %419 = arith.mulf %418, %404 : vector<1x358xf32>
    %420 = arith.addf %402, %419 : vector<1x358xf32>
    %c0_77 = arith.constant 0 : index
    %c3_78 = arith.constant 3 : index
    %c22_79 = arith.constant 22 : index
    %421 = vector.load %arg1[%c0_77, %c3_78, %c22_79] : memref<1x4x400xf32, #tpu.memory_space<vmem>>, vector<1x1x358xf32>
    %422 = vector.shape_cast %421 : vector<1x1x358xf32> to vector<1x358xf32>
    %c83 = arith.constant 83 : index
    %423 = memref.load %arg3[%c83] : memref<308xf32, #tpu.memory_space<smem>>
    %424 = vector.broadcast %423 : f32 to vector<1x358xf32>
    %425 = arith.mulf %424, %422 : vector<1x358xf32>
    %426 = arith.addf %408, %425 : vector<1x358xf32>
    %c87 = arith.constant 87 : index
    %427 = memref.load %arg3[%c87] : memref<308xf32, #tpu.memory_space<smem>>
    %428 = vector.broadcast %427 : f32 to vector<1x358xf32>
    %429 = arith.mulf %428, %422 : vector<1x358xf32>
    %430 = arith.addf %412, %429 : vector<1x358xf32>
    %c91 = arith.constant 91 : index
    %431 = memref.load %arg3[%c91] : memref<308xf32, #tpu.memory_space<smem>>
    %432 = vector.broadcast %431 : f32 to vector<1x358xf32>
    %433 = arith.mulf %432, %422 : vector<1x358xf32>
    %434 = arith.addf %416, %433 : vector<1x358xf32>
    %c95 = arith.constant 95 : index
    %435 = memref.load %arg3[%c95] : memref<308xf32, #tpu.memory_space<smem>>
    %436 = vector.broadcast %435 : f32 to vector<1x358xf32>
    %437 = arith.mulf %436, %422 : vector<1x358xf32>
    %438 = arith.addf %420, %437 : vector<1x358xf32>
    %c0_80 = arith.constant 0 : index
    %c0_81 = arith.constant 0 : index
    %c40_82 = arith.constant 40 : index
    %439 = vector.load %arg1[%c0_80, %c0_81, %c40_82] : memref<1x4x400xf32, #tpu.memory_space<vmem>>, vector<1x1x358xf32>
    %440 = vector.shape_cast %439 : vector<1x1x358xf32> to vector<1x358xf32>
    %c96 = arith.constant 96 : index
    %441 = memref.load %arg3[%c96] : memref<308xf32, #tpu.memory_space<smem>>
    %442 = vector.broadcast %441 : f32 to vector<1x358xf32>
    %443 = arith.mulf %442, %440 : vector<1x358xf32>
    %444 = arith.addf %426, %443 : vector<1x358xf32>
    %c100 = arith.constant 100 : index
    %445 = memref.load %arg3[%c100] : memref<308xf32, #tpu.memory_space<smem>>
    %446 = vector.broadcast %445 : f32 to vector<1x358xf32>
    %447 = arith.mulf %446, %440 : vector<1x358xf32>
    %448 = arith.addf %430, %447 : vector<1x358xf32>
    %c104 = arith.constant 104 : index
    %449 = memref.load %arg3[%c104] : memref<308xf32, #tpu.memory_space<smem>>
    %450 = vector.broadcast %449 : f32 to vector<1x358xf32>
    %451 = arith.mulf %450, %440 : vector<1x358xf32>
    %452 = arith.addf %434, %451 : vector<1x358xf32>
    %c108 = arith.constant 108 : index
    %453 = memref.load %arg3[%c108] : memref<308xf32, #tpu.memory_space<smem>>
    %454 = vector.broadcast %453 : f32 to vector<1x358xf32>
    %455 = arith.mulf %454, %440 : vector<1x358xf32>
    %456 = arith.addf %438, %455 : vector<1x358xf32>
    %c0_83 = arith.constant 0 : index
    %c1_84 = arith.constant 1 : index
    %c40_85 = arith.constant 40 : index
    %457 = vector.load %arg1[%c0_83, %c1_84, %c40_85] : memref<1x4x400xf32, #tpu.memory_space<vmem>>, vector<1x1x358xf32>
    %458 = vector.shape_cast %457 : vector<1x1x358xf32> to vector<1x358xf32>
    %c97 = arith.constant 97 : index
    %459 = memref.load %arg3[%c97] : memref<308xf32, #tpu.memory_space<smem>>
    %460 = vector.broadcast %459 : f32 to vector<1x358xf32>
    %461 = arith.mulf %460, %458 : vector<1x358xf32>
    %462 = arith.addf %444, %461 : vector<1x358xf32>
    %c101 = arith.constant 101 : index
    %463 = memref.load %arg3[%c101] : memref<308xf32, #tpu.memory_space<smem>>
    %464 = vector.broadcast %463 : f32 to vector<1x358xf32>
    %465 = arith.mulf %464, %458 : vector<1x358xf32>
    %466 = arith.addf %448, %465 : vector<1x358xf32>
    %c105 = arith.constant 105 : index
    %467 = memref.load %arg3[%c105] : memref<308xf32, #tpu.memory_space<smem>>
    %468 = vector.broadcast %467 : f32 to vector<1x358xf32>
    %469 = arith.mulf %468, %458 : vector<1x358xf32>
    %470 = arith.addf %452, %469 : vector<1x358xf32>
    %c109 = arith.constant 109 : index
    %471 = memref.load %arg3[%c109] : memref<308xf32, #tpu.memory_space<smem>>
    %472 = vector.broadcast %471 : f32 to vector<1x358xf32>
    %473 = arith.mulf %472, %458 : vector<1x358xf32>
    %474 = arith.addf %456, %473 : vector<1x358xf32>
    %c0_86 = arith.constant 0 : index
    %c2_87 = arith.constant 2 : index
    %c40_88 = arith.constant 40 : index
    %475 = vector.load %arg1[%c0_86, %c2_87, %c40_88] : memref<1x4x400xf32, #tpu.memory_space<vmem>>, vector<1x1x358xf32>
    %476 = vector.shape_cast %475 : vector<1x1x358xf32> to vector<1x358xf32>
    %c98 = arith.constant 98 : index
    %477 = memref.load %arg3[%c98] : memref<308xf32, #tpu.memory_space<smem>>
    %478 = vector.broadcast %477 : f32 to vector<1x358xf32>
    %479 = arith.mulf %478, %476 : vector<1x358xf32>
    %480 = arith.addf %462, %479 : vector<1x358xf32>
    %c102 = arith.constant 102 : index
    %481 = memref.load %arg3[%c102] : memref<308xf32, #tpu.memory_space<smem>>
    %482 = vector.broadcast %481 : f32 to vector<1x358xf32>
    %483 = arith.mulf %482, %476 : vector<1x358xf32>
    %484 = arith.addf %466, %483 : vector<1x358xf32>
    %c106 = arith.constant 106 : index
    %485 = memref.load %arg3[%c106] : memref<308xf32, #tpu.memory_space<smem>>
    %486 = vector.broadcast %485 : f32 to vector<1x358xf32>
    %487 = arith.mulf %486, %476 : vector<1x358xf32>
    %488 = arith.addf %470, %487 : vector<1x358xf32>
    %c110 = arith.constant 110 : index
    %489 = memref.load %arg3[%c110] : memref<308xf32, #tpu.memory_space<smem>>
    %490 = vector.broadcast %489 : f32 to vector<1x358xf32>
    %491 = arith.mulf %490, %476 : vector<1x358xf32>
    %492 = arith.addf %474, %491 : vector<1x358xf32>
    %c0_89 = arith.constant 0 : index
    %c3_90 = arith.constant 3 : index
    %c40_91 = arith.constant 40 : index
    %493 = vector.load %arg1[%c0_89, %c3_90, %c40_91] : memref<1x4x400xf32, #tpu.memory_space<vmem>>, vector<1x1x358xf32>
    %494 = vector.shape_cast %493 : vector<1x1x358xf32> to vector<1x358xf32>
    %c99 = arith.constant 99 : index
    %495 = memref.load %arg3[%c99] : memref<308xf32, #tpu.memory_space<smem>>
    %496 = vector.broadcast %495 : f32 to vector<1x358xf32>
    %497 = arith.mulf %496, %494 : vector<1x358xf32>
    %498 = arith.addf %480, %497 : vector<1x358xf32>
    %c103 = arith.constant 103 : index
    %499 = memref.load %arg3[%c103] : memref<308xf32, #tpu.memory_space<smem>>
    %500 = vector.broadcast %499 : f32 to vector<1x358xf32>
    %501 = arith.mulf %500, %494 : vector<1x358xf32>
    %502 = arith.addf %484, %501 : vector<1x358xf32>
    %c107 = arith.constant 107 : index
    %503 = memref.load %arg3[%c107] : memref<308xf32, #tpu.memory_space<smem>>
    %504 = vector.broadcast %503 : f32 to vector<1x358xf32>
    %505 = arith.mulf %504, %494 : vector<1x358xf32>
    %506 = arith.addf %488, %505 : vector<1x358xf32>
    %c111 = arith.constant 111 : index
    %507 = memref.load %arg3[%c111] : memref<308xf32, #tpu.memory_space<smem>>
    %508 = vector.broadcast %507 : f32 to vector<1x358xf32>
    %509 = arith.mulf %508, %494 : vector<1x358xf32>
    %510 = arith.addf %492, %509 : vector<1x358xf32>
    %c0_92 = arith.constant 0 : index
    %c0_93 = arith.constant 0 : index
    %c41_94 = arith.constant 41 : index
    %511 = vector.load %arg1[%c0_92, %c0_93, %c41_94] : memref<1x4x400xf32, #tpu.memory_space<vmem>>, vector<1x1x358xf32>
    %512 = vector.shape_cast %511 : vector<1x1x358xf32> to vector<1x358xf32>
    %c112 = arith.constant 112 : index
    %513 = memref.load %arg3[%c112] : memref<308xf32, #tpu.memory_space<smem>>
    %514 = vector.broadcast %513 : f32 to vector<1x358xf32>
    %515 = arith.mulf %514, %512 : vector<1x358xf32>
    %516 = arith.addf %498, %515 : vector<1x358xf32>
    %c116 = arith.constant 116 : index
    %517 = memref.load %arg3[%c116] : memref<308xf32, #tpu.memory_space<smem>>
    %518 = vector.broadcast %517 : f32 to vector<1x358xf32>
    %519 = arith.mulf %518, %512 : vector<1x358xf32>
    %520 = arith.addf %502, %519 : vector<1x358xf32>
    %c120 = arith.constant 120 : index
    %521 = memref.load %arg3[%c120] : memref<308xf32, #tpu.memory_space<smem>>
    %522 = vector.broadcast %521 : f32 to vector<1x358xf32>
    %523 = arith.mulf %522, %512 : vector<1x358xf32>
    %524 = arith.addf %506, %523 : vector<1x358xf32>
    %c124 = arith.constant 124 : index
    %525 = memref.load %arg3[%c124] : memref<308xf32, #tpu.memory_space<smem>>
    %526 = vector.broadcast %525 : f32 to vector<1x358xf32>
    %527 = arith.mulf %526, %512 : vector<1x358xf32>
    %528 = arith.addf %510, %527 : vector<1x358xf32>
    %c0_95 = arith.constant 0 : index
    %c1_96 = arith.constant 1 : index
    %c41_97 = arith.constant 41 : index
    %529 = vector.load %arg1[%c0_95, %c1_96, %c41_97] : memref<1x4x400xf32, #tpu.memory_space<vmem>>, vector<1x1x358xf32>
    %530 = vector.shape_cast %529 : vector<1x1x358xf32> to vector<1x358xf32>
    %c113 = arith.constant 113 : index
    %531 = memref.load %arg3[%c113] : memref<308xf32, #tpu.memory_space<smem>>
    %532 = vector.broadcast %531 : f32 to vector<1x358xf32>
    %533 = arith.mulf %532, %530 : vector<1x358xf32>
    %534 = arith.addf %516, %533 : vector<1x358xf32>
    %c117 = arith.constant 117 : index
    %535 = memref.load %arg3[%c117] : memref<308xf32, #tpu.memory_space<smem>>
    %536 = vector.broadcast %535 : f32 to vector<1x358xf32>
    %537 = arith.mulf %536, %530 : vector<1x358xf32>
    %538 = arith.addf %520, %537 : vector<1x358xf32>
    %c121 = arith.constant 121 : index
    %539 = memref.load %arg3[%c121] : memref<308xf32, #tpu.memory_space<smem>>
    %540 = vector.broadcast %539 : f32 to vector<1x358xf32>
    %541 = arith.mulf %540, %530 : vector<1x358xf32>
    %542 = arith.addf %524, %541 : vector<1x358xf32>
    %c125 = arith.constant 125 : index
    %543 = memref.load %arg3[%c125] : memref<308xf32, #tpu.memory_space<smem>>
    %544 = vector.broadcast %543 : f32 to vector<1x358xf32>
    %545 = arith.mulf %544, %530 : vector<1x358xf32>
    %546 = arith.addf %528, %545 : vector<1x358xf32>
    %c0_98 = arith.constant 0 : index
    %c2_99 = arith.constant 2 : index
    %c41_100 = arith.constant 41 : index
    %547 = vector.load %arg1[%c0_98, %c2_99, %c41_100] : memref<1x4x400xf32, #tpu.memory_space<vmem>>, vector<1x1x358xf32>
    %548 = vector.shape_cast %547 : vector<1x1x358xf32> to vector<1x358xf32>
    %c114 = arith.constant 114 : index
    %549 = memref.load %arg3[%c114] : memref<308xf32, #tpu.memory_space<smem>>
    %550 = vector.broadcast %549 : f32 to vector<1x358xf32>
    %551 = arith.mulf %550, %548 : vector<1x358xf32>
    %552 = arith.addf %534, %551 : vector<1x358xf32>
    %c118 = arith.constant 118 : index
    %553 = memref.load %arg3[%c118] : memref<308xf32, #tpu.memory_space<smem>>
    %554 = vector.broadcast %553 : f32 to vector<1x358xf32>
    %555 = arith.mulf %554, %548 : vector<1x358xf32>
    %556 = arith.addf %538, %555 : vector<1x358xf32>
    %c122 = arith.constant 122 : index
    %557 = memref.load %arg3[%c122] : memref<308xf32, #tpu.memory_space<smem>>
    %558 = vector.broadcast %557 : f32 to vector<1x358xf32>
    %559 = arith.mulf %558, %548 : vector<1x358xf32>
    %560 = arith.addf %542, %559 : vector<1x358xf32>
    %c126 = arith.constant 126 : index
    %561 = memref.load %arg3[%c126] : memref<308xf32, #tpu.memory_space<smem>>
    %562 = vector.broadcast %561 : f32 to vector<1x358xf32>
    %563 = arith.mulf %562, %548 : vector<1x358xf32>
    %564 = arith.addf %546, %563 : vector<1x358xf32>
    %c0_101 = arith.constant 0 : index
    %c3_102 = arith.constant 3 : index
    %c41_103 = arith.constant 41 : index
    %565 = vector.load %arg1[%c0_101, %c3_102, %c41_103] : memref<1x4x400xf32, #tpu.memory_space<vmem>>, vector<1x1x358xf32>
    %566 = vector.shape_cast %565 : vector<1x1x358xf32> to vector<1x358xf32>
    %c115 = arith.constant 115 : index
    %567 = memref.load %arg3[%c115] : memref<308xf32, #tpu.memory_space<smem>>
    %568 = vector.broadcast %567 : f32 to vector<1x358xf32>
    %569 = arith.mulf %568, %566 : vector<1x358xf32>
    %570 = arith.addf %552, %569 : vector<1x358xf32>
    %c119 = arith.constant 119 : index
    %571 = memref.load %arg3[%c119] : memref<308xf32, #tpu.memory_space<smem>>
    %572 = vector.broadcast %571 : f32 to vector<1x358xf32>
    %573 = arith.mulf %572, %566 : vector<1x358xf32>
    %574 = arith.addf %556, %573 : vector<1x358xf32>
    %c123 = arith.constant 123 : index
    %575 = memref.load %arg3[%c123] : memref<308xf32, #tpu.memory_space<smem>>
    %576 = vector.broadcast %575 : f32 to vector<1x358xf32>
    %577 = arith.mulf %576, %566 : vector<1x358xf32>
    %578 = arith.addf %560, %577 : vector<1x358xf32>
    %c127 = arith.constant 127 : index
    %579 = memref.load %arg3[%c127] : memref<308xf32, #tpu.memory_space<smem>>
    %580 = vector.broadcast %579 : f32 to vector<1x358xf32>
    %581 = arith.mulf %580, %566 : vector<1x358xf32>
    %582 = arith.addf %564, %581 : vector<1x358xf32>
    %c0_104 = arith.constant 0 : index
    %c0_105 = arith.constant 0 : index
    %c42_106 = arith.constant 42 : index
    %583 = vector.load %arg1[%c0_104, %c0_105, %c42_106] : memref<1x4x400xf32, #tpu.memory_space<vmem>>, vector<1x1x358xf32>
    %584 = vector.shape_cast %583 : vector<1x1x358xf32> to vector<1x358xf32>
    %c128 = arith.constant 128 : index
    %585 = memref.load %arg3[%c128] : memref<308xf32, #tpu.memory_space<smem>>
    %586 = vector.broadcast %585 : f32 to vector<1x358xf32>
    %587 = arith.mulf %586, %584 : vector<1x358xf32>
    %588 = arith.addf %570, %587 : vector<1x358xf32>
    %c132 = arith.constant 132 : index
    %589 = memref.load %arg3[%c132] : memref<308xf32, #tpu.memory_space<smem>>
    %590 = vector.broadcast %589 : f32 to vector<1x358xf32>
    %591 = arith.mulf %590, %584 : vector<1x358xf32>
    %592 = arith.addf %574, %591 : vector<1x358xf32>
    %c136 = arith.constant 136 : index
    %593 = memref.load %arg3[%c136] : memref<308xf32, #tpu.memory_space<smem>>
    %594 = vector.broadcast %593 : f32 to vector<1x358xf32>
    %595 = arith.mulf %594, %584 : vector<1x358xf32>
    %596 = arith.addf %578, %595 : vector<1x358xf32>
    %c140 = arith.constant 140 : index
    %597 = memref.load %arg3[%c140] : memref<308xf32, #tpu.memory_space<smem>>
    %598 = vector.broadcast %597 : f32 to vector<1x358xf32>
    %599 = arith.mulf %598, %584 : vector<1x358xf32>
    %600 = arith.addf %582, %599 : vector<1x358xf32>
    %c0_107 = arith.constant 0 : index
    %c1_108 = arith.constant 1 : index
    %c42_109 = arith.constant 42 : index
    %601 = vector.load %arg1[%c0_107, %c1_108, %c42_109] : memref<1x4x400xf32, #tpu.memory_space<vmem>>, vector<1x1x358xf32>
    %602 = vector.shape_cast %601 : vector<1x1x358xf32> to vector<1x358xf32>
    %c129 = arith.constant 129 : index
    %603 = memref.load %arg3[%c129] : memref<308xf32, #tpu.memory_space<smem>>
    %604 = vector.broadcast %603 : f32 to vector<1x358xf32>
    %605 = arith.mulf %604, %602 : vector<1x358xf32>
    %606 = arith.addf %588, %605 : vector<1x358xf32>
    %c133 = arith.constant 133 : index
    %607 = memref.load %arg3[%c133] : memref<308xf32, #tpu.memory_space<smem>>
    %608 = vector.broadcast %607 : f32 to vector<1x358xf32>
    %609 = arith.mulf %608, %602 : vector<1x358xf32>
    %610 = arith.addf %592, %609 : vector<1x358xf32>
    %c137 = arith.constant 137 : index
    %611 = memref.load %arg3[%c137] : memref<308xf32, #tpu.memory_space<smem>>
    %612 = vector.broadcast %611 : f32 to vector<1x358xf32>
    %613 = arith.mulf %612, %602 : vector<1x358xf32>
    %614 = arith.addf %596, %613 : vector<1x358xf32>
    %c141 = arith.constant 141 : index
    %615 = memref.load %arg3[%c141] : memref<308xf32, #tpu.memory_space<smem>>
    %616 = vector.broadcast %615 : f32 to vector<1x358xf32>
    %617 = arith.mulf %616, %602 : vector<1x358xf32>
    %618 = arith.addf %600, %617 : vector<1x358xf32>
    %c0_110 = arith.constant 0 : index
    %c2_111 = arith.constant 2 : index
    %c42_112 = arith.constant 42 : index
    %619 = vector.load %arg1[%c0_110, %c2_111, %c42_112] : memref<1x4x400xf32, #tpu.memory_space<vmem>>, vector<1x1x358xf32>
    %620 = vector.shape_cast %619 : vector<1x1x358xf32> to vector<1x358xf32>
    %c130 = arith.constant 130 : index
    %621 = memref.load %arg3[%c130] : memref<308xf32, #tpu.memory_space<smem>>
    %622 = vector.broadcast %621 : f32 to vector<1x358xf32>
    %623 = arith.mulf %622, %620 : vector<1x358xf32>
    %624 = arith.addf %606, %623 : vector<1x358xf32>
    %c134 = arith.constant 134 : index
    %625 = memref.load %arg3[%c134] : memref<308xf32, #tpu.memory_space<smem>>
    %626 = vector.broadcast %625 : f32 to vector<1x358xf32>
    %627 = arith.mulf %626, %620 : vector<1x358xf32>
    %628 = arith.addf %610, %627 : vector<1x358xf32>
    %c138 = arith.constant 138 : index
    %629 = memref.load %arg3[%c138] : memref<308xf32, #tpu.memory_space<smem>>
    %630 = vector.broadcast %629 : f32 to vector<1x358xf32>
    %631 = arith.mulf %630, %620 : vector<1x358xf32>
    %632 = arith.addf %614, %631 : vector<1x358xf32>
    %c142 = arith.constant 142 : index
    %633 = memref.load %arg3[%c142] : memref<308xf32, #tpu.memory_space<smem>>
    %634 = vector.broadcast %633 : f32 to vector<1x358xf32>
    %635 = arith.mulf %634, %620 : vector<1x358xf32>
    %636 = arith.addf %618, %635 : vector<1x358xf32>
    %c0_113 = arith.constant 0 : index
    %c3_114 = arith.constant 3 : index
    %c42_115 = arith.constant 42 : index
    %637 = vector.load %arg1[%c0_113, %c3_114, %c42_115] : memref<1x4x400xf32, #tpu.memory_space<vmem>>, vector<1x1x358xf32>
    %638 = vector.shape_cast %637 : vector<1x1x358xf32> to vector<1x358xf32>
    %c131 = arith.constant 131 : index
    %639 = memref.load %arg3[%c131] : memref<308xf32, #tpu.memory_space<smem>>
    %640 = vector.broadcast %639 : f32 to vector<1x358xf32>
    %641 = arith.mulf %640, %638 : vector<1x358xf32>
    %642 = arith.addf %624, %641 : vector<1x358xf32>
    %c135 = arith.constant 135 : index
    %643 = memref.load %arg3[%c135] : memref<308xf32, #tpu.memory_space<smem>>
    %644 = vector.broadcast %643 : f32 to vector<1x358xf32>
    %645 = arith.mulf %644, %638 : vector<1x358xf32>
    %646 = arith.addf %628, %645 : vector<1x358xf32>
    %c139 = arith.constant 139 : index
    %647 = memref.load %arg3[%c139] : memref<308xf32, #tpu.memory_space<smem>>
    %648 = vector.broadcast %647 : f32 to vector<1x358xf32>
    %649 = arith.mulf %648, %638 : vector<1x358xf32>
    %650 = arith.addf %632, %649 : vector<1x358xf32>
    %c143 = arith.constant 143 : index
    %651 = memref.load %arg3[%c143] : memref<308xf32, #tpu.memory_space<smem>>
    %652 = vector.broadcast %651 : f32 to vector<1x358xf32>
    %653 = arith.mulf %652, %638 : vector<1x358xf32>
    %654 = arith.addf %636, %653 : vector<1x358xf32>
    %c144 = arith.constant 144 : index
    %655 = memref.load %arg3[%c144] : memref<308xf32, #tpu.memory_space<smem>>
    %656 = vector.broadcast %655 : f32 to vector<1x358xf32>
    %657 = arith.addf %642, %656 : vector<1x358xf32>
    %cst_116 = arith.constant 0.000000e+00 : f32
    %658 = vector.broadcast %cst_116 : f32 to vector<1x358xf32>
    %659 = arith.maximumf %657, %658 : vector<1x358xf32>
    %660 = arith.mulf %659, %0 : vector<1x358xf32>
    %c0_117 = arith.constant 0 : index
    %c21_118 = arith.constant 21 : index
    %661 = vector.load %arg5[%c0_117, %c21_118] : memref<4x400xf32, #tpu.memory_space<vmem>>, vector<1x358xf32>
    tpu.vector_store %arg5[%c0_117, %c21_118], %660 {strides = array<i32>} : memref<4x400xf32, #tpu.memory_space<vmem>>, vector<1x358xf32>,
    %c145 = arith.constant 145 : index
    %662 = memref.load %arg3[%c145] : memref<308xf32, #tpu.memory_space<smem>>
    %663 = vector.broadcast %662 : f32 to vector<1x358xf32>
    %664 = arith.addf %646, %663 : vector<1x358xf32>
    %cst_119 = arith.constant 0.000000e+00 : f32
    %665 = vector.broadcast %cst_119 : f32 to vector<1x358xf32>
    %666 = arith.maximumf %664, %665 : vector<1x358xf32>
    %667 = arith.mulf %666, %0 : vector<1x358xf32>
    %c1_120 = arith.constant 1 : index
    %c21_121 = arith.constant 21 : index
    %668 = vector.load %arg5[%c1_120, %c21_121] : memref<4x400xf32, #tpu.memory_space<vmem>>, vector<1x358xf32>
    tpu.vector_store %arg5[%c1_120, %c21_121], %667 {strides = array<i32>} : memref<4x400xf32, #tpu.memory_space<vmem>>, vector<1x358xf32>,
    %c146 = arith.constant 146 : index
    %669 = memref.load %arg3[%c146] : memref<308xf32, #tpu.memory_space<smem>>
    %670 = vector.broadcast %669 : f32 to vector<1x358xf32>
    %671 = arith.addf %650, %670 : vector<1x358xf32>
    %cst_122 = arith.constant 0.000000e+00 : f32
    %672 = vector.broadcast %cst_122 : f32 to vector<1x358xf32>
    %673 = arith.maximumf %671, %672 : vector<1x358xf32>
    %674 = arith.mulf %673, %0 : vector<1x358xf32>
    %c2_123 = arith.constant 2 : index
    %c21_124 = arith.constant 21 : index
    %675 = vector.load %arg5[%c2_123, %c21_124] : memref<4x400xf32, #tpu.memory_space<vmem>>, vector<1x358xf32>
    tpu.vector_store %arg5[%c2_123, %c21_124], %674 {strides = array<i32>} : memref<4x400xf32, #tpu.memory_space<vmem>>, vector<1x358xf32>,
    %c147 = arith.constant 147 : index
    %676 = memref.load %arg3[%c147] : memref<308xf32, #tpu.memory_space<smem>>
    %677 = vector.broadcast %676 : f32 to vector<1x358xf32>
    %678 = arith.addf %654, %677 : vector<1x358xf32>
    %cst_125 = arith.constant 0.000000e+00 : f32
    %679 = vector.broadcast %cst_125 : f32 to vector<1x358xf32>
    %680 = arith.maximumf %678, %679 : vector<1x358xf32>
    %681 = arith.mulf %680, %0 : vector<1x358xf32>
    %c3_126 = arith.constant 3 : index
    %c21_127 = arith.constant 21 : index
    %682 = vector.load %arg5[%c3_126, %c21_127] : memref<4x400xf32, #tpu.memory_space<vmem>>, vector<1x358xf32>
    tpu.vector_store %arg5[%c3_126, %c21_127], %681 {strides = array<i32>} : memref<4x400xf32, #tpu.memory_space<vmem>>, vector<1x358xf32>,
    %cst_128 = arith.constant 0.000000e+00 : f32
    %683 = vector.broadcast %cst_128 : f32 to vector<1x358xf32>
    %cst_129 = arith.constant 0.000000e+00 : f32
    %684 = vector.broadcast %cst_129 : f32 to vector<1x358xf32>
    %cst_130 = arith.constant 0.000000e+00 : f32
    %685 = vector.broadcast %cst_130 : f32 to vector<1x358xf32>
    %cst_131 = arith.constant 0.000000e+00 : f32
    %686 = vector.broadcast %cst_131 : f32 to vector<1x358xf32>
    %c0_132 = arith.constant 0 : index
    %c0_133 = arith.constant 0 : index
    %687 = vector.load %arg5[%c0_132, %c0_133] : memref<4x400xf32, #tpu.memory_space<vmem>>, vector<1x358xf32>
    %c148 = arith.constant 148 : index
    %688 = memref.load %arg3[%c148] : memref<308xf32, #tpu.memory_space<smem>>
    %689 = vector.broadcast %688 : f32 to vector<1x358xf32>
    %690 = arith.mulf %689, %687 : vector<1x358xf32>
    %691 = arith.addf %683, %690 : vector<1x358xf32>
    %c152 = arith.constant 152 : index
    %692 = memref.load %arg3[%c152] : memref<308xf32, #tpu.memory_space<smem>>
    %693 = vector.broadcast %692 : f32 to vector<1x358xf32>
    %694 = arith.mulf %693, %687 : vector<1x358xf32>
    %695 = arith.addf %684, %694 : vector<1x358xf32>
    %c156 = arith.constant 156 : index
    %696 = memref.load %arg3[%c156] : memref<308xf32, #tpu.memory_space<smem>>
    %697 = vector.broadcast %696 : f32 to vector<1x358xf32>
    %698 = arith.mulf %697, %687 : vector<1x358xf32>
    %699 = arith.addf %685, %698 : vector<1x358xf32>
    %c160 = arith.constant 160 : index
    %700 = memref.load %arg3[%c160] : memref<308xf32, #tpu.memory_space<smem>>
    %701 = vector.broadcast %700 : f32 to vector<1x358xf32>
    %702 = arith.mulf %701, %687 : vector<1x358xf32>
    %703 = arith.addf %686, %702 : vector<1x358xf32>
    %c1_134 = arith.constant 1 : index
    %c0_135 = arith.constant 0 : index
    %704 = vector.load %arg5[%c1_134, %c0_135] : memref<4x400xf32, #tpu.memory_space<vmem>>, vector<1x358xf32>
    %c149 = arith.constant 149 : index
    %705 = memref.load %arg3[%c149] : memref<308xf32, #tpu.memory_space<smem>>
    %706 = vector.broadcast %705 : f32 to vector<1x358xf32>
    %707 = arith.mulf %706, %704 : vector<1x358xf32>
    %708 = arith.addf %691, %707 : vector<1x358xf32>
    %c153 = arith.constant 153 : index
    %709 = memref.load %arg3[%c153] : memref<308xf32, #tpu.memory_space<smem>>
    %710 = vector.broadcast %709 : f32 to vector<1x358xf32>
    %711 = arith.mulf %710, %704 : vector<1x358xf32>
    %712 = arith.addf %695, %711 : vector<1x358xf32>
    %c157 = arith.constant 157 : index
    %713 = memref.load %arg3[%c157] : memref<308xf32, #tpu.memory_space<smem>>
    %714 = vector.broadcast %713 : f32 to vector<1x358xf32>
    %715 = arith.mulf %714, %704 : vector<1x358xf32>
    %716 = arith.addf %699, %715 : vector<1x358xf32>
    %c161 = arith.constant 161 : index
    %717 = memref.load %arg3[%c161] : memref<308xf32, #tpu.memory_space<smem>>
    %718 = vector.broadcast %717 : f32 to vector<1x358xf32>
    %719 = arith.mulf %718, %704 : vector<1x358xf32>
    %720 = arith.addf %703, %719 : vector<1x358xf32>
    %c2_136 = arith.constant 2 : index
    %c0_137 = arith.constant 0 : index
    %721 = vector.load %arg5[%c2_136, %c0_137] : memref<4x400xf32, #tpu.memory_space<vmem>>, vector<1x358xf32>
    %c150 = arith.constant 150 : index
    %722 = memref.load %arg3[%c150] : memref<308xf32, #tpu.memory_space<smem>>
    %723 = vector.broadcast %722 : f32 to vector<1x358xf32>
    %724 = arith.mulf %723, %721 : vector<1x358xf32>
    %725 = arith.addf %708, %724 : vector<1x358xf32>
    %c154 = arith.constant 154 : index
    %726 = memref.load %arg3[%c154] : memref<308xf32, #tpu.memory_space<smem>>
    %727 = vector.broadcast %726 : f32 to vector<1x358xf32>
    %728 = arith.mulf %727, %721 : vector<1x358xf32>
    %729 = arith.addf %712, %728 : vector<1x358xf32>
    %c158 = arith.constant 158 : index
    %730 = memref.load %arg3[%c158] : memref<308xf32, #tpu.memory_space<smem>>
    %731 = vector.broadcast %730 : f32 to vector<1x358xf32>
    %732 = arith.mulf %731, %721 : vector<1x358xf32>
    %733 = arith.addf %716, %732 : vector<1x358xf32>
    %c162 = arith.constant 162 : index
    %734 = memref.load %arg3[%c162] : memref<308xf32, #tpu.memory_space<smem>>
    %735 = vector.broadcast %734 : f32 to vector<1x358xf32>
    %736 = arith.mulf %735, %721 : vector<1x358xf32>
    %737 = arith.addf %720, %736 : vector<1x358xf32>
    %c3_138 = arith.constant 3 : index
    %c0_139 = arith.constant 0 : index
    %738 = vector.load %arg5[%c3_138, %c0_139] : memref<4x400xf32, #tpu.memory_space<vmem>>, vector<1x358xf32>
    %c151 = arith.constant 151 : index
    %739 = memref.load %arg3[%c151] : memref<308xf32, #tpu.memory_space<smem>>
    %740 = vector.broadcast %739 : f32 to vector<1x358xf32>
    %741 = arith.mulf %740, %738 : vector<1x358xf32>
    %742 = arith.addf %725, %741 : vector<1x358xf32>
    %c155 = arith.constant 155 : index
    %743 = memref.load %arg3[%c155] : memref<308xf32, #tpu.memory_space<smem>>
    %744 = vector.broadcast %743 : f32 to vector<1x358xf32>
    %745 = arith.mulf %744, %738 : vector<1x358xf32>
    %746 = arith.addf %729, %745 : vector<1x358xf32>
    %c159 = arith.constant 159 : index
    %747 = memref.load %arg3[%c159] : memref<308xf32, #tpu.memory_space<smem>>
    %748 = vector.broadcast %747 : f32 to vector<1x358xf32>
    %749 = arith.mulf %748, %738 : vector<1x358xf32>
    %750 = arith.addf %733, %749 : vector<1x358xf32>
    %c163 = arith.constant 163 : index
    %751 = memref.load %arg3[%c163] : memref<308xf32, #tpu.memory_space<smem>>
    %752 = vector.broadcast %751 : f32 to vector<1x358xf32>
    %753 = arith.mulf %752, %738 : vector<1x358xf32>
    %754 = arith.addf %737, %753 : vector<1x358xf32>
    %c0_140 = arith.constant 0 : index
    %c1_141 = arith.constant 1 : index
    %755 = vector.load %arg5[%c0_140, %c1_141] : memref<4x400xf32, #tpu.memory_space<vmem>>, vector<1x358xf32>
    %c164 = arith.constant 164 : index
    %756 = memref.load %arg3[%c164] : memref<308xf32, #tpu.memory_space<smem>>
    %757 = vector.broadcast %756 : f32 to vector<1x358xf32>
    %758 = arith.mulf %757, %755 : vector<1x358xf32>
    %759 = arith.addf %742, %758 : vector<1x358xf32>
    %c168 = arith.constant 168 : index
    %760 = memref.load %arg3[%c168] : memref<308xf32, #tpu.memory_space<smem>>
    %761 = vector.broadcast %760 : f32 to vector<1x358xf32>
    %762 = arith.mulf %761, %755 : vector<1x358xf32>
    %763 = arith.addf %746, %762 : vector<1x358xf32>
    %c172 = arith.constant 172 : index
    %764 = memref.load %arg3[%c172] : memref<308xf32, #tpu.memory_space<smem>>
    %765 = vector.broadcast %764 : f32 to vector<1x358xf32>
    %766 = arith.mulf %765, %755 : vector<1x358xf32>
    %767 = arith.addf %750, %766 : vector<1x358xf32>
    %c176 = arith.constant 176 : index
    %768 = memref.load %arg3[%c176] : memref<308xf32, #tpu.memory_space<smem>>
    %769 = vector.broadcast %768 : f32 to vector<1x358xf32>
    %770 = arith.mulf %769, %755 : vector<1x358xf32>
    %771 = arith.addf %754, %770 : vector<1x358xf32>
    %c1_142 = arith.constant 1 : index
    %c1_143 = arith.constant 1 : index
    %772 = vector.load %arg5[%c1_142, %c1_143] : memref<4x400xf32, #tpu.memory_space<vmem>>, vector<1x358xf32>
    %c165 = arith.constant 165 : index
    %773 = memref.load %arg3[%c165] : memref<308xf32, #tpu.memory_space<smem>>
    %774 = vector.broadcast %773 : f32 to vector<1x358xf32>
    %775 = arith.mulf %774, %772 : vector<1x358xf32>
    %776 = arith.addf %759, %775 : vector<1x358xf32>
    %c169 = arith.constant 169 : index
    %777 = memref.load %arg3[%c169] : memref<308xf32, #tpu.memory_space<smem>>
    %778 = vector.broadcast %777 : f32 to vector<1x358xf32>
    %779 = arith.mulf %778, %772 : vector<1x358xf32>
    %780 = arith.addf %763, %779 : vector<1x358xf32>
    %c173 = arith.constant 173 : index
    %781 = memref.load %arg3[%c173] : memref<308xf32, #tpu.memory_space<smem>>
    %782 = vector.broadcast %781 : f32 to vector<1x358xf32>
    %783 = arith.mulf %782, %772 : vector<1x358xf32>
    %784 = arith.addf %767, %783 : vector<1x358xf32>
    %c177 = arith.constant 177 : index
    %785 = memref.load %arg3[%c177] : memref<308xf32, #tpu.memory_space<smem>>
    %786 = vector.broadcast %785 : f32 to vector<1x358xf32>
    %787 = arith.mulf %786, %772 : vector<1x358xf32>
    %788 = arith.addf %771, %787 : vector<1x358xf32>
    %c2_144 = arith.constant 2 : index
    %c1_145 = arith.constant 1 : index
    %789 = vector.load %arg5[%c2_144, %c1_145] : memref<4x400xf32, #tpu.memory_space<vmem>>, vector<1x358xf32>
    %c166 = arith.constant 166 : index
    %790 = memref.load %arg3[%c166] : memref<308xf32, #tpu.memory_space<smem>>
    %791 = vector.broadcast %790 : f32 to vector<1x358xf32>
    %792 = arith.mulf %791, %789 : vector<1x358xf32>
    %793 = arith.addf %776, %792 : vector<1x358xf32>
    %c170 = arith.constant 170 : index
    %794 = memref.load %arg3[%c170] : memref<308xf32, #tpu.memory_space<smem>>
    %795 = vector.broadcast %794 : f32 to vector<1x358xf32>
    %796 = arith.mulf %795, %789 : vector<1x358xf32>
    %797 = arith.addf %780, %796 : vector<1x358xf32>
    %c174 = arith.constant 174 : index
    %798 = memref.load %arg3[%c174] : memref<308xf32, #tpu.memory_space<smem>>
    %799 = vector.broadcast %798 : f32 to vector<1x358xf32>
    %800 = arith.mulf %799, %789 : vector<1x358xf32>
    %801 = arith.addf %784, %800 : vector<1x358xf32>
    %c178 = arith.constant 178 : index
    %802 = memref.load %arg3[%c178] : memref<308xf32, #tpu.memory_space<smem>>
    %803 = vector.broadcast %802 : f32 to vector<1x358xf32>
    %804 = arith.mulf %803, %789 : vector<1x358xf32>
    %805 = arith.addf %788, %804 : vector<1x358xf32>
    %c3_146 = arith.constant 3 : index
    %c1_147 = arith.constant 1 : index
    %806 = vector.load %arg5[%c3_146, %c1_147] : memref<4x400xf32, #tpu.memory_space<vmem>>, vector<1x358xf32>
    %c167 = arith.constant 167 : index
    %807 = memref.load %arg3[%c167] : memref<308xf32, #tpu.memory_space<smem>>
    %808 = vector.broadcast %807 : f32 to vector<1x358xf32>
    %809 = arith.mulf %808, %806 : vector<1x358xf32>
    %810 = arith.addf %793, %809 : vector<1x358xf32>
    %c171 = arith.constant 171 : index
    %811 = memref.load %arg3[%c171] : memref<308xf32, #tpu.memory_space<smem>>
    %812 = vector.broadcast %811 : f32 to vector<1x358xf32>
    %813 = arith.mulf %812, %806 : vector<1x358xf32>
    %814 = arith.addf %797, %813 : vector<1x358xf32>
    %c175 = arith.constant 175 : index
    %815 = memref.load %arg3[%c175] : memref<308xf32, #tpu.memory_space<smem>>
    %816 = vector.broadcast %815 : f32 to vector<1x358xf32>
    %817 = arith.mulf %816, %806 : vector<1x358xf32>
    %818 = arith.addf %801, %817 : vector<1x358xf32>
    %c179 = arith.constant 179 : index
    %819 = memref.load %arg3[%c179] : memref<308xf32, #tpu.memory_space<smem>>
    %820 = vector.broadcast %819 : f32 to vector<1x358xf32>
    %821 = arith.mulf %820, %806 : vector<1x358xf32>
    %822 = arith.addf %805, %821 : vector<1x358xf32>
    %c0_148 = arith.constant 0 : index
    %c2_149 = arith.constant 2 : index
    %823 = vector.load %arg5[%c0_148, %c2_149] : memref<4x400xf32, #tpu.memory_space<vmem>>, vector<1x358xf32>
    %c180 = arith.constant 180 : index
    %824 = memref.load %arg3[%c180] : memref<308xf32, #tpu.memory_space<smem>>
    %825 = vector.broadcast %824 : f32 to vector<1x358xf32>
    %826 = arith.mulf %825, %823 : vector<1x358xf32>
    %827 = arith.addf %810, %826 : vector<1x358xf32>
    %c184 = arith.constant 184 : index
    %828 = memref.load %arg3[%c184] : memref<308xf32, #tpu.memory_space<smem>>
    %829 = vector.broadcast %828 : f32 to vector<1x358xf32>
    %830 = arith.mulf %829, %823 : vector<1x358xf32>
    %831 = arith.addf %814, %830 : vector<1x358xf32>
    %c188 = arith.constant 188 : index
    %832 = memref.load %arg3[%c188] : memref<308xf32, #tpu.memory_space<smem>>
    %833 = vector.broadcast %832 : f32 to vector<1x358xf32>
    %834 = arith.mulf %833, %823 : vector<1x358xf32>
    %835 = arith.addf %818, %834 : vector<1x358xf32>
    %c192 = arith.constant 192 : index
    %836 = memref.load %arg3[%c192] : memref<308xf32, #tpu.memory_space<smem>>
    %837 = vector.broadcast %836 : f32 to vector<1x358xf32>
    %838 = arith.mulf %837, %823 : vector<1x358xf32>
    %839 = arith.addf %822, %838 : vector<1x358xf32>
    %c1_150 = arith.constant 1 : index
    %c2_151 = arith.constant 2 : index
    %840 = vector.load %arg5[%c1_150, %c2_151] : memref<4x400xf32, #tpu.memory_space<vmem>>, vector<1x358xf32>
    %c181 = arith.constant 181 : index
    %841 = memref.load %arg3[%c181] : memref<308xf32, #tpu.memory_space<smem>>
    %842 = vector.broadcast %841 : f32 to vector<1x358xf32>
    %843 = arith.mulf %842, %840 : vector<1x358xf32>
    %844 = arith.addf %827, %843 : vector<1x358xf32>
    %c185 = arith.constant 185 : index
    %845 = memref.load %arg3[%c185] : memref<308xf32, #tpu.memory_space<smem>>
    %846 = vector.broadcast %845 : f32 to vector<1x358xf32>
    %847 = arith.mulf %846, %840 : vector<1x358xf32>
    %848 = arith.addf %831, %847 : vector<1x358xf32>
    %c189 = arith.constant 189 : index
    %849 = memref.load %arg3[%c189] : memref<308xf32, #tpu.memory_space<smem>>
    %850 = vector.broadcast %849 : f32 to vector<1x358xf32>
    %851 = arith.mulf %850, %840 : vector<1x358xf32>
    %852 = arith.addf %835, %851 : vector<1x358xf32>
    %c193 = arith.constant 193 : index
    %853 = memref.load %arg3[%c193] : memref<308xf32, #tpu.memory_space<smem>>
    %854 = vector.broadcast %853 : f32 to vector<1x358xf32>
    %855 = arith.mulf %854, %840 : vector<1x358xf32>
    %856 = arith.addf %839, %855 : vector<1x358xf32>
    %c2_152 = arith.constant 2 : index
    %c2_153 = arith.constant 2 : index
    %857 = vector.load %arg5[%c2_152, %c2_153] : memref<4x400xf32, #tpu.memory_space<vmem>>, vector<1x358xf32>
    %c182 = arith.constant 182 : index
    %858 = memref.load %arg3[%c182] : memref<308xf32, #tpu.memory_space<smem>>
    %859 = vector.broadcast %858 : f32 to vector<1x358xf32>
    %860 = arith.mulf %859, %857 : vector<1x358xf32>
    %861 = arith.addf %844, %860 : vector<1x358xf32>
    %c186 = arith.constant 186 : index
    %862 = memref.load %arg3[%c186] : memref<308xf32, #tpu.memory_space<smem>>
    %863 = vector.broadcast %862 : f32 to vector<1x358xf32>
    %864 = arith.mulf %863, %857 : vector<1x358xf32>
    %865 = arith.addf %848, %864 : vector<1x358xf32>
    %c190 = arith.constant 190 : index
    %866 = memref.load %arg3[%c190] : memref<308xf32, #tpu.memory_space<smem>>
    %867 = vector.broadcast %866 : f32 to vector<1x358xf32>
    %868 = arith.mulf %867, %857 : vector<1x358xf32>
    %869 = arith.addf %852, %868 : vector<1x358xf32>
    %c194 = arith.constant 194 : index
    %870 = memref.load %arg3[%c194] : memref<308xf32, #tpu.memory_space<smem>>
    %871 = vector.broadcast %870 : f32 to vector<1x358xf32>
    %872 = arith.mulf %871, %857 : vector<1x358xf32>
    %873 = arith.addf %856, %872 : vector<1x358xf32>
    %c3_154 = arith.constant 3 : index
    %c2_155 = arith.constant 2 : index
    %874 = vector.load %arg5[%c3_154, %c2_155] : memref<4x400xf32, #tpu.memory_space<vmem>>, vector<1x358xf32>
    %c183 = arith.constant 183 : index
    %875 = memref.load %arg3[%c183] : memref<308xf32, #tpu.memory_space<smem>>
    %876 = vector.broadcast %875 : f32 to vector<1x358xf32>
    %877 = arith.mulf %876, %874 : vector<1x358xf32>
    %878 = arith.addf %861, %877 : vector<1x358xf32>
    %c187 = arith.constant 187 : index
    %879 = memref.load %arg3[%c187] : memref<308xf32, #tpu.memory_space<smem>>
    %880 = vector.broadcast %879 : f32 to vector<1x358xf32>
    %881 = arith.mulf %880, %874 : vector<1x358xf32>
    %882 = arith.addf %865, %881 : vector<1x358xf32>
    %c191 = arith.constant 191 : index
    %883 = memref.load %arg3[%c191] : memref<308xf32, #tpu.memory_space<smem>>
    %884 = vector.broadcast %883 : f32 to vector<1x358xf32>
    %885 = arith.mulf %884, %874 : vector<1x358xf32>
    %886 = arith.addf %869, %885 : vector<1x358xf32>
    %c195 = arith.constant 195 : index
    %887 = memref.load %arg3[%c195] : memref<308xf32, #tpu.memory_space<smem>>
    %888 = vector.broadcast %887 : f32 to vector<1x358xf32>
    %889 = arith.mulf %888, %874 : vector<1x358xf32>
    %890 = arith.addf %873, %889 : vector<1x358xf32>
    %c0_156 = arith.constant 0 : index
    %c20_157 = arith.constant 20 : index
    %891 = vector.load %arg5[%c0_156, %c20_157] : memref<4x400xf32, #tpu.memory_space<vmem>>, vector<1x358xf32>
    %c196 = arith.constant 196 : index
    %892 = memref.load %arg3[%c196] : memref<308xf32, #tpu.memory_space<smem>>
    %893 = vector.broadcast %892 : f32 to vector<1x358xf32>
    %894 = arith.mulf %893, %891 : vector<1x358xf32>
    %895 = arith.addf %878, %894 : vector<1x358xf32>
    %c200 = arith.constant 200 : index
    %896 = memref.load %arg3[%c200] : memref<308xf32, #tpu.memory_space<smem>>
    %897 = vector.broadcast %896 : f32 to vector<1x358xf32>
    %898 = arith.mulf %897, %891 : vector<1x358xf32>
    %899 = arith.addf %882, %898 : vector<1x358xf32>
    %c204 = arith.constant 204 : index
    %900 = memref.load %arg3[%c204] : memref<308xf32, #tpu.memory_space<smem>>
    %901 = vector.broadcast %900 : f32 to vector<1x358xf32>
    %902 = arith.mulf %901, %891 : vector<1x358xf32>
    %903 = arith.addf %886, %902 : vector<1x358xf32>
    %c208 = arith.constant 208 : index
    %904 = memref.load %arg3[%c208] : memref<308xf32, #tpu.memory_space<smem>>
    %905 = vector.broadcast %904 : f32 to vector<1x358xf32>
    %906 = arith.mulf %905, %891 : vector<1x358xf32>
    %907 = arith.addf %890, %906 : vector<1x358xf32>
    %c1_158 = arith.constant 1 : index
    %c20_159 = arith.constant 20 : index
    %908 = vector.load %arg5[%c1_158, %c20_159] : memref<4x400xf32, #tpu.memory_space<vmem>>, vector<1x358xf32>
    %c197 = arith.constant 197 : index
    %909 = memref.load %arg3[%c197] : memref<308xf32, #tpu.memory_space<smem>>
    %910 = vector.broadcast %909 : f32 to vector<1x358xf32>
    %911 = arith.mulf %910, %908 : vector<1x358xf32>
    %912 = arith.addf %895, %911 : vector<1x358xf32>
    %c201 = arith.constant 201 : index
    %913 = memref.load %arg3[%c201] : memref<308xf32, #tpu.memory_space<smem>>
    %914 = vector.broadcast %913 : f32 to vector<1x358xf32>
    %915 = arith.mulf %914, %908 : vector<1x358xf32>
    %916 = arith.addf %899, %915 : vector<1x358xf32>
    %c205 = arith.constant 205 : index
    %917 = memref.load %arg3[%c205] : memref<308xf32, #tpu.memory_space<smem>>
    %918 = vector.broadcast %917 : f32 to vector<1x358xf32>
    %919 = arith.mulf %918, %908 : vector<1x358xf32>
    %920 = arith.addf %903, %919 : vector<1x358xf32>
    %c209 = arith.constant 209 : index
    %921 = memref.load %arg3[%c209] : memref<308xf32, #tpu.memory_space<smem>>
    %922 = vector.broadcast %921 : f32 to vector<1x358xf32>
    %923 = arith.mulf %922, %908 : vector<1x358xf32>
    %924 = arith.addf %907, %923 : vector<1x358xf32>
    %c2_160 = arith.constant 2 : index
    %c20_161 = arith.constant 20 : index
    %925 = vector.load %arg5[%c2_160, %c20_161] : memref<4x400xf32, #tpu.memory_space<vmem>>, vector<1x358xf32>
    %c198 = arith.constant 198 : index
    %926 = memref.load %arg3[%c198] : memref<308xf32, #tpu.memory_space<smem>>
    %927 = vector.broadcast %926 : f32 to vector<1x358xf32>
    %928 = arith.mulf %927, %925 : vector<1x358xf32>
    %929 = arith.addf %912, %928 : vector<1x358xf32>
    %c202 = arith.constant 202 : index
    %930 = memref.load %arg3[%c202] : memref<308xf32, #tpu.memory_space<smem>>
    %931 = vector.broadcast %930 : f32 to vector<1x358xf32>
    %932 = arith.mulf %931, %925 : vector<1x358xf32>
    %933 = arith.addf %916, %932 : vector<1x358xf32>
    %c206 = arith.constant 206 : index
    %934 = memref.load %arg3[%c206] : memref<308xf32, #tpu.memory_space<smem>>
    %935 = vector.broadcast %934 : f32 to vector<1x358xf32>
    %936 = arith.mulf %935, %925 : vector<1x358xf32>
    %937 = arith.addf %920, %936 : vector<1x358xf32>
    %c210 = arith.constant 210 : index
    %938 = memref.load %arg3[%c210] : memref<308xf32, #tpu.memory_space<smem>>
    %939 = vector.broadcast %938 : f32 to vector<1x358xf32>
    %940 = arith.mulf %939, %925 : vector<1x358xf32>
    %941 = arith.addf %924, %940 : vector<1x358xf32>
    %c3_162 = arith.constant 3 : index
    %c20_163 = arith.constant 20 : index
    %942 = vector.load %arg5[%c3_162, %c20_163] : memref<4x400xf32, #tpu.memory_space<vmem>>, vector<1x358xf32>
    %c199 = arith.constant 199 : index
    %943 = memref.load %arg3[%c199] : memref<308xf32, #tpu.memory_space<smem>>
    %944 = vector.broadcast %943 : f32 to vector<1x358xf32>
    %945 = arith.mulf %944, %942 : vector<1x358xf32>
    %946 = arith.addf %929, %945 : vector<1x358xf32>
    %c203 = arith.constant 203 : index
    %947 = memref.load %arg3[%c203] : memref<308xf32, #tpu.memory_space<smem>>
    %948 = vector.broadcast %947 : f32 to vector<1x358xf32>
    %949 = arith.mulf %948, %942 : vector<1x358xf32>
    %950 = arith.addf %933, %949 : vector<1x358xf32>
    %c207 = arith.constant 207 : index
    %951 = memref.load %arg3[%c207] : memref<308xf32, #tpu.memory_space<smem>>
    %952 = vector.broadcast %951 : f32 to vector<1x358xf32>
    %953 = arith.mulf %952, %942 : vector<1x358xf32>
    %954 = arith.addf %937, %953 : vector<1x358xf32>
    %c211 = arith.constant 211 : index
    %955 = memref.load %arg3[%c211] : memref<308xf32, #tpu.memory_space<smem>>
    %956 = vector.broadcast %955 : f32 to vector<1x358xf32>
    %957 = arith.mulf %956, %942 : vector<1x358xf32>
    %958 = arith.addf %941, %957 : vector<1x358xf32>
    %c0_164 = arith.constant 0 : index
    %c21_165 = arith.constant 21 : index
    %959 = vector.load %arg5[%c0_164, %c21_165] : memref<4x400xf32, #tpu.memory_space<vmem>>, vector<1x358xf32>
    %c212 = arith.constant 212 : index
    %960 = memref.load %arg3[%c212] : memref<308xf32, #tpu.memory_space<smem>>
    %961 = vector.broadcast %960 : f32 to vector<1x358xf32>
    %962 = arith.mulf %961, %959 : vector<1x358xf32>
    %963 = arith.addf %946, %962 : vector<1x358xf32>
    %c216 = arith.constant 216 : index
    %964 = memref.load %arg3[%c216] : memref<308xf32, #tpu.memory_space<smem>>
    %965 = vector.broadcast %964 : f32 to vector<1x358xf32>
    %966 = arith.mulf %965, %959 : vector<1x358xf32>
    %967 = arith.addf %950, %966 : vector<1x358xf32>
    %c220 = arith.constant 220 : index
    %968 = memref.load %arg3[%c220] : memref<308xf32, #tpu.memory_space<smem>>
    %969 = vector.broadcast %968 : f32 to vector<1x358xf32>
    %970 = arith.mulf %969, %959 : vector<1x358xf32>
    %971 = arith.addf %954, %970 : vector<1x358xf32>
    %c224 = arith.constant 224 : index
    %972 = memref.load %arg3[%c224] : memref<308xf32, #tpu.memory_space<smem>>
    %973 = vector.broadcast %972 : f32 to vector<1x358xf32>
    %974 = arith.mulf %973, %959 : vector<1x358xf32>
    %975 = arith.addf %958, %974 : vector<1x358xf32>
    %c1_166 = arith.constant 1 : index
    %c21_167 = arith.constant 21 : index
    %976 = vector.load %arg5[%c1_166, %c21_167] : memref<4x400xf32, #tpu.memory_space<vmem>>, vector<1x358xf32>
    %c213 = arith.constant 213 : index
    %977 = memref.load %arg3[%c213] : memref<308xf32, #tpu.memory_space<smem>>
    %978 = vector.broadcast %977 : f32 to vector<1x358xf32>
    %979 = arith.mulf %978, %976 : vector<1x358xf32>
    %980 = arith.addf %963, %979 : vector<1x358xf32>
    %c217 = arith.constant 217 : index
    %981 = memref.load %arg3[%c217] : memref<308xf32, #tpu.memory_space<smem>>
    %982 = vector.broadcast %981 : f32 to vector<1x358xf32>
    %983 = arith.mulf %982, %976 : vector<1x358xf32>
    %984 = arith.addf %967, %983 : vector<1x358xf32>
    %c221 = arith.constant 221 : index
    %985 = memref.load %arg3[%c221] : memref<308xf32, #tpu.memory_space<smem>>
    %986 = vector.broadcast %985 : f32 to vector<1x358xf32>
    %987 = arith.mulf %986, %976 : vector<1x358xf32>
    %988 = arith.addf %971, %987 : vector<1x358xf32>
    %c225 = arith.constant 225 : index
    %989 = memref.load %arg3[%c225] : memref<308xf32, #tpu.memory_space<smem>>
    %990 = vector.broadcast %989 : f32 to vector<1x358xf32>
    %991 = arith.mulf %990, %976 : vector<1x358xf32>
    %992 = arith.addf %975, %991 : vector<1x358xf32>
    %c2_168 = arith.constant 2 : index
    %c21_169 = arith.constant 21 : index
    %993 = vector.load %arg5[%c2_168, %c21_169] : memref<4x400xf32, #tpu.memory_space<vmem>>, vector<1x358xf32>
    %c214 = arith.constant 214 : index
    %994 = memref.load %arg3[%c214] : memref<308xf32, #tpu.memory_space<smem>>
    %995 = vector.broadcast %994 : f32 to vector<1x358xf32>
    %996 = arith.mulf %995, %993 : vector<1x358xf32>
    %997 = arith.addf %980, %996 : vector<1x358xf32>
    %c218 = arith.constant 218 : index
    %998 = memref.load %arg3[%c218] : memref<308xf32, #tpu.memory_space<smem>>
    %999 = vector.broadcast %998 : f32 to vector<1x358xf32>
    %1000 = arith.mulf %999, %993 : vector<1x358xf32>
    %1001 = arith.addf %984, %1000 : vector<1x358xf32>
    %c222 = arith.constant 222 : index
    %1002 = memref.load %arg3[%c222] : memref<308xf32, #tpu.memory_space<smem>>
    %1003 = vector.broadcast %1002 : f32 to vector<1x358xf32>
    %1004 = arith.mulf %1003, %993 : vector<1x358xf32>
    %1005 = arith.addf %988, %1004 : vector<1x358xf32>
    %c226 = arith.constant 226 : index
    %1006 = memref.load %arg3[%c226] : memref<308xf32, #tpu.memory_space<smem>>
    %1007 = vector.broadcast %1006 : f32 to vector<1x358xf32>
    %1008 = arith.mulf %1007, %993 : vector<1x358xf32>
    %1009 = arith.addf %992, %1008 : vector<1x358xf32>
    %c3_170 = arith.constant 3 : index
    %c21_171 = arith.constant 21 : index
    %1010 = vector.load %arg5[%c3_170, %c21_171] : memref<4x400xf32, #tpu.memory_space<vmem>>, vector<1x358xf32>
    %c215 = arith.constant 215 : index
    %1011 = memref.load %arg3[%c215] : memref<308xf32, #tpu.memory_space<smem>>
    %1012 = vector.broadcast %1011 : f32 to vector<1x358xf32>
    %1013 = arith.mulf %1012, %1010 : vector<1x358xf32>
    %1014 = arith.addf %997, %1013 : vector<1x358xf32>
    %c219 = arith.constant 219 : index
    %1015 = memref.load %arg3[%c219] : memref<308xf32, #tpu.memory_space<smem>>
    %1016 = vector.broadcast %1015 : f32 to vector<1x358xf32>
    %1017 = arith.mulf %1016, %1010 : vector<1x358xf32>
    %1018 = arith.addf %1001, %1017 : vector<1x358xf32>
    %c223 = arith.constant 223 : index
    %1019 = memref.load %arg3[%c223] : memref<308xf32, #tpu.memory_space<smem>>
    %1020 = vector.broadcast %1019 : f32 to vector<1x358xf32>
    %1021 = arith.mulf %1020, %1010 : vector<1x358xf32>
    %1022 = arith.addf %1005, %1021 : vector<1x358xf32>
    %c227 = arith.constant 227 : index
    %1023 = memref.load %arg3[%c227] : memref<308xf32, #tpu.memory_space<smem>>
    %1024 = vector.broadcast %1023 : f32 to vector<1x358xf32>
    %1025 = arith.mulf %1024, %1010 : vector<1x358xf32>
    %1026 = arith.addf %1009, %1025 : vector<1x358xf32>
    %c0_172 = arith.constant 0 : index
    %c22_173 = arith.constant 22 : index
    %1027 = vector.load %arg5[%c0_172, %c22_173] : memref<4x400xf32, #tpu.memory_space<vmem>>, vector<1x358xf32>
    %c228 = arith.constant 228 : index
    %1028 = memref.load %arg3[%c228] : memref<308xf32, #tpu.memory_space<smem>>
    %1029 = vector.broadcast %1028 : f32 to vector<1x358xf32>
    %1030 = arith.mulf %1029, %1027 : vector<1x358xf32>
    %1031 = arith.addf %1014, %1030 : vector<1x358xf32>
    %c232 = arith.constant 232 : index
    %1032 = memref.load %arg3[%c232] : memref<308xf32, #tpu.memory_space<smem>>
    %1033 = vector.broadcast %1032 : f32 to vector<1x358xf32>
    %1034 = arith.mulf %1033, %1027 : vector<1x358xf32>
    %1035 = arith.addf %1018, %1034 : vector<1x358xf32>
    %c236 = arith.constant 236 : index
    %1036 = memref.load %arg3[%c236] : memref<308xf32, #tpu.memory_space<smem>>
    %1037 = vector.broadcast %1036 : f32 to vector<1x358xf32>
    %1038 = arith.mulf %1037, %1027 : vector<1x358xf32>
    %1039 = arith.addf %1022, %1038 : vector<1x358xf32>
    %c240 = arith.constant 240 : index
    %1040 = memref.load %arg3[%c240] : memref<308xf32, #tpu.memory_space<smem>>
    %1041 = vector.broadcast %1040 : f32 to vector<1x358xf32>
    %1042 = arith.mulf %1041, %1027 : vector<1x358xf32>
    %1043 = arith.addf %1026, %1042 : vector<1x358xf32>
    %c1_174 = arith.constant 1 : index
    %c22_175 = arith.constant 22 : index
    %1044 = vector.load %arg5[%c1_174, %c22_175] : memref<4x400xf32, #tpu.memory_space<vmem>>, vector<1x358xf32>
    %c229 = arith.constant 229 : index
    %1045 = memref.load %arg3[%c229] : memref<308xf32, #tpu.memory_space<smem>>
    %1046 = vector.broadcast %1045 : f32 to vector<1x358xf32>
    %1047 = arith.mulf %1046, %1044 : vector<1x358xf32>
    %1048 = arith.addf %1031, %1047 : vector<1x358xf32>
    %c233 = arith.constant 233 : index
    %1049 = memref.load %arg3[%c233] : memref<308xf32, #tpu.memory_space<smem>>
    %1050 = vector.broadcast %1049 : f32 to vector<1x358xf32>
    %1051 = arith.mulf %1050, %1044 : vector<1x358xf32>
    %1052 = arith.addf %1035, %1051 : vector<1x358xf32>
    %c237 = arith.constant 237 : index
    %1053 = memref.load %arg3[%c237] : memref<308xf32, #tpu.memory_space<smem>>
    %1054 = vector.broadcast %1053 : f32 to vector<1x358xf32>
    %1055 = arith.mulf %1054, %1044 : vector<1x358xf32>
    %1056 = arith.addf %1039, %1055 : vector<1x358xf32>
    %c241 = arith.constant 241 : index
    %1057 = memref.load %arg3[%c241] : memref<308xf32, #tpu.memory_space<smem>>
    %1058 = vector.broadcast %1057 : f32 to vector<1x358xf32>
    %1059 = arith.mulf %1058, %1044 : vector<1x358xf32>
    %1060 = arith.addf %1043, %1059 : vector<1x358xf32>
    %c2_176 = arith.constant 2 : index
    %c22_177 = arith.constant 22 : index
    %1061 = vector.load %arg5[%c2_176, %c22_177] : memref<4x400xf32, #tpu.memory_space<vmem>>, vector<1x358xf32>
    %c230 = arith.constant 230 : index
    %1062 = memref.load %arg3[%c230] : memref<308xf32, #tpu.memory_space<smem>>
    %1063 = vector.broadcast %1062 : f32 to vector<1x358xf32>
    %1064 = arith.mulf %1063, %1061 : vector<1x358xf32>
    %1065 = arith.addf %1048, %1064 : vector<1x358xf32>
    %c234 = arith.constant 234 : index
    %1066 = memref.load %arg3[%c234] : memref<308xf32, #tpu.memory_space<smem>>
    %1067 = vector.broadcast %1066 : f32 to vector<1x358xf32>
    %1068 = arith.mulf %1067, %1061 : vector<1x358xf32>
    %1069 = arith.addf %1052, %1068 : vector<1x358xf32>
    %c238 = arith.constant 238 : index
    %1070 = memref.load %arg3[%c238] : memref<308xf32, #tpu.memory_space<smem>>
    %1071 = vector.broadcast %1070 : f32 to vector<1x358xf32>
    %1072 = arith.mulf %1071, %1061 : vector<1x358xf32>
    %1073 = arith.addf %1056, %1072 : vector<1x358xf32>
    %c242 = arith.constant 242 : index
    %1074 = memref.load %arg3[%c242] : memref<308xf32, #tpu.memory_space<smem>>
    %1075 = vector.broadcast %1074 : f32 to vector<1x358xf32>
    %1076 = arith.mulf %1075, %1061 : vector<1x358xf32>
    %1077 = arith.addf %1060, %1076 : vector<1x358xf32>
    %c3_178 = arith.constant 3 : index
    %c22_179 = arith.constant 22 : index
    %1078 = vector.load %arg5[%c3_178, %c22_179] : memref<4x400xf32, #tpu.memory_space<vmem>>, vector<1x358xf32>
    %c231 = arith.constant 231 : index
    %1079 = memref.load %arg3[%c231] : memref<308xf32, #tpu.memory_space<smem>>
    %1080 = vector.broadcast %1079 : f32 to vector<1x358xf32>
    %1081 = arith.mulf %1080, %1078 : vector<1x358xf32>
    %1082 = arith.addf %1065, %1081 : vector<1x358xf32>
    %c235 = arith.constant 235 : index
    %1083 = memref.load %arg3[%c235] : memref<308xf32, #tpu.memory_space<smem>>
    %1084 = vector.broadcast %1083 : f32 to vector<1x358xf32>
    %1085 = arith.mulf %1084, %1078 : vector<1x358xf32>
    %1086 = arith.addf %1069, %1085 : vector<1x358xf32>
    %c239 = arith.constant 239 : index
    %1087 = memref.load %arg3[%c239] : memref<308xf32, #tpu.memory_space<smem>>
    %1088 = vector.broadcast %1087 : f32 to vector<1x358xf32>
    %1089 = arith.mulf %1088, %1078 : vector<1x358xf32>
    %1090 = arith.addf %1073, %1089 : vector<1x358xf32>
    %c243 = arith.constant 243 : index
    %1091 = memref.load %arg3[%c243] : memref<308xf32, #tpu.memory_space<smem>>
    %1092 = vector.broadcast %1091 : f32 to vector<1x358xf32>
    %1093 = arith.mulf %1092, %1078 : vector<1x358xf32>
    %1094 = arith.addf %1077, %1093 : vector<1x358xf32>
    %c0_180 = arith.constant 0 : index
    %c40_181 = arith.constant 40 : index
    %1095 = vector.load %arg5[%c0_180, %c40_181] : memref<4x400xf32, #tpu.memory_space<vmem>>, vector<1x358xf32>
    %c244 = arith.constant 244 : index
    %1096 = memref.load %arg3[%c244] : memref<308xf32, #tpu.memory_space<smem>>
    %1097 = vector.broadcast %1096 : f32 to vector<1x358xf32>
    %1098 = arith.mulf %1097, %1095 : vector<1x358xf32>
    %1099 = arith.addf %1082, %1098 : vector<1x358xf32>
    %c248 = arith.constant 248 : index
    %1100 = memref.load %arg3[%c248] : memref<308xf32, #tpu.memory_space<smem>>
    %1101 = vector.broadcast %1100 : f32 to vector<1x358xf32>
    %1102 = arith.mulf %1101, %1095 : vector<1x358xf32>
    %1103 = arith.addf %1086, %1102 : vector<1x358xf32>
    %c252 = arith.constant 252 : index
    %1104 = memref.load %arg3[%c252] : memref<308xf32, #tpu.memory_space<smem>>
    %1105 = vector.broadcast %1104 : f32 to vector<1x358xf32>
    %1106 = arith.mulf %1105, %1095 : vector<1x358xf32>
    %1107 = arith.addf %1090, %1106 : vector<1x358xf32>
    %c256 = arith.constant 256 : index
    %1108 = memref.load %arg3[%c256] : memref<308xf32, #tpu.memory_space<smem>>
    %1109 = vector.broadcast %1108 : f32 to vector<1x358xf32>
    %1110 = arith.mulf %1109, %1095 : vector<1x358xf32>
    %1111 = arith.addf %1094, %1110 : vector<1x358xf32>
    %c1_182 = arith.constant 1 : index
    %c40_183 = arith.constant 40 : index
    %1112 = vector.load %arg5[%c1_182, %c40_183] : memref<4x400xf32, #tpu.memory_space<vmem>>, vector<1x358xf32>
    %c245 = arith.constant 245 : index
    %1113 = memref.load %arg3[%c245] : memref<308xf32, #tpu.memory_space<smem>>
    %1114 = vector.broadcast %1113 : f32 to vector<1x358xf32>
    %1115 = arith.mulf %1114, %1112 : vector<1x358xf32>
    %1116 = arith.addf %1099, %1115 : vector<1x358xf32>
    %c249 = arith.constant 249 : index
    %1117 = memref.load %arg3[%c249] : memref<308xf32, #tpu.memory_space<smem>>
    %1118 = vector.broadcast %1117 : f32 to vector<1x358xf32>
    %1119 = arith.mulf %1118, %1112 : vector<1x358xf32>
    %1120 = arith.addf %1103, %1119 : vector<1x358xf32>
    %c253 = arith.constant 253 : index
    %1121 = memref.load %arg3[%c253] : memref<308xf32, #tpu.memory_space<smem>>
    %1122 = vector.broadcast %1121 : f32 to vector<1x358xf32>
    %1123 = arith.mulf %1122, %1112 : vector<1x358xf32>
    %1124 = arith.addf %1107, %1123 : vector<1x358xf32>
    %c257 = arith.constant 257 : index
    %1125 = memref.load %arg3[%c257] : memref<308xf32, #tpu.memory_space<smem>>
    %1126 = vector.broadcast %1125 : f32 to vector<1x358xf32>
    %1127 = arith.mulf %1126, %1112 : vector<1x358xf32>
    %1128 = arith.addf %1111, %1127 : vector<1x358xf32>
    %c2_184 = arith.constant 2 : index
    %c40_185 = arith.constant 40 : index
    %1129 = vector.load %arg5[%c2_184, %c40_185] : memref<4x400xf32, #tpu.memory_space<vmem>>, vector<1x358xf32>
    %c246 = arith.constant 246 : index
    %1130 = memref.load %arg3[%c246] : memref<308xf32, #tpu.memory_space<smem>>
    %1131 = vector.broadcast %1130 : f32 to vector<1x358xf32>
    %1132 = arith.mulf %1131, %1129 : vector<1x358xf32>
    %1133 = arith.addf %1116, %1132 : vector<1x358xf32>
    %c250 = arith.constant 250 : index
    %1134 = memref.load %arg3[%c250] : memref<308xf32, #tpu.memory_space<smem>>
    %1135 = vector.broadcast %1134 : f32 to vector<1x358xf32>
    %1136 = arith.mulf %1135, %1129 : vector<1x358xf32>
    %1137 = arith.addf %1120, %1136 : vector<1x358xf32>
    %c254 = arith.constant 254 : index
    %1138 = memref.load %arg3[%c254] : memref<308xf32, #tpu.memory_space<smem>>
    %1139 = vector.broadcast %1138 : f32 to vector<1x358xf32>
    %1140 = arith.mulf %1139, %1129 : vector<1x358xf32>
    %1141 = arith.addf %1124, %1140 : vector<1x358xf32>
    %c258 = arith.constant 258 : index
    %1142 = memref.load %arg3[%c258] : memref<308xf32, #tpu.memory_space<smem>>
    %1143 = vector.broadcast %1142 : f32 to vector<1x358xf32>
    %1144 = arith.mulf %1143, %1129 : vector<1x358xf32>
    %1145 = arith.addf %1128, %1144 : vector<1x358xf32>
    %c3_186 = arith.constant 3 : index
    %c40_187 = arith.constant 40 : index
    %1146 = vector.load %arg5[%c3_186, %c40_187] : memref<4x400xf32, #tpu.memory_space<vmem>>, vector<1x358xf32>
    %c247 = arith.constant 247 : index
    %1147 = memref.load %arg3[%c247] : memref<308xf32, #tpu.memory_space<smem>>
    %1148 = vector.broadcast %1147 : f32 to vector<1x358xf32>
    %1149 = arith.mulf %1148, %1146 : vector<1x358xf32>
    %1150 = arith.addf %1133, %1149 : vector<1x358xf32>
    %c251 = arith.constant 251 : index
    %1151 = memref.load %arg3[%c251] : memref<308xf32, #tpu.memory_space<smem>>
    %1152 = vector.broadcast %1151 : f32 to vector<1x358xf32>
    %1153 = arith.mulf %1152, %1146 : vector<1x358xf32>
    %1154 = arith.addf %1137, %1153 : vector<1x358xf32>
    %c255 = arith.constant 255 : index
    %1155 = memref.load %arg3[%c255] : memref<308xf32, #tpu.memory_space<smem>>
    %1156 = vector.broadcast %1155 : f32 to vector<1x358xf32>
    %1157 = arith.mulf %1156, %1146 : vector<1x358xf32>
    %1158 = arith.addf %1141, %1157 : vector<1x358xf32>
    %c259 = arith.constant 259 : index
    %1159 = memref.load %arg3[%c259] : memref<308xf32, #tpu.memory_space<smem>>
    %1160 = vector.broadcast %1159 : f32 to vector<1x358xf32>
    %1161 = arith.mulf %1160, %1146 : vector<1x358xf32>
    %1162 = arith.addf %1145, %1161 : vector<1x358xf32>
    %c0_188 = arith.constant 0 : index
    %c41_189 = arith.constant 41 : index
    %1163 = vector.load %arg5[%c0_188, %c41_189] : memref<4x400xf32, #tpu.memory_space<vmem>>, vector<1x358xf32>
    %c260 = arith.constant 260 : index
    %1164 = memref.load %arg3[%c260] : memref<308xf32, #tpu.memory_space<smem>>
    %1165 = vector.broadcast %1164 : f32 to vector<1x358xf32>
    %1166 = arith.mulf %1165, %1163 : vector<1x358xf32>
    %1167 = arith.addf %1150, %1166 : vector<1x358xf32>
    %c264 = arith.constant 264 : index
    %1168 = memref.load %arg3[%c264] : memref<308xf32, #tpu.memory_space<smem>>
    %1169 = vector.broadcast %1168 : f32 to vector<1x358xf32>
    %1170 = arith.mulf %1169, %1163 : vector<1x358xf32>
    %1171 = arith.addf %1154, %1170 : vector<1x358xf32>
    %c268 = arith.constant 268 : index
    %1172 = memref.load %arg3[%c268] : memref<308xf32, #tpu.memory_space<smem>>
    %1173 = vector.broadcast %1172 : f32 to vector<1x358xf32>
    %1174 = arith.mulf %1173, %1163 : vector<1x358xf32>
    %1175 = arith.addf %1158, %1174 : vector<1x358xf32>
    %c272 = arith.constant 272 : index
    %1176 = memref.load %arg3[%c272] : memref<308xf32, #tpu.memory_space<smem>>
    %1177 = vector.broadcast %1176 : f32 to vector<1x358xf32>
    %1178 = arith.mulf %1177, %1163 : vector<1x358xf32>
    %1179 = arith.addf %1162, %1178 : vector<1x358xf32>
    %c1_190 = arith.constant 1 : index
    %c41_191 = arith.constant 41 : index
    %1180 = vector.load %arg5[%c1_190, %c41_191] : memref<4x400xf32, #tpu.memory_space<vmem>>, vector<1x358xf32>
    %c261 = arith.constant 261 : index
    %1181 = memref.load %arg3[%c261] : memref<308xf32, #tpu.memory_space<smem>>
    %1182 = vector.broadcast %1181 : f32 to vector<1x358xf32>
    %1183 = arith.mulf %1182, %1180 : vector<1x358xf32>
    %1184 = arith.addf %1167, %1183 : vector<1x358xf32>
    %c265 = arith.constant 265 : index
    %1185 = memref.load %arg3[%c265] : memref<308xf32, #tpu.memory_space<smem>>
    %1186 = vector.broadcast %1185 : f32 to vector<1x358xf32>
    %1187 = arith.mulf %1186, %1180 : vector<1x358xf32>
    %1188 = arith.addf %1171, %1187 : vector<1x358xf32>
    %c269 = arith.constant 269 : index
    %1189 = memref.load %arg3[%c269] : memref<308xf32, #tpu.memory_space<smem>>
    %1190 = vector.broadcast %1189 : f32 to vector<1x358xf32>
    %1191 = arith.mulf %1190, %1180 : vector<1x358xf32>
    %1192 = arith.addf %1175, %1191 : vector<1x358xf32>
    %c273 = arith.constant 273 : index
    %1193 = memref.load %arg3[%c273] : memref<308xf32, #tpu.memory_space<smem>>
    %1194 = vector.broadcast %1193 : f32 to vector<1x358xf32>
    %1195 = arith.mulf %1194, %1180 : vector<1x358xf32>
    %1196 = arith.addf %1179, %1195 : vector<1x358xf32>
    %c2_192 = arith.constant 2 : index
    %c41_193 = arith.constant 41 : index
    %1197 = vector.load %arg5[%c2_192, %c41_193] : memref<4x400xf32, #tpu.memory_space<vmem>>, vector<1x358xf32>
    %c262 = arith.constant 262 : index
    %1198 = memref.load %arg3[%c262] : memref<308xf32, #tpu.memory_space<smem>>
    %1199 = vector.broadcast %1198 : f32 to vector<1x358xf32>
    %1200 = arith.mulf %1199, %1197 : vector<1x358xf32>
    %1201 = arith.addf %1184, %1200 : vector<1x358xf32>
    %c266 = arith.constant 266 : index
    %1202 = memref.load %arg3[%c266] : memref<308xf32, #tpu.memory_space<smem>>
    %1203 = vector.broadcast %1202 : f32 to vector<1x358xf32>
    %1204 = arith.mulf %1203, %1197 : vector<1x358xf32>
    %1205 = arith.addf %1188, %1204 : vector<1x358xf32>
    %c270 = arith.constant 270 : index
    %1206 = memref.load %arg3[%c270] : memref<308xf32, #tpu.memory_space<smem>>
    %1207 = vector.broadcast %1206 : f32 to vector<1x358xf32>
    %1208 = arith.mulf %1207, %1197 : vector<1x358xf32>
    %1209 = arith.addf %1192, %1208 : vector<1x358xf32>
    %c274 = arith.constant 274 : index
    %1210 = memref.load %arg3[%c274] : memref<308xf32, #tpu.memory_space<smem>>
    %1211 = vector.broadcast %1210 : f32 to vector<1x358xf32>
    %1212 = arith.mulf %1211, %1197 : vector<1x358xf32>
    %1213 = arith.addf %1196, %1212 : vector<1x358xf32>
    %c3_194 = arith.constant 3 : index
    %c41_195 = arith.constant 41 : index
    %1214 = vector.load %arg5[%c3_194, %c41_195] : memref<4x400xf32, #tpu.memory_space<vmem>>, vector<1x358xf32>
    %c263 = arith.constant 263 : index
    %1215 = memref.load %arg3[%c263] : memref<308xf32, #tpu.memory_space<smem>>
    %1216 = vector.broadcast %1215 : f32 to vector<1x358xf32>
    %1217 = arith.mulf %1216, %1214 : vector<1x358xf32>
    %1218 = arith.addf %1201, %1217 : vector<1x358xf32>
    %c267 = arith.constant 267 : index
    %1219 = memref.load %arg3[%c267] : memref<308xf32, #tpu.memory_space<smem>>
    %1220 = vector.broadcast %1219 : f32 to vector<1x358xf32>
    %1221 = arith.mulf %1220, %1214 : vector<1x358xf32>
    %1222 = arith.addf %1205, %1221 : vector<1x358xf32>
    %c271 = arith.constant 271 : index
    %1223 = memref.load %arg3[%c271] : memref<308xf32, #tpu.memory_space<smem>>
    %1224 = vector.broadcast %1223 : f32 to vector<1x358xf32>
    %1225 = arith.mulf %1224, %1214 : vector<1x358xf32>
    %1226 = arith.addf %1209, %1225 : vector<1x358xf32>
    %c275 = arith.constant 275 : index
    %1227 = memref.load %arg3[%c275] : memref<308xf32, #tpu.memory_space<smem>>
    %1228 = vector.broadcast %1227 : f32 to vector<1x358xf32>
    %1229 = arith.mulf %1228, %1214 : vector<1x358xf32>
    %1230 = arith.addf %1213, %1229 : vector<1x358xf32>
    %c0_196 = arith.constant 0 : index
    %c42_197 = arith.constant 42 : index
    %1231 = vector.load %arg5[%c0_196, %c42_197] : memref<4x400xf32, #tpu.memory_space<vmem>>, vector<1x358xf32>
    %c276 = arith.constant 276 : index
    %1232 = memref.load %arg3[%c276] : memref<308xf32, #tpu.memory_space<smem>>
    %1233 = vector.broadcast %1232 : f32 to vector<1x358xf32>
    %1234 = arith.mulf %1233, %1231 : vector<1x358xf32>
    %1235 = arith.addf %1218, %1234 : vector<1x358xf32>
    %c280 = arith.constant 280 : index
    %1236 = memref.load %arg3[%c280] : memref<308xf32, #tpu.memory_space<smem>>
    %1237 = vector.broadcast %1236 : f32 to vector<1x358xf32>
    %1238 = arith.mulf %1237, %1231 : vector<1x358xf32>
    %1239 = arith.addf %1222, %1238 : vector<1x358xf32>
    %c284 = arith.constant 284 : index
    %1240 = memref.load %arg3[%c284] : memref<308xf32, #tpu.memory_space<smem>>
    %1241 = vector.broadcast %1240 : f32 to vector<1x358xf32>
    %1242 = arith.mulf %1241, %1231 : vector<1x358xf32>
    %1243 = arith.addf %1226, %1242 : vector<1x358xf32>
    %c288 = arith.constant 288 : index
    %1244 = memref.load %arg3[%c288] : memref<308xf32, #tpu.memory_space<smem>>
    %1245 = vector.broadcast %1244 : f32 to vector<1x358xf32>
    %1246 = arith.mulf %1245, %1231 : vector<1x358xf32>
    %1247 = arith.addf %1230, %1246 : vector<1x358xf32>
    %c1_198 = arith.constant 1 : index
    %c42_199 = arith.constant 42 : index
    %1248 = vector.load %arg5[%c1_198, %c42_199] : memref<4x400xf32, #tpu.memory_space<vmem>>, vector<1x358xf32>
    %c277 = arith.constant 277 : index
    %1249 = memref.load %arg3[%c277] : memref<308xf32, #tpu.memory_space<smem>>
    %1250 = vector.broadcast %1249 : f32 to vector<1x358xf32>
    %1251 = arith.mulf %1250, %1248 : vector<1x358xf32>
    %1252 = arith.addf %1235, %1251 : vector<1x358xf32>
    %c281 = arith.constant 281 : index
    %1253 = memref.load %arg3[%c281] : memref<308xf32, #tpu.memory_space<smem>>
    %1254 = vector.broadcast %1253 : f32 to vector<1x358xf32>
    %1255 = arith.mulf %1254, %1248 : vector<1x358xf32>
    %1256 = arith.addf %1239, %1255 : vector<1x358xf32>
    %c285 = arith.constant 285 : index
    %1257 = memref.load %arg3[%c285] : memref<308xf32, #tpu.memory_space<smem>>
    %1258 = vector.broadcast %1257 : f32 to vector<1x358xf32>
    %1259 = arith.mulf %1258, %1248 : vector<1x358xf32>
    %1260 = arith.addf %1243, %1259 : vector<1x358xf32>
    %c289 = arith.constant 289 : index
    %1261 = memref.load %arg3[%c289] : memref<308xf32, #tpu.memory_space<smem>>
    %1262 = vector.broadcast %1261 : f32 to vector<1x358xf32>
    %1263 = arith.mulf %1262, %1248 : vector<1x358xf32>
    %1264 = arith.addf %1247, %1263 : vector<1x358xf32>
    %c2_200 = arith.constant 2 : index
    %c42_201 = arith.constant 42 : index
    %1265 = vector.load %arg5[%c2_200, %c42_201] : memref<4x400xf32, #tpu.memory_space<vmem>>, vector<1x358xf32>
    %c278 = arith.constant 278 : index
    %1266 = memref.load %arg3[%c278] : memref<308xf32, #tpu.memory_space<smem>>
    %1267 = vector.broadcast %1266 : f32 to vector<1x358xf32>
    %1268 = arith.mulf %1267, %1265 : vector<1x358xf32>
    %1269 = arith.addf %1252, %1268 : vector<1x358xf32>
    %c282 = arith.constant 282 : index
    %1270 = memref.load %arg3[%c282] : memref<308xf32, #tpu.memory_space<smem>>
    %1271 = vector.broadcast %1270 : f32 to vector<1x358xf32>
    %1272 = arith.mulf %1271, %1265 : vector<1x358xf32>
    %1273 = arith.addf %1256, %1272 : vector<1x358xf32>
    %c286 = arith.constant 286 : index
    %1274 = memref.load %arg3[%c286] : memref<308xf32, #tpu.memory_space<smem>>
    %1275 = vector.broadcast %1274 : f32 to vector<1x358xf32>
    %1276 = arith.mulf %1275, %1265 : vector<1x358xf32>
    %1277 = arith.addf %1260, %1276 : vector<1x358xf32>
    %c290 = arith.constant 290 : index
    %1278 = memref.load %arg3[%c290] : memref<308xf32, #tpu.memory_space<smem>>
    %1279 = vector.broadcast %1278 : f32 to vector<1x358xf32>
    %1280 = arith.mulf %1279, %1265 : vector<1x358xf32>
    %1281 = arith.addf %1264, %1280 : vector<1x358xf32>
    %c3_202 = arith.constant 3 : index
    %c42_203 = arith.constant 42 : index
    %1282 = vector.load %arg5[%c3_202, %c42_203] : memref<4x400xf32, #tpu.memory_space<vmem>>, vector<1x358xf32>
    %c279 = arith.constant 279 : index
    %1283 = memref.load %arg3[%c279] : memref<308xf32, #tpu.memory_space<smem>>
    %1284 = vector.broadcast %1283 : f32 to vector<1x358xf32>
    %1285 = arith.mulf %1284, %1282 : vector<1x358xf32>
    %1286 = arith.addf %1269, %1285 : vector<1x358xf32>
    %c283 = arith.constant 283 : index
    %1287 = memref.load %arg3[%c283] : memref<308xf32, #tpu.memory_space<smem>>
    %1288 = vector.broadcast %1287 : f32 to vector<1x358xf32>
    %1289 = arith.mulf %1288, %1282 : vector<1x358xf32>
    %1290 = arith.addf %1273, %1289 : vector<1x358xf32>
    %c287 = arith.constant 287 : index
    %1291 = memref.load %arg3[%c287] : memref<308xf32, #tpu.memory_space<smem>>
    %1292 = vector.broadcast %1291 : f32 to vector<1x358xf32>
    %1293 = arith.mulf %1292, %1282 : vector<1x358xf32>
    %1294 = arith.addf %1277, %1293 : vector<1x358xf32>
    %c291 = arith.constant 291 : index
    %1295 = memref.load %arg3[%c291] : memref<308xf32, #tpu.memory_space<smem>>
    %1296 = vector.broadcast %1295 : f32 to vector<1x358xf32>
    %1297 = arith.mulf %1296, %1282 : vector<1x358xf32>
    %1298 = arith.addf %1281, %1297 : vector<1x358xf32>
    %c292 = arith.constant 292 : index
    %1299 = memref.load %arg3[%c292] : memref<308xf32, #tpu.memory_space<smem>>
    %1300 = vector.broadcast %1299 : f32 to vector<1x358xf32>
    %1301 = arith.addf %1286, %1300 : vector<1x358xf32>
    %cst_204 = arith.constant 0.000000e+00 : f32
    %1302 = vector.broadcast %cst_204 : f32 to vector<1x358xf32>
    %1303 = arith.maximumf %1301, %1302 : vector<1x358xf32>
    %c293 = arith.constant 293 : index
    %1304 = memref.load %arg3[%c293] : memref<308xf32, #tpu.memory_space<smem>>
    %1305 = vector.broadcast %1304 : f32 to vector<1x358xf32>
    %1306 = arith.addf %1290, %1305 : vector<1x358xf32>
    %cst_205 = arith.constant 0.000000e+00 : f32
    %1307 = vector.broadcast %cst_205 : f32 to vector<1x358xf32>
    %1308 = arith.maximumf %1306, %1307 : vector<1x358xf32>
    %c294 = arith.constant 294 : index
    %1309 = memref.load %arg3[%c294] : memref<308xf32, #tpu.memory_space<smem>>
    %1310 = vector.broadcast %1309 : f32 to vector<1x358xf32>
    %1311 = arith.addf %1294, %1310 : vector<1x358xf32>
    %cst_206 = arith.constant 0.000000e+00 : f32
    %1312 = vector.broadcast %cst_206 : f32 to vector<1x358xf32>
    %1313 = arith.maximumf %1311, %1312 : vector<1x358xf32>
    %c295 = arith.constant 295 : index
    %1314 = memref.load %arg3[%c295] : memref<308xf32, #tpu.memory_space<smem>>
    %1315 = vector.broadcast %1314 : f32 to vector<1x358xf32>
    %1316 = arith.addf %1298, %1315 : vector<1x358xf32>
    %cst_207 = arith.constant 0.000000e+00 : f32
    %1317 = vector.broadcast %cst_207 : f32 to vector<1x358xf32>
    %1318 = arith.maximumf %1316, %1317 : vector<1x358xf32>
    %c296 = arith.constant 296 : index
    %1319 = memref.load %arg3[%c296] : memref<308xf32, #tpu.memory_space<smem>>
    %1320 = vector.broadcast %1319 : f32 to vector<1x358xf32>
    %1321 = arith.mulf %1320, %1303 : vector<1x358xf32>
    %c297 = arith.constant 297 : index
    %1322 = memref.load %arg3[%c297] : memref<308xf32, #tpu.memory_space<smem>>
    %1323 = vector.broadcast %1322 : f32 to vector<1x358xf32>
    %1324 = arith.mulf %1323, %1308 : vector<1x358xf32>
    %1325 = arith.addf %1321, %1324 : vector<1x358xf32>
    %c298 = arith.constant 298 : index
    %1326 = memref.load %arg3[%c298] : memref<308xf32, #tpu.memory_space<smem>>
    %1327 = vector.broadcast %1326 : f32 to vector<1x358xf32>
    %1328 = arith.mulf %1327, %1313 : vector<1x358xf32>
    %1329 = arith.addf %1325, %1328 : vector<1x358xf32>
    %c299 = arith.constant 299 : index
    %1330 = memref.load %arg3[%c299] : memref<308xf32, #tpu.memory_space<smem>>
    %1331 = vector.broadcast %1330 : f32 to vector<1x358xf32>
    %1332 = arith.mulf %1331, %1318 : vector<1x358xf32>
    %1333 = arith.addf %1329, %1332 : vector<1x358xf32>
    %cst_208 = arith.constant 0.000000e+00 : f32
    %1334 = vector.broadcast %cst_208 : f32 to vector<1x358xf32>
    %1335 = arith.subf %1334, %1333 : vector<1x358xf32>
    %1336 = math.exp %1335 : vector<1x358xf32>
    %cst_209 = arith.constant 1.000000e+00 : f32
    %1337 = vector.broadcast %cst_209 : f32 to vector<1x358xf32>
    %1338 = arith.addf %1337, %1336 : vector<1x358xf32>
    %1339 = tpu.reciprocal %1338 {approx = true} : vector<1x358xf32> -> vector<1x358xf32>
    %c0_210 = arith.constant 0 : index
    %c0_211 = arith.constant 0 : index
    %c21_212 = arith.constant 21 : index
    %1340 = vector.load %arg1[%c0_210, %c0_211, %c21_212] : memref<1x4x400xf32, #tpu.memory_space<vmem>>, vector<1x1x358xf32>
    %1341 = vector.shape_cast %1340 : vector<1x1x358xf32> to vector<1x358xf32>
    %c300 = arith.constant 300 : index
    %1342 = memref.load %arg3[%c300] : memref<308xf32, #tpu.memory_space<smem>>
    %1343 = arith.mulf %1341, %1339 : vector<1x358xf32>
    %1344 = vector.broadcast %1342 : f32 to vector<1x358xf32>
    %1345 = arith.mulf %1344, %1343 : vector<1x358xf32>
    %c304 = arith.constant 304 : index
    %1346 = memref.load %arg3[%c304] : memref<308xf32, #tpu.memory_space<smem>>
    %1347 = vector.broadcast %1346 : f32 to vector<1x358xf32>
    %1348 = arith.addf %1345, %1347 : vector<1x358xf32>
    %cst_213 = arith.constant 0.000000e+00 : f32
    %1349 = vector.broadcast %cst_213 : f32 to vector<1x358xf32>
    %1350 = arith.maximumf %1348, %1349 : vector<1x358xf32>
    %c0_214 = arith.constant 0 : index
    %c0_215 = arith.constant 0 : index
    %1351 = vector.load %arg6[%c0_214, %c0_215] : memref<4x358xf32, #tpu.memory_space<vmem>>, vector<1x358xf32>
    tpu.vector_store %arg6[%c0_214, %c0_215], %1350 {strides = array<i32>} : memref<4x358xf32, #tpu.memory_space<vmem>>, vector<1x358xf32>,
    %c0_216 = arith.constant 0 : index
    %c1_217 = arith.constant 1 : index
    %c21_218 = arith.constant 21 : index
    %1352 = vector.load %arg1[%c0_216, %c1_217, %c21_218] : memref<1x4x400xf32, #tpu.memory_space<vmem>>, vector<1x1x358xf32>
    %1353 = vector.shape_cast %1352 : vector<1x1x358xf32> to vector<1x358xf32>
    %c301 = arith.constant 301 : index
    %1354 = memref.load %arg3[%c301] : memref<308xf32, #tpu.memory_space<smem>>
    %1355 = arith.mulf %1353, %1339 : vector<1x358xf32>
    %1356 = vector.broadcast %1354 : f32 to vector<1x358xf32>
    %1357 = arith.mulf %1356, %1355 : vector<1x358xf32>
    %c305 = arith.constant 305 : index
    %1358 = memref.load %arg3[%c305] : memref<308xf32, #tpu.memory_space<smem>>
    %1359 = vector.broadcast %1358 : f32 to vector<1x358xf32>
    %1360 = arith.addf %1357, %1359 : vector<1x358xf32>
    %cst_219 = arith.constant 0.000000e+00 : f32
    %1361 = vector.broadcast %cst_219 : f32 to vector<1x358xf32>
    %1362 = arith.maximumf %1360, %1361 : vector<1x358xf32>
    %c1_220 = arith.constant 1 : index
    %c0_221 = arith.constant 0 : index
    %1363 = vector.load %arg6[%c1_220, %c0_221] : memref<4x358xf32, #tpu.memory_space<vmem>>, vector<1x358xf32>
    tpu.vector_store %arg6[%c1_220, %c0_221], %1362 {strides = array<i32>} : memref<4x358xf32, #tpu.memory_space<vmem>>, vector<1x358xf32>,
    %c0_222 = arith.constant 0 : index
    %c2_223 = arith.constant 2 : index
    %c21_224 = arith.constant 21 : index
    %1364 = vector.load %arg1[%c0_222, %c2_223, %c21_224] : memref<1x4x400xf32, #tpu.memory_space<vmem>>, vector<1x1x358xf32>
    %1365 = vector.shape_cast %1364 : vector<1x1x358xf32> to vector<1x358xf32>
    %c302 = arith.constant 302 : index
    %1366 = memref.load %arg3[%c302] : memref<308xf32, #tpu.memory_space<smem>>
    %1367 = arith.mulf %1365, %1339 : vector<1x358xf32>
    %1368 = vector.broadcast %1366 : f32 to vector<1x358xf32>
    %1369 = arith.mulf %1368, %1367 : vector<1x358xf32>
    %c306 = arith.constant 306 : index
    %1370 = memref.load %arg3[%c306] : memref<308xf32, #tpu.memory_space<smem>>
    %1371 = vector.broadcast %1370 : f32 to vector<1x358xf32>
    %1372 = arith.addf %1369, %1371 : vector<1x358xf32>
    %cst_225 = arith.constant 0.000000e+00 : f32
    %1373 = vector.broadcast %cst_225 : f32 to vector<1x358xf32>
    %1374 = arith.maximumf %1372, %1373 : vector<1x358xf32>
    %c2_226 = arith.constant 2 : index
    %c0_227 = arith.constant 0 : index
    %1375 = vector.load %arg6[%c2_226, %c0_227] : memref<4x358xf32, #tpu.memory_space<vmem>>, vector<1x358xf32>
    tpu.vector_store %arg6[%c2_226, %c0_227], %1374 {strides = array<i32>} : memref<4x358xf32, #tpu.memory_space<vmem>>, vector<1x358xf32>,
    %c0_228 = arith.constant 0 : index
    %c3_229 = arith.constant 3 : index
    %c21_230 = arith.constant 21 : index
    %1376 = vector.load %arg1[%c0_228, %c3_229, %c21_230] : memref<1x4x400xf32, #tpu.memory_space<vmem>>, vector<1x1x358xf32>
    %1377 = vector.shape_cast %1376 : vector<1x1x358xf32> to vector<1x358xf32>
    %c303 = arith.constant 303 : index
    %1378 = memref.load %arg3[%c303] : memref<308xf32, #tpu.memory_space<smem>>
    %1379 = arith.mulf %1377, %1339 : vector<1x358xf32>
    %1380 = vector.broadcast %1378 : f32 to vector<1x358xf32>
    %1381 = arith.mulf %1380, %1379 : vector<1x358xf32>
    %c307 = arith.constant 307 : index
    %1382 = memref.load %arg3[%c307] : memref<308xf32, #tpu.memory_space<smem>>
    %1383 = vector.broadcast %1382 : f32 to vector<1x358xf32>
    %1384 = arith.addf %1381, %1383 : vector<1x358xf32>
    %cst_231 = arith.constant 0.000000e+00 : f32
    %1385 = vector.broadcast %cst_231 : f32 to vector<1x358xf32>
    %1386 = arith.maximumf %1384, %1385 : vector<1x358xf32>
    %c3_232 = arith.constant 3 : index
    %c0_233 = arith.constant 0 : index
    %1387 = vector.load %arg6[%c3_232, %c0_233] : memref<4x358xf32, #tpu.memory_space<vmem>>, vector<1x358xf32>
    tpu.vector_store %arg6[%c3_232, %c0_233], %1386 {strides = array<i32>} : memref<4x358xf32, #tpu.memory_space<vmem>>, vector<1x358xf32>,
    %c0_234 = arith.constant 0 : index
    %c21_235 = arith.constant 21 : index
    %1388 = vector.load %arg6[%c0_234, %c21_235] : memref<4x358xf32, #tpu.memory_space<vmem>>, vector<4x16xf32>
    %c0_236 = arith.constant 0 : index
    %c0_237 = arith.constant 0 : index
    %c0_238 = arith.constant 0 : index
    %1389 = vector.load %arg4[%c0_236, %c0_237, %c0_238] : memref<1x4x256xf32, #tpu.memory_space<vmem>>, vector<1x4x16xf32>
    %1390 = vector.shape_cast %1389 : vector<1x4x16xf32> to vector<4x16xf32>
    %1391 = vector.shape_cast %1388 : vector<4x16xf32> to vector<1x4x16xf32>
    tpu.vector_store %arg4[%c0_236, %c0_237, %c0_238], %1391 {strides = array<i32>} : memref<1x4x256xf32, #tpu.memory_space<vmem>>, vector<1x4x16xf32>,
    %c0_239 = arith.constant 0 : index
    %c41_240 = arith.constant 41 : index
    %1392 = vector.load %arg6[%c0_239, %c41_240] : memref<4x358xf32, #tpu.memory_space<vmem>>, vector<4x16xf32>
    %c0_241 = arith.constant 0 : index
    %c0_242 = arith.constant 0 : index
    %c16_243 = arith.constant 16 : index
    %1393 = vector.load %arg4[%c0_241, %c0_242, %c16_243] : memref<1x4x256xf32, #tpu.memory_space<vmem>>, vector<1x4x16xf32>
    %1394 = vector.shape_cast %1393 : vector<1x4x16xf32> to vector<4x16xf32>
    %1395 = vector.shape_cast %1392 : vector<4x16xf32> to vector<1x4x16xf32>
    tpu.vector_store %arg4[%c0_241, %c0_242, %c16_243], %1395 {strides = array<i32>} : memref<1x4x256xf32, #tpu.memory_space<vmem>>, vector<1x4x16xf32>,
    %c0_244 = arith.constant 0 : index
    %c61_245 = arith.constant 61 : index
    %1396 = vector.load %arg6[%c0_244, %c61_245] : memref<4x358xf32, #tpu.memory_space<vmem>>, vector<4x16xf32>
    %c0_246 = arith.constant 0 : index
    %c0_247 = arith.constant 0 : index
    %c32_248 = arith.constant 32 : index
    %1397 = vector.load %arg4[%c0_246, %c0_247, %c32_248] : memref<1x4x256xf32, #tpu.memory_space<vmem>>, vector<1x4x16xf32>
    %1398 = vector.shape_cast %1397 : vector<1x4x16xf32> to vector<4x16xf32>
    %1399 = vector.shape_cast %1396 : vector<4x16xf32> to vector<1x4x16xf32>
    tpu.vector_store %arg4[%c0_246, %c0_247, %c32_248], %1399 {strides = array<i32>} : memref<1x4x256xf32, #tpu.memory_space<vmem>>, vector<1x4x16xf32>,
    %c0_249 = arith.constant 0 : index
    %c81_250 = arith.constant 81 : index
    %1400 = vector.load %arg6[%c0_249, %c81_250] : memref<4x358xf32, #tpu.memory_space<vmem>>, vector<4x16xf32>
    %c0_251 = arith.constant 0 : index
    %c0_252 = arith.constant 0 : index
    %c48_253 = arith.constant 48 : index
    %1401 = vector.load %arg4[%c0_251, %c0_252, %c48_253] : memref<1x4x256xf32, #tpu.memory_space<vmem>>, vector<1x4x16xf32>
    %1402 = vector.shape_cast %1401 : vector<1x4x16xf32> to vector<4x16xf32>
    %1403 = vector.shape_cast %1400 : vector<4x16xf32> to vector<1x4x16xf32>
    tpu.vector_store %arg4[%c0_251, %c0_252, %c48_253], %1403 {strides = array<i32>} : memref<1x4x256xf32, #tpu.memory_space<vmem>>, vector<1x4x16xf32>,
    %c0_254 = arith.constant 0 : index
    %c101_255 = arith.constant 101 : index
    %1404 = vector.load %arg6[%c0_254, %c101_255] : memref<4x358xf32, #tpu.memory_space<vmem>>, vector<4x16xf32>
    %c0_256 = arith.constant 0 : index
    %c0_257 = arith.constant 0 : index
    %c64_258 = arith.constant 64 : index
    %1405 = vector.load %arg4[%c0_256, %c0_257, %c64_258] : memref<1x4x256xf32, #tpu.memory_space<vmem>>, vector<1x4x16xf32>
    %1406 = vector.shape_cast %1405 : vector<1x4x16xf32> to vector<4x16xf32>
    %1407 = vector.shape_cast %1404 : vector<4x16xf32> to vector<1x4x16xf32>
    tpu.vector_store %arg4[%c0_256, %c0_257, %c64_258], %1407 {strides = array<i32>} : memref<1x4x256xf32, #tpu.memory_space<vmem>>, vector<1x4x16xf32>,
    %c0_259 = arith.constant 0 : index
    %c121_260 = arith.constant 121 : index
    %1408 = vector.load %arg6[%c0_259, %c121_260] : memref<4x358xf32, #tpu.memory_space<vmem>>, vector<4x16xf32>
    %c0_261 = arith.constant 0 : index
    %c0_262 = arith.constant 0 : index
    %c80_263 = arith.constant 80 : index
    %1409 = vector.load %arg4[%c0_261, %c0_262, %c80_263] : memref<1x4x256xf32, #tpu.memory_space<vmem>>, vector<1x4x16xf32>
    %1410 = vector.shape_cast %1409 : vector<1x4x16xf32> to vector<4x16xf32>
    %1411 = vector.shape_cast %1408 : vector<4x16xf32> to vector<1x4x16xf32>
    tpu.vector_store %arg4[%c0_261, %c0_262, %c80_263], %1411 {strides = array<i32>} : memref<1x4x256xf32, #tpu.memory_space<vmem>>, vector<1x4x16xf32>,
    %c0_264 = arith.constant 0 : index
    %c141_265 = arith.constant 141 : index
    %1412 = vector.load %arg6[%c0_264, %c141_265] : memref<4x358xf32, #tpu.memory_space<vmem>>, vector<4x16xf32>
    %c0_266 = arith.constant 0 : index
    %c0_267 = arith.constant 0 : index
    %c96_268 = arith.constant 96 : index
    %1413 = vector.load %arg4[%c0_266, %c0_267, %c96_268] : memref<1x4x256xf32, #tpu.memory_space<vmem>>, vector<1x4x16xf32>
    %1414 = vector.shape_cast %1413 : vector<1x4x16xf32> to vector<4x16xf32>
    %1415 = vector.shape_cast %1412 : vector<4x16xf32> to vector<1x4x16xf32>
    tpu.vector_store %arg4[%c0_266, %c0_267, %c96_268], %1415 {strides = array<i32>} : memref<1x4x256xf32, #tpu.memory_space<vmem>>, vector<1x4x16xf32>,
    %c0_269 = arith.constant 0 : index
    %c161_270 = arith.constant 161 : index
    %1416 = vector.load %arg6[%c0_269, %c161_270] : memref<4x358xf32, #tpu.memory_space<vmem>>, vector<4x16xf32>
    %c0_271 = arith.constant 0 : index
    %c0_272 = arith.constant 0 : index
    %c112_273 = arith.constant 112 : index
    %1417 = vector.load %arg4[%c0_271, %c0_272, %c112_273] : memref<1x4x256xf32, #tpu.memory_space<vmem>>, vector<1x4x16xf32>
    %1418 = vector.shape_cast %1417 : vector<1x4x16xf32> to vector<4x16xf32>
    %1419 = vector.shape_cast %1416 : vector<4x16xf32> to vector<1x4x16xf32>
    tpu.vector_store %arg4[%c0_271, %c0_272, %c112_273], %1419 {strides = array<i32>} : memref<1x4x256xf32, #tpu.memory_space<vmem>>, vector<1x4x16xf32>,
    %c0_274 = arith.constant 0 : index
    %c181_275 = arith.constant 181 : index
    %1420 = vector.load %arg6[%c0_274, %c181_275] : memref<4x358xf32, #tpu.memory_space<vmem>>, vector<4x16xf32>
    %c0_276 = arith.constant 0 : index
    %c0_277 = arith.constant 0 : index
    %c128_278 = arith.constant 128 : index
    %1421 = vector.load %arg4[%c0_276, %c0_277, %c128_278] : memref<1x4x256xf32, #tpu.memory_space<vmem>>, vector<1x4x16xf32>
    %1422 = vector.shape_cast %1421 : vector<1x4x16xf32> to vector<4x16xf32>
    %1423 = vector.shape_cast %1420 : vector<4x16xf32> to vector<1x4x16xf32>
    tpu.vector_store %arg4[%c0_276, %c0_277, %c128_278], %1423 {strides = array<i32>} : memref<1x4x256xf32, #tpu.memory_space<vmem>>, vector<1x4x16xf32>,
    %c0_279 = arith.constant 0 : index
    %c201_280 = arith.constant 201 : index
    %1424 = vector.load %arg6[%c0_279, %c201_280] : memref<4x358xf32, #tpu.memory_space<vmem>>, vector<4x16xf32>
    %c0_281 = arith.constant 0 : index
    %c0_282 = arith.constant 0 : index
    %c144_283 = arith.constant 144 : index
    %1425 = vector.load %arg4[%c0_281, %c0_282, %c144_283] : memref<1x4x256xf32, #tpu.memory_space<vmem>>, vector<1x4x16xf32>
    %1426 = vector.shape_cast %1425 : vector<1x4x16xf32> to vector<4x16xf32>
    %1427 = vector.shape_cast %1424 : vector<4x16xf32> to vector<1x4x16xf32>
    tpu.vector_store %arg4[%c0_281, %c0_282, %c144_283], %1427 {strides = array<i32>} : memref<1x4x256xf32, #tpu.memory_space<vmem>>, vector<1x4x16xf32>,
    %c0_284 = arith.constant 0 : index
    %c221_285 = arith.constant 221 : index
    %1428 = vector.load %arg6[%c0_284, %c221_285] : memref<4x358xf32, #tpu.memory_space<vmem>>, vector<4x16xf32>
    %c0_286 = arith.constant 0 : index
    %c0_287 = arith.constant 0 : index
    %c160_288 = arith.constant 160 : index
    %1429 = vector.load %arg4[%c0_286, %c0_287, %c160_288] : memref<1x4x256xf32, #tpu.memory_space<vmem>>, vector<1x4x16xf32>
    %1430 = vector.shape_cast %1429 : vector<1x4x16xf32> to vector<4x16xf32>
    %1431 = vector.shape_cast %1428 : vector<4x16xf32> to vector<1x4x16xf32>
    tpu.vector_store %arg4[%c0_286, %c0_287, %c160_288], %1431 {strides = array<i32>} : memref<1x4x256xf32, #tpu.memory_space<vmem>>, vector<1x4x16xf32>,
    %c0_289 = arith.constant 0 : index
    %c241_290 = arith.constant 241 : index
    %1432 = vector.load %arg6[%c0_289, %c241_290] : memref<4x358xf32, #tpu.memory_space<vmem>>, vector<4x16xf32>
    %c0_291 = arith.constant 0 : index
    %c0_292 = arith.constant 0 : index
    %c176_293 = arith.constant 176 : index
    %1433 = vector.load %arg4[%c0_291, %c0_292, %c176_293] : memref<1x4x256xf32, #tpu.memory_space<vmem>>, vector<1x4x16xf32>
    %1434 = vector.shape_cast %1433 : vector<1x4x16xf32> to vector<4x16xf32>
    %1435 = vector.shape_cast %1432 : vector<4x16xf32> to vector<1x4x16xf32>
    tpu.vector_store %arg4[%c0_291, %c0_292, %c176_293], %1435 {strides = array<i32>} : memref<1x4x256xf32, #tpu.memory_space<vmem>>, vector<1x4x16xf32>,
    %c0_294 = arith.constant 0 : index
    %c261_295 = arith.constant 261 : index
    %1436 = vector.load %arg6[%c0_294, %c261_295] : memref<4x358xf32, #tpu.memory_space<vmem>>, vector<4x16xf32>
    %c0_296 = arith.constant 0 : index
    %c0_297 = arith.constant 0 : index
    %c192_298 = arith.constant 192 : index
    %1437 = vector.load %arg4[%c0_296, %c0_297, %c192_298] : memref<1x4x256xf32, #tpu.memory_space<vmem>>, vector<1x4x16xf32>
    %1438 = vector.shape_cast %1437 : vector<1x4x16xf32> to vector<4x16xf32>
    %1439 = vector.shape_cast %1436 : vector<4x16xf32> to vector<1x4x16xf32>
    tpu.vector_store %arg4[%c0_296, %c0_297, %c192_298], %1439 {strides = array<i32>} : memref<1x4x256xf32, #tpu.memory_space<vmem>>, vector<1x4x16xf32>,
    %c0_299 = arith.constant 0 : index
    %c281_300 = arith.constant 281 : index
    %1440 = vector.load %arg6[%c0_299, %c281_300] : memref<4x358xf32, #tpu.memory_space<vmem>>, vector<4x16xf32>
    %c0_301 = arith.constant 0 : index
    %c0_302 = arith.constant 0 : index
    %c208_303 = arith.constant 208 : index
    %1441 = vector.load %arg4[%c0_301, %c0_302, %c208_303] : memref<1x4x256xf32, #tpu.memory_space<vmem>>, vector<1x4x16xf32>
    %1442 = vector.shape_cast %1441 : vector<1x4x16xf32> to vector<4x16xf32>
    %1443 = vector.shape_cast %1440 : vector<4x16xf32> to vector<1x4x16xf32>
    tpu.vector_store %arg4[%c0_301, %c0_302, %c208_303], %1443 {strides = array<i32>} : memref<1x4x256xf32, #tpu.memory_space<vmem>>, vector<1x4x16xf32>,
    %c0_304 = arith.constant 0 : index
    %c301_305 = arith.constant 301 : index
    %1444 = vector.load %arg6[%c0_304, %c301_305] : memref<4x358xf32, #tpu.memory_space<vmem>>, vector<4x16xf32>
    %c0_306 = arith.constant 0 : index
    %c0_307 = arith.constant 0 : index
    %c224_308 = arith.constant 224 : index
    %1445 = vector.load %arg4[%c0_306, %c0_307, %c224_308] : memref<1x4x256xf32, #tpu.memory_space<vmem>>, vector<1x4x16xf32>
    %1446 = vector.shape_cast %1445 : vector<1x4x16xf32> to vector<4x16xf32>
    %1447 = vector.shape_cast %1444 : vector<4x16xf32> to vector<1x4x16xf32>
    tpu.vector_store %arg4[%c0_306, %c0_307, %c224_308], %1447 {strides = array<i32>} : memref<1x4x256xf32, #tpu.memory_space<vmem>>, vector<1x4x16xf32>,
    %c0_309 = arith.constant 0 : index
    %c321 = arith.constant 321 : index
    %1448 = vector.load %arg6[%c0_309, %c321] : memref<4x358xf32, #tpu.memory_space<vmem>>, vector<4x16xf32>
    %c0_310 = arith.constant 0 : index
    %c0_311 = arith.constant 0 : index
    %c240_312 = arith.constant 240 : index
    %1449 = vector.load %arg4[%c0_310, %c0_311, %c240_312] : memref<1x4x256xf32, #tpu.memory_space<vmem>>, vector<1x4x16xf32>
    %1450 = vector.shape_cast %1449 : vector<1x4x16xf32> to vector<4x16xf32>
    %1451 = vector.shape_cast %1448 : vector<4x16xf32> to vector<1x4x16xf32>
    tpu.vector_store %arg4[%c0_310, %c0_311, %c240_312], %1451 {strides = array<i32>} : memref<1x4x256xf32, #tpu.memory_space<vmem>>, vector<1x4x16xf32>,
    return
  }
  func.func @transform_0(%arg0: i32) -> (i32, i32, i32) {
    %c0_i32 = arith.constant 0 : i32
    %c0_i32_0 = arith.constant 0 : i32
    %c0_i32_1 = arith.constant 0 : i32
    return %arg0, %c0_i32, %c0_i32_0 : i32, i32, i32
  }
  func.func @transform_1(%arg0: i32) -> (i32, i32) {
    %c0_i32 = arith.constant 0 : i32
    %c0_i32_0 = arith.constant 0 : i32
    %c0_i32_1 = arith.constant 0 : i32
    return %c0_i32, %c0_i32_0 : i32, i32
  }
  func.func @transform_2(%arg0: i32) -> i32 {
    %c0_i32 = arith.constant 0 : i32
    %c0_i32_0 = arith.constant 0 : i32
    return %c0_i32 : i32
  }
  func.func @transform_3(%arg0: i32) -> (i32, i32, i32) {
    %c0_i32 = arith.constant 0 : i32
    %c0_i32_0 = arith.constant 0 : i32
    %c0_i32_1 = arith.constant 0 : i32
    return %arg0, %c0_i32, %c0_i32_0 : i32, i32, i32
  }
}

</mosaic_0001>

<bundles_post_ra>
// kernel: spatial_attention_forward.1
= control target key start
LH: loop header
LB: loop body
LE: loop exit
PB: predicated region body
PF: predicated region fallthrough
CT: control target
= control target key end

     0   :  { %s5825_s0 = inlined_call_operand.vmem [shape: f32[2,4,400], index: 0, kind: input, shape index: {}]   ;;  %s5826_s1 = inlined_call_operand.vmem [shape: f32[1,400], index: 1, kind: input, shape index: {}]   ;;  %s5827_s2 = inlined_call_operand.vmem [shape: f32[308], index: 2, kind: input, shape index: {}]   ;;  %s5828_s3 = inlined_call_operand.vmem [shape: f32[2,4,256], index: 3, kind: output, shape index: {}]  }
   0x1   :  { %5896 = sst [smem:[#allocation44_spill]] %s5825_s0 }
   0x2   :  { %5897 = sst [smem:[#allocation45_spill]] %s5826_s1 }
   0x3   :  { %5898 = sst [smem:[#allocation46_spill]] %s5827_s2 }
   0x4   :  { %8 = vsyncpa [#allocation5], 0  ;;  %s3710_s12 = smov 0  }
   0x5 LB: > { %5899 = sst [smem:[#allocation7_spill]] %s3663_s12  ;;  %s3256_s13 = sadd.s32 4294967295, %s3663_s12   ;;  %s3663_s12 = sphi %s3710_s12, %s14_s12  }
   0x6   : > { %p3258_p0 = scmp.ge.s32.totalorder %s3663_s12, 1  ;;  %p113_p1 = scmp.lt.s32.totalorder %s3663_s12, 3 }
   0x7   : > { %s5900_s2 = sld [smem:[#allocation46_spill]]  ;;  %p3595_p3 = scmp.eq.s32.totalorder %s3256_s13, 0 }
   0x8   : > { %p3721_p2 = pnand %p3258_p0, %p113_p1 }
   0xa   : > { %p3591_p4 = pneg %p3721_p2 }
   0xc   : > { %p3592_p5 = pnand %p3595_p3, %p3591_p4 }
   0xd   : > { %s129_s16 = sshll.u32 %s5900_s2, 4  ;;  %s130_s16 = int_to_ptr.vmem [resolvable:$true] %s129_s16 }
   0xe   : > { %s3638_s18 = scalar_lea.vmem %s130_s16, 48  ;;  %p3640_p7 = pneg %p3592_p5 }
   0xf   : > { %p3639_p6 = scmp.ne.s32.totalorder %s130_s16, %s3638_s18  ;;  %s3645_s19 = scalar_lea.vmem %s130_s16, 64 }
  0x10   : > { %p3646_p10 = scmp.lt.s32.totalorder %s130_s16, %s130_s16  ;;  %p3647_p11 = scmp.lt.s32.totalorder %s3645_s19, %s3638_s18 }
  0x11   : > { %p3641_p8 = pnand %p3640_p7, %p3639_p6 }
  0x12   : > { %p3648_p12 = por %p3647_p11, %p3646_p10 }
  0x13   : > { %p3642_p9 = pneg %p3641_p8 }
  0x15   : > { %p3649_p13 = pnand %p3648_p12, %p3642_p9 }
  0x17   : > { %3652 = shalt.err (!%p3649_p13)
}
  0x18   : > { %s3665_s20 = smov [#allocation4]   ;;  %150 = sbr.rel (%p3721_p2) target bundleno = 1366 (0x556), region = 32 }
  0x19   : > { %3594 = dma.vmem_to_smem (!%p3592_p5), %s130_s16, 48, %s3665_s20, [#allocation5]  }
  0x1d   : > { %3658 = dma.done.wait (%p3595_p3), [#allocation5], 48  }
  0x1e   : > { %3660 = vsyncadd (%p3595_p3), [#allocation5], 4294967248 }
  0x1f   : > { %156 = sfence }
  0x20   : > { %p175_p0 = scmp.lt.s32.totalorder %s3256_s13, 1  ;;  %s3289_s21 = sld [smem:[#allocation4 + $0x11]]  ;;  %vm187_vm0 = vcmask 1043456   ;;  %vm188_vm1 = vcmask 130052   ;;  %vm269_vm3 = vcmask 1039360   ;;  %vm430_vm4 = vcmask 1031168  }
  0x21   : > { %s3285_s22 = sld [smem:[#allocation4 + $0x10]]  ;;  %s3666_s5 = smov 127   ;;  %vm189_vm2 = vmor %vm188_vm1, %vm187_vm0  ;;  %vm591_vm5 = vcmask 883712   ;;  %vm752_vm6 = vcmask 875520   ;;  %vm913_vm7 = vcmask 867328   ;;  %vm1075_vm8 = vcmask 719872  }
  0x22   : > { %s6017_s13 = smov (!%p175_p0, %s3256_s13), 1  ;;  %s3287_s24 = sld [smem:[#allocation4 + $0x18]]  ;;  %vm1239_vm9 = vcmask 711680   ;;  %vm1400_vm10 = vcmask 703488   ;;  %vm1569_vm13 = vcmask 171008   ;;  %vm3085_vm0 = vcmask 125952  }
  0x23   : > { %s3585_s23 = sshll.u32 %s6017_s13, 4  ;;  %s5902_s0 = sld [smem:[#allocation44_spill]]  ;;  %vm3092_vm1 = vcmask 257152  }
  0x24   : > { %s3286_s28 = sld [smem:[#allocation4 + $0x14]] }
  0x25   : > { %s3293_s29 = sld [smem:[#allocation4 + $0x12]] }
  0x26   : > { %v304_v1 = vstv %s3289_s21  ;;  %s3290_s30 = sld [smem:[#allocation4 + $0x15]]  ;;  %s5878_s21 = smov 126  }
  0x27   : > { %v263_v4 = vstv %s3285_s22  ;;  %s3291_s4 = sld [smem:[#allocation4 + $0x19]] }
  0x28   : > { %v284_v6 = vstv %s3287_s24  ;;  %s3288_s6 = sld [smem:[#allocation4 + $0x1c]] }
  0x29   : > { %s3738_s27 = scalar_lea.vmem %s5902_s0, %s3585_s23  ;;  %s3297_s7 = sld [smem:[#allocation4 + $0x13]] }
  0x2a   : > { %v3741_v0 = vld [vmem:[%s3738_s27 + $0x1] ss:$4 sm:$0x7]  ;;  %v3744_v2 = vld [vmem:[%s3738_s27] ss:$4 sm:$0x7]  ;;  %v274_v8 = vstv %s3286_s28 }
  0x2b   : > { %v305_v3 = vmul.f32 %v3741_v0, %v304_v1  ;;  %v264_v5 = vmul.f32 %v263_v4, %v3744_v2  ;;  %v285_v7 = vmul.f32 %v284_v6, %v3744_v2  ;;  %v3751_v9 = vld [vmem:[%s3738_s27 + $0x2] ss:$4 sm:$0x7]  ;;  %v275_v10 = vmul.f32 %v274_v8, %v3744_v2  ;;  %s3294_s8 = sld [smem:[#allocation4 + $0x16]] }
  0x2c   : > { %v344_v11 = vstv %s3293_s29  ;;  %v314_v13 = vstv %s3290_s30  ;;  %s3295_s9 = sld [smem:[#allocation4 + $0x1a]]  ;;  %v3762_v18 = vld [vmem:[%s3738_s27 + $0x3] ss:$4 sm:$0x7] }
  0x2d   : > { %307 = vrot.lane.b32.xlu1 %v305_v3, %s3666_s5  ;;  %266 = vrot.lane.b32.xlu0 %v264_v5, %s3666_s5  ;;  %v345_v12 = vmul.f32 %v3751_v9, %v344_v11  ;;  %v324_v14 = vstv %s3291_s4  ;;  %v315_v15 = vmul.f32 %v3741_v0, %v314_v13  ;;  %s3292_s10 = sld [smem:[#allocation4 + $0x1d]] }
  0x2e   : > { %v294_v16 = vstv %s3288_s6  ;;  %v325_v17 = vmul.f32 %v3741_v0, %v324_v14  ;;  %s3301_s11 = sld [smem:[#allocation4 + $0x20]] }
  0x2f   : > { %v384_v19 = vstv %s3297_s7  ;;  %v295_v20 = vmul.f32 %v294_v16, %v3744_v2  ;;  %s3298_s14 = sld [smem:[#allocation4 + $0x17]] }
  0x30   : > { %v385_v22 = vmul.f32 %v3762_v18, %v384_v19  ;;  %s3299_s15 = sld [smem:[#allocation4 + $0x1b]] }
  0x31   : > { %287 = vrot.lane.b32.xlu1 %v285_v7, %s3666_s5  ;;  %277 = vrot.lane.b32.xlu0 %v275_v10, %s3666_s5  ;;  %v354_v21 = vstv %s3294_s8  ;;  %s3296_s16 = sld [smem:[#allocation4 + $0x1e]] }
  0x32   : > { %v364_v23 = vstv %s3295_s9  ;;  %v355_v24 = vmul.f32 %v3751_v9, %v354_v21  ;;  %s3305_s17 = sld [smem:[#allocation4 + $0x21]] }
  0x33   : > { %v334_v25 = vstv %s3292_s10  ;;  %v365_v26 = vmul.f32 %v3751_v9, %v364_v23  ;;  %s3302_s18 = sld [smem:[#allocation4 + $0x24]] }
  0x34   : > { %v424_v27 = vstv %s3301_s11  ;;  %v335_v28 = vmul.f32 %v3741_v0, %v334_v25  ;;  %s3303_s19 = sld [smem:[#allocation4 + $0x28]] }
  0x35   : > { %347 = vrot.lane.b32.xlu1 %v345_v12, %s3666_s5  ;;  %317 = vrot.lane.b32.xlu0 %v315_v15, %s3666_s5  ;;  %v394_v29 = vstv %s3298_s14  ;;  %v425_v30 = vmul.f32 %v424_v27, %v3744_v2  ;;  %s3300_s20 = sld [smem:[#allocation4 + $0x1f]] }
  0x36   : > { %v404_v31 = vstv %s3299_s15  ;;  %v395_v32 = vmul.f32 %v3762_v18, %v394_v29  ;;  %s3309_s22 = sld [smem:[#allocation4 + $0x22]]  ;;  %s5876_s15 = smov 108  }
  0x37   : > { %v374_v33 = vstv %s3296_s16  ;;  %v405_v34 = vmul.f32 %v3762_v18, %v404_v31  ;;  %s3306_s23 = sld [smem:[#allocation4 + $0x25]] }
  0x38   : > { %v465_v35 = vstv %s3305_s17  ;;  %v375_v36 = vmul.f32 %v3751_v9, %v374_v33  ;;  %s3307_s24 = sld [smem:[#allocation4 + $0x29]] }
  0x39   : > { %327 = vrot.lane.b32.xlu1 %v325_v17, %s3666_s5  ;;  %297 = vrot.lane.b32.xlu0 %v295_v20, %s3666_s5  ;;  %v435_v37 = vstv %s3302_s18  ;;  %v466_v38 = vmul.f32 %v3741_v0, %v465_v35  ;;  %s3304_s25 = sld [smem:[#allocation4 + $0x2c]] }
  0x3a   : > { %v445_v39 = vstv %s3303_s19  ;;  %v436_v40 = vmul.f32 %v435_v37, %v3744_v2  ;;  %s3313_s26 = sld [smem:[#allocation4 + $0x23]] }
  0x3b   : > { %v414_v41 = vstv %s3300_s20  ;;  %v446_v42 = vmul.f32 %v445_v39, %v3744_v2  ;;  %s3310_s28 = sld [smem:[#allocation4 + $0x26]] }
  0x3c   : > { %v505_v43 = vstv %s3309_s22  ;;  %v415_v44 = vmul.f32 %v3762_v18, %v414_v41  ;;  %s3311_s29 = sld [smem:[#allocation4 + $0x2a]] }
  0x3d   : > { %387 = vrot.lane.b32.xlu1 %v385_v22, %s3666_s5  ;;  %357 = vrot.lane.b32.xlu0 %v355_v24, %s3666_s5  ;;  %v475_v45 = vstv %s3306_s23  ;;  %v506_v46 = vmul.f32 %v3751_v9, %v505_v43  ;;  %s3308_s30 = sld [smem:[#allocation4 + $0x2d]] }
  0x3e   : > { %v485_v47 = vstv %s3307_s24  ;;  %v476_v48 = vmul.f32 %v3741_v0, %v475_v45  ;;  %s3317_s4 = sld [smem:[#allocation4 + $0x30]] }
  0x3f   : > { %v455_v49 = vstv %s3304_s25  ;;  %v486_v50 = vmul.f32 %v3741_v0, %v485_v47  ;;  %s3314_s6 = sld [smem:[#allocation4 + $0x27]] }
  0x40   : > { %v545_v51 = vstv %s3313_s26  ;;  %v456_v52 = vmul.f32 %v455_v49, %v3744_v2  ;;  %s3315_s7 = sld [smem:[#allocation4 + $0x2b]] }
  0x41   : > { %367 = vrot.lane.b32.xlu1 %v365_v26, %s3666_s5  ;;  %337 = vrot.lane.b32.xlu0 %v335_v28, %s3666_s5  ;;  %v515_v53 = vstv %s3310_s28  ;;  %v546_v54 = vmul.f32 %v3762_v18, %v545_v51  ;;  %s3312_s8 = sld [smem:[#allocation4 + $0x2e]] }
  0x42   : > { %v525_v55 = vstv %s3311_s29  ;;  %v516_v56 = vmul.f32 %v3751_v9, %v515_v53  ;;  %s3321_s9 = sld [smem:[#allocation4 + $0x31]] }
  0x43   : > { %v495_v57 = vstv %s3308_s30  ;;  %v526_v58 = vmul.f32 %v3751_v9, %v525_v55  ;;  %s3318_s10 = sld [smem:[#allocation4 + $0x34]] }
  0x44   : > { %v585_v59 = vstv %s3317_s4  ;;  %v496_v60 = vmul.f32 %v3741_v0, %v495_v57  ;;  %s3319_s11 = sld [smem:[#allocation4 + $0x38]] }
  0x45   : > { %427 = vrot.lane.b32.xlu1 %v425_v30, %s5878_s21  ;;  %397 = vrot.lane.b32.xlu0 %v395_v32, %s3666_s5  ;;  %v555_v61 = vstv %s3314_s6  ;;  %v586_v62 = vmul.f32 %v585_v59, %v3744_v2  ;;  %s3316_s14 = sld [smem:[#allocation4 + $0x2f]] }
  0x46   : > { %v565_v63 = vstv %s3315_s7  ;;  %v556_v1 = vmul.f32 %v3762_v18, %v555_v61  ;;  %s3325_s16 = sld [smem:[#allocation4 + $0x32]] }
  0x47   : > { %v535_v3 = vstv %s3312_s8  ;;  %v566_v4 = vmul.f32 %v3762_v18, %v565_v63  ;;  %s3322_s17 = sld [smem:[#allocation4 + $0x35]]  ;;  %s5874_s8 = smov 107  }
  0x48   : > { %v626_v5 = vstv %s3321_s9  ;;  %v536_v6 = vmul.f32 %v3751_v9, %v535_v3  ;;  %s3323_s18 = sld [smem:[#allocation4 + $0x39]] }
  0x49   : > { %407 = vrot.lane.b32.xlu1 %v405_v34, %s3666_s5  ;;  %377 = vrot.lane.b32.xlu0 %v375_v36, %s3666_s5  ;;  %v596_v7 = vstv %s3318_s10  ;;  %v627_v8 = vmul.f32 %v3741_v0, %v626_v5  ;;  %s3320_s19 = sld [smem:[#allocation4 + $0x3c]] }
  0x4a   : > { %v606_v10 = vstv %s3319_s11  ;;  %v597_v11 = vmul.f32 %v596_v7, %v3744_v2  ;;  %s3329_s20 = sld [smem:[#allocation4 + $0x33]] }
  0x4b   : > { %v575_v12 = vstv %s3316_s14  ;;  %v607_v13 = vmul.f32 %v606_v10, %v3744_v2  ;;  %s3326_s22 = sld [smem:[#allocation4 + $0x36]] }
  0x4c   : > { %v666_v14 = vstv %s3325_s16  ;;  %v576_v15 = vmul.f32 %v3762_v18, %v575_v12  ;;  %s3327_s23 = sld [smem:[#allocation4 + $0x3a]] }
  0x4d   : > { %468 = vrot.lane.b32.xlu1 %v466_v38, %s5878_s21  ;;  %438 = vrot.lane.b32.xlu0 %v436_v40, %s5878_s21  ;;  %v636_v16 = vstv %s3322_s17  ;;  %v667_v17 = vmul.f32 %v3751_v9, %v666_v14  ;;  %s3324_s24 = sld [smem:[#allocation4 + $0x3d]] }
  0x4e   : > { %v646_v19 = vstv %s3323_s18  ;;  %v637_v20 = vmul.f32 %v3741_v0, %v636_v16  ;;  %s3333_s25 = sld [smem:[#allocation4 + $0x40]] }
  0x4f   : > { %v616_v21 = vstv %s3320_s19  ;;  %v647_v22 = vmul.f32 %v3741_v0, %v646_v19  ;;  %s3330_s26 = sld [smem:[#allocation4 + $0x37]] }
  0x50   : > { %v706_v23 = vstv %s3329_s20  ;;  %v617_v24 = vmul.f32 %v616_v21, %v3744_v2  ;;  %s3331_s28 = sld [smem:[#allocation4 + $0x3b]] }
  0x51   : > { %448 = vrot.lane.b32.xlu1 %v446_v42, %s5878_s21  ;;  %417 = vrot.lane.b32.xlu0 %v415_v44, %s3666_s5  ;;  %v676_v25 = vstv %s3326_s22  ;;  %v707_v26 = vmul.f32 %v3762_v18, %v706_v23  ;;  %s3328_s29 = sld [smem:[#allocation4 + $0x3e]] }
  0x52   : > { %v686_v27 = vstv %s3327_s23  ;;  %v677_v28 = vmul.f32 %v3751_v9, %v676_v25  ;;  %s3337_s30 = sld [smem:[#allocation4 + $0x41]] }
  0x53   : > { %v656_v29 = vstv %s3324_s24  ;;  %v687_v30 = vmul.f32 %v3751_v9, %v686_v27  ;;  %s3334_s4 = sld [smem:[#allocation4 + $0x44]] }
  0x54   : > { %v746_v31 = vstv %s3333_s25  ;;  %v657_v32 = vmul.f32 %v3741_v0, %v656_v29  ;;  %s3335_s6 = sld [smem:[#allocation4 + $0x48]] }
  0x55   : > { %508 = vrot.lane.b32.xlu1 %v506_v46, %s5878_s21  ;;  %478 = vrot.lane.b32.xlu0 %v476_v48, %s5878_s21  ;;  %v716_v33 = vstv %s3330_s26  ;;  %v747_v34 = vmul.f32 %v746_v31, %v3744_v2  ;;  %s3332_s7 = sld [smem:[#allocation4 + $0x3f]] }
  0x56   : > { %v726_v35 = vstv %s3331_s28  ;;  %v717_v36 = vmul.f32 %v3762_v18, %v716_v33  ;;  %s3341_s9 = sld [smem:[#allocation4 + $0x42]] }
  0x57   : > { %v696_v37 = vstv %s3328_s29  ;;  %v727_v38 = vmul.f32 %v3762_v18, %v726_v35  ;;  %s3338_s10 = sld [smem:[#allocation4 + $0x45]] }
  0x58   : > { %v787_v39 = vstv %s3337_s30  ;;  %v697_v40 = vmul.f32 %v3751_v9, %v696_v37  ;;  %s3339_s11 = sld [smem:[#allocation4 + $0x49]]  ;;  %s5872_s30 = smov 106  }
  0x59   : > { %488 = vrot.lane.b32.xlu1 %v486_v50, %s5878_s21  ;;  %458 = vrot.lane.b32.xlu0 %v456_v52, %s5878_s21  ;;  %v757_v41 = vstv %s3334_s4  ;;  %v788_v42 = vmul.f32 %v3741_v0, %v787_v39  ;;  %s3336_s14 = sld [smem:[#allocation4 + $0x4c]] }
  0x5a   : > { %v767_v43 = vstv %s3335_s6  ;;  %v758_v44 = vmul.f32 %v757_v41, %v3744_v2  ;;  %s3345_s16 = sld [smem:[#allocation4 + $0x43]] }
  0x5b   : > { %v736_v45 = vstv %s3332_s7  ;;  %v768_v46 = vmul.f32 %v767_v43, %v3744_v2  ;;  %s3342_s17 = sld [smem:[#allocation4 + $0x46]] }
  0x5c   : > { %v827_v47 = vstv %s3341_s9  ;;  %v737_v48 = vmul.f32 %v3762_v18, %v736_v45  ;;  %s3343_s18 = sld [smem:[#allocation4 + $0x4a]] }
  0x5d   : > { %548 = vrot.lane.b32.xlu1 %v546_v54, %s5878_s21  ;;  %518 = vrot.lane.b32.xlu0 %v516_v56, %s5878_s21  ;;  %v797_v49 = vstv %s3338_s10  ;;  %v828_v50 = vmul.f32 %v3751_v9, %v827_v47  ;;  %s3340_s19 = sld [smem:[#allocation4 + $0x4d]] }
  0x5e   : > { %v807_v51 = vstv %s3339_s11  ;;  %v798_v52 = vmul.f32 %v3741_v0, %v797_v49  ;;  %s3349_s20 = sld [smem:[#allocation4 + $0x50]] }
  0x5f   : > { %v777_v53 = vstv %s3336_s14  ;;  %v808_v54 = vmul.f32 %v3741_v0, %v807_v51  ;;  %s3346_s22 = sld [smem:[#allocation4 + $0x47]] }
  0x60   : > { %v867_v55 = vstv %s3345_s16  ;;  %v778_v56 = vmul.f32 %v777_v53, %v3744_v2  ;;  %s3347_s23 = sld [smem:[#allocation4 + $0x4b]] }
  0x61   : > { %528 = vrot.lane.b32.xlu1 %v526_v58, %s5878_s21  ;;  %498 = vrot.lane.b32.xlu0 %v496_v60, %s5878_s21  ;;  %v837_v57 = vstv %s3342_s17  ;;  %v868_v58 = vmul.f32 %v3762_v18, %v867_v55  ;;  %s3344_s24 = sld [smem:[#allocation4 + $0x4e]] }
  0x62   : > { %v847_v59 = vstv %s3343_s18  ;;  %v838_v60 = vmul.f32 %v3751_v9, %v837_v57  ;;  %s3353_s25 = sld [smem:[#allocation4 + $0x51]] }
  0x63   : > { %v817_v61 = vstv %s3340_s19  ;;  %s3350_s26 = sld [smem:[#allocation4 + $0x54]] }
  0x64   : > { %v907_v63 = vstv %s3349_s20  ;;  %v818_v3 = vmul.f32 %v3741_v0, %v817_v61  ;;  %s3351_s28 = sld [smem:[#allocation4 + $0x58]] }
  0x65   : > { %588 = vrot.lane.b32.xlu1 %v586_v62, %s5876_s15  ;;  %558 = vrot.lane.b32.xlu0 %v556_v1, %s5878_s21  ;;  %v848_v62 = vmul.f32 %v3751_v9, %v847_v59  ;;  %s3348_s29 = sld [smem:[#allocation4 + $0x4f]] }
  0x66   : > { %v887_v7 = vstv %s3347_s23  ;;  %s3357_s4 = sld [smem:[#allocation4 + $0x52]] }
  0x67   : > { %s3354_s6 = sld [smem:[#allocation4 + $0x55]] }
  0x68   : > { %v948_v14 = vstv %s3353_s25  ;;  %s3355_s7 = sld [smem:[#allocation4 + $0x59]] }
  0x69   : > { %568 = vrot.lane.b32.xlu1 %v566_v4, %s5878_s21  ;;  %538 = vrot.lane.b32.xlu0 %v536_v6, %s5878_s21  ;;  %v877_v4 = vstv %s3346_s22  ;;  %v908_v6 = vmul.f32 %v907_v63, %v3744_v2  ;;  %s3352_s9 = sld [smem:[#allocation4 + $0x5c]] }
  0x6a   : > { %v878_v10 = vmul.f32 %v3762_v18, %v877_v4  ;;  %v928_v21 = vstv %s3351_s28  ;;  %s3361_s10 = sld [smem:[#allocation4 + $0x53]] }
  0x6b   : > { %s3358_s11 = sld [smem:[#allocation4 + $0x56]] }
  0x6c   : > { %v988_v27 = vstv %s3357_s4  ;;  %s3359_s14 = sld [smem:[#allocation4 + $0x5a]] }
  0x6d   : > { %629 = vrot.lane.b32.xlu1 %v627_v8, %s5876_s15  ;;  %599 = vrot.lane.b32.xlu0 %v597_v11, %s5876_s15  ;;  %v857_v11 = vstv %s3344_s24  ;;  %s3356_s16 = sld [smem:[#allocation4 + $0x5d]] }
  0x6e   : > { %v858_v16 = vmul.f32 %v3751_v9, %v857_v11  ;;  %v968_v33 = vstv %s3355_s7  ;;  %s3365_s17 = sld [smem:[#allocation4 + $0x60]] }
  0x6f   : > { %s3362_s18 = sld [smem:[#allocation4 + $0x57]] }
  0x70   : > { %v1028_v39 = vstv %s3361_s10  ;;  %s3924_s19 = sld [smem:[#allocation4 + $0x5b]] }
  0x71   : > { %609 = vrot.lane.b32.xlu1 %v607_v13, %s5876_s15  ;;  %578 = vrot.lane.b32.xlu0 %v576_v15, %s5878_s21  ;;  %v888_v13 = vmul.f32 %v3762_v18, %v887_v7  ;;  %s3930_s20 = sld [smem:[#allocation4 + $0x5e]] }
  0x72   : > { %v1008_v45 = vstv %s3359_s14  ;;  %s3939_s22 = sld [smem:[#allocation4 + $0x61]] }
  0x73   : > { %v1009_v49 = vmul.f32 %v3751_v9, %v1008_v45  ;;  %s3366_s23 = sld [smem:[#allocation4 + $0x64]] }
  0x74   : > { %v1069_v51 = vstv %s3365_s17  ;;  %s3950_s24 = sld [smem:[#allocation4 + $0x68]] }
  0x75   : > { %669 = vrot.lane.b32.xlu1 %v667_v17, %s5876_s15  ;;  %639 = vrot.lane.b32.xlu0 %v637_v20, %s5876_s15  ;;  %v918_v17 = vstv %s3350_s26  ;;  %v949_v20 = vmul.f32 %v3741_v0, %v948_v14  ;;  %s3957_s25 = sld [smem:[#allocation4 + $0x5f]]  ;;  %s5870_s26 = smov 88  }
  0x76   : > { %v919_v23 = vmul.f32 %v918_v17, %v3744_v2  ;;  %v1048_v57 = vstv %s3924_s19  ;;  %s3375_s28 = sld [smem:[#allocation4 + $0x62]] }
  0x77   : > { %v1049_v61 = vmul.f32 %v3762_v18, %v1048_v57  ;;  %s3372_s4 = sld [smem:[#allocation4 + $0x69]] }
  0x78   : > { %v1111_v63 = vstv %s3939_s22  ;;  %s3380_s7 = sld [smem:[#allocation4 + $0x63]] }
  0x79   : > { %649 = vrot.lane.b32.xlu1 %v647_v22, %s5876_s15  ;;  %619 = vrot.lane.b32.xlu0 %v617_v24, %s5876_s15  ;;  %v897_v24 = vstv %s3348_s29  ;;  %s3371_s29 = sld [smem:[#allocation4 + $0x65]] }
  0x7a   : > { %v898_v29 = vmul.f32 %v3762_v18, %v897_v24  ;;  %v1090_v11 = vstv %s3950_s24  ;;  %s3377_s10 = sld [smem:[#allocation4 + $0x6a]]  ;;  %s5868_s24 = smov 87  }
  0x7b   : > { %s3384_s14 = sld [smem:[#allocation4 + $0x70]] }
  0x7c   : > { %s3382_s17 = sld [smem:[#allocation4 + $0x6b]] }
  0x7d   : > { %709 = vrot.lane.b32.xlu1 %v707_v26, %s5876_s15  ;;  %679 = vrot.lane.b32.xlu0 %v677_v28, %s5876_s15  ;;  %v929_v26 = vmul.f32 %v928_v21, %v3744_v2  ;;  %v1152_v21 = vstv %s3375_s28  ;;  %s3388_s19 = sld [smem:[#allocation4 + $0x71]] }
  0x7e   : > { %s3386_s22 = sld [smem:[#allocation4 + $0x78]] }
  0x7f   : > { %s3389_s28 = sld [smem:[#allocation4 + $0x75]] }
  0x80   : > { %s5937_s1 = sld [smem:[#allocation45_spill]] }
  0x81   : > { %689 = vrot.lane.b32.xlu1 %v687_v30, %s5876_s15  ;;  %659 = vrot.lane.b32.xlu0 %v657_v32, %s5876_s15  ;;  %v958_v30 = vstv %s3354_s6  ;;  %v989_v32 = vmul.f32 %v3751_v9, %v988_v27  ;;  %s3368_s6 = sld [smem:[#allocation4 + $0x6c]]  ;;  %v1233_v57 = vstv %s3384_s14 }
  0x82   : > { %v959_v35 = vmul.f32 %v3741_v0, %v958_v30  ;;  %v1131_v30 = vstv %s3372_s4  ;;  %s3387_s4 = sld [smem:[#allocation4 + $0x7c]] }
  0x83   : > { %s3397_s14 = sld [smem:[#allocation4 + $0x77]] }
  0x84   : > { %s4816_s21 = sld [smem:[#allocation4 + $0x9e]] }
  0x85   : > { %749 = vrot.lane.b32.xlu1 %v747_v34, %s5874_s8  ;;  %719 = vrot.lane.b32.xlu0 %v717_v36, %s5876_s15  ;;  %v938_v36 = vstv %s3352_s9  ;;  %s3376_s9 = sld [smem:[#allocation4 + $0x66]] }
  0x86   : > { %v939_v41 = vmul.f32 %v938_v36, %v3744_v2  ;;  %s4828_s0 = sld [smem:[#allocation4 + $0xa1]] }
  0x87   : > { %s5194_s2 = sld [smem:[#allocation4 + $0x10a]] }
  0x88   : > { %s5212_s12 = sld [smem:[#allocation4 + $0x10b]] }
  0x89   : > { %729 = vrot.lane.b32.xlu1 %v727_v38, %s5876_s15  ;;  %699 = vrot.lane.b32.xlu0 %v697_v40, %s5876_s15  ;;  %v969_v38 = vmul.f32 %v3741_v0, %v968_v33 }
  0x8d   : > { %790 = vrot.lane.b32.xlu1 %v788_v42, %s5874_s8  ;;  %760 = vrot.lane.b32.xlu0 %v758_v44, %s5874_s8  ;;  %v998_v42 = vstv %s3358_s11  ;;  %v1029_v44 = vmul.f32 %v3762_v18, %v1028_v39  ;;  %s3373_s11 = sld [smem:[#allocation4 + $0x6d]]  ;;  %v1193_v39 = vstv %s3380_s7 }
  0x8e   : > { %v999_v47 = vmul.f32 %v3751_v9, %v998_v42  ;;  %s3393_s7 = sld [smem:[#allocation4 + $0x76]] }
  0x91   : > { %770 = vrot.lane.b32.xlu1 %v768_v46, %s5874_s8  ;;  %739 = vrot.lane.b32.xlu0 %v737_v48, %s5876_s15  ;;  %v978_v48 = vstv %s3356_s16  ;;  %s3381_s16 = sld [smem:[#allocation4 + $0x67]] }
  0x92   : > { %v979_v53 = vmul.f32 %v3741_v0, %v978_v48  ;;  %v1018_v0 = vstv %s3930_s20  ;;  %v1172_v48 = vstv %s3377_s10  ;;  %s3385_s20 = sld [smem:[#allocation4 + $0x74]] }
  0x93   : > { %v1019_v4 = vmul.f32 %v3751_v9, %v1018_v0  ;;  %s3391_s10 = sld [smem:[#allocation4 + $0x7d]] }
  0x94   : > { %s4804_s15 = sld [smem:[#allocation4 + $0x97]] }
  0x95   : > { %830 = vrot.lane.b32.xlu1 %v828_v50, %s5874_s8  ;;  %800 = vrot.lane.b32.xlu0 %v798_v52, %s5874_s8  ;;  %v3937_v50 = vld [vmem:[%s3738_s27] ss:$4 sm:$0xf] }
  0x96   : > { %v1091_v17 = vmul.f32 %v1090_v11, %v3937_v50 }
  0x99   : > { %810 = vrot.lane.b32.xlu1 %v808_v54, %s5874_s8  ;;  %780 = vrot.lane.b32.xlu0 %v778_v56, %s5874_s8  ;;  %v1038_v54 = vstv %s3362_s18  ;;  %v1070_v56 = vmul.f32 %v1069_v51, %v3937_v50  ;;  %s3378_s18 = sld [smem:[#allocation4 + $0x6e]] }
  0x9a   : > { %v1039_v59 = vmul.f32 %v3762_v18, %v1038_v54 }
  0x9d   : > { %870 = vrot.lane.b32.xlu1 %v868_v58, %s5874_s8  ;;  %840 = vrot.lane.b32.xlu0 %v838_v60, %s5874_s8 }
  0x9f   : > { %v3869_v1 = vpop.permute.xlu1 %307  ;;  %v3872_v5 = vpop.permute.xlu0 %266 }
  0xa1   : > { %850 = vrot.lane.b32.xlu1 %v848_v62, %s5874_s8  ;;  %820 = vrot.lane.b32.xlu0 %v818_v3, %s5874_s8  ;;  %v3964_v62 = vld [vmem:[%s3738_s27 + $0x1] ss:$4 sm:$0xf] }
  0xa2   : > { %v1132_v36 = vmul.f32 %v3964_v62, %v1131_v30 }
  0xa3   : > { %v3877_v8 = vpop.permute.xlu1 %287  ;;  %v3880_v12 = vpop.permute.xlu0 %277 }
  0xa5   : > { %910 = vrot.lane.b32.xlu1 %v908_v6, %s5872_s30  ;;  %880 = vrot.lane.b32.xlu0 %v878_v10, %s5874_s8  ;;  %v1080_v6 = vstv %s3366_s23  ;;  %v1112_v10 = vmul.f32 %v3964_v62, %v1111_v63  ;;  %s3383_s23 = sld [smem:[#allocation4 + $0x6f]] }
  0xa6   : > { %v1081_v14 = vmul.f32 %v1080_v6, %v3937_v50  ;;  %v1213_v6 = vstv %s3382_s17  ;;  %s3395_s17 = sld [smem:[#allocation4 + $0x7e]] }
  0xa7   : > { %v3885_v15 = vpop.permute.xlu1 %347  ;;  %v3888_v19 = vpop.permute.xlu0 %317 }
  0xa9   : > { %890 = vrot.lane.b32.xlu1 %v888_v13, %s5874_s8  ;;  %860 = vrot.lane.b32.xlu0 %v858_v16, %s5874_s8  ;;  %v1058_v16 = vstv %s3957_s25  ;;  %s3392_s25 = sld [smem:[#allocation4 + $0x72]] }
  0xaa   : > { %v1059_v24 = vmul.f32 %v3762_v18, %v1058_v16 }
  0xab   : > { %v3893_v22 = vpop.permute.xlu1 %327  ;;  %v3896_v25 = vpop.permute.xlu0 %297 }
  0xad   : > { %951 = vrot.lane.b32.xlu1 %v949_v20, %s5872_s30  ;;  %921 = vrot.lane.b32.xlu0 %v919_v23, %s5872_s30  ;;  %v3986_v20 = vld [vmem:[%s3738_s27 + $0x2] ss:$4 sm:$0xf] }
  0xaf   : > { %v3901_v28 = vpop.permute.xlu1 %387  ;;  %v3904_v31 = vpop.permute.xlu0 %357 }
  0xb1   : > { %931 = vrot.lane.b32.xlu1 %v929_v26, %s5872_s30  ;;  %900 = vrot.lane.b32.xlu0 %v898_v29, %s5874_s8  ;;  %v1121_v26 = vstv %s3371_s29  ;;  %v1153_v29 = vmul.f32 %v3986_v20, %v1152_v21  ;;  %v1274_v21 = vstv %s3388_s19  ;;  %s3390_s29 = sld [smem:[#allocation4 + $0x79]] }
  0xb2   : > { %v1122_v33 = vmul.f32 %v3964_v62, %v1121_v26  ;;  %s3401_s19 = sld [smem:[#allocation4 + $0x84]] }
  0xb3   : > { %v3909_v34 = vpop.permute.xlu1 %367  ;;  %v3912_v37 = vpop.permute.xlu0 %337 }
  0xb5   : > { %991 = vrot.lane.b32.xlu1 %v989_v32, %s5872_s30  ;;  %961 = vrot.lane.b32.xlu0 %v959_v35, %s5872_s30  ;;  %v1100_v35 = vstv %s3368_s6  ;;  %s3396_s6 = sld [smem:[#allocation4 + $0x73]] }
  0xb6   : > { %v1101_v42 = vmul.f32 %v1100_v35, %v3937_v50  ;;  %v1254_v35 = vstv %s3386_s22  ;;  %s3399_s22 = sld [smem:[#allocation4 + $0x7f]] }
  0xb7   : > { %v3917_v40 = vpop.permute.xlu1 %427  ;;  %v3920_v43 = vpop.permute.xlu0 %397 }
  0xb9   : > { %971 = vrot.lane.b32.xlu1 %v969_v38, %s5872_s30  ;;  %941 = vrot.lane.b32.xlu0 %v939_v41, %s5872_s30  ;;  %v4005_v38 = vld [vmem:[%s3738_s27 + $0x3] ss:$4 sm:$0xf] }
  0xbb   : > { %v3927_v46 = vpop.permute.xlu1 %407  ;;  %v3932_v2 = vpop.permute.xlu0 %377 }
  0xbd   : > { %1031 = vrot.lane.b32.xlu1 %v1029_v44, %s5872_s30  ;;  %1001 = vrot.lane.b32.xlu0 %v999_v47, %s5872_s30  ;;  %v1162_v44 = vstv %s3376_s9  ;;  %v1194_v47 = vmul.f32 %v4005_v38, %v1193_v39  ;;  %s3394_s9 = sld [smem:[#allocation4 + $0x7a]] }
  0xbe   : > { %v1163_v51 = vmul.f32 %v3986_v20, %v1162_v44 }
  0xbf   : > { %v3942_v52 = vpop.permute.xlu1 %468  ;;  %v3945_v55 = vpop.permute.xlu0 %438 }
  0xc1   : > { %1011 = vrot.lane.b32.xlu1 %v1009_v49, %s5872_s30  ;;  %981 = vrot.lane.b32.xlu0 %v979_v53, %s5872_s30  ;;  %v1141_v53 = vstv %s3373_s11  ;;  %s3400_s11 = sld [smem:[#allocation4 + $0x80]] }
  0xc2   : > { %v1142_v0 = vmul.f32 %v3964_v62, %v1141_v53 }
  0xc3   : > { %v3953_v58 = vpop.permute.xlu1 %448  ;;  %v3959_v60 = vpop.permute.xlu0 %417 }
  0xc5   : > { %1072 = vrot.lane.b32.xlu1 %v1070_v56, %s5870_s26  ;;  %1041 = vrot.lane.b32.xlu0 %v1039_v59, %s5872_s30  ;;  %v1173_v56 = vmul.f32 %v3986_v20, %v1172_v48  ;;  %v1314_v48 = vstv %s3392_s25  ;;  %s3408_s25 = sld [smem:[#allocation4 + $0x82]] }
  0xc7   : > { %v3968_v3 = vpop.permute.xlu1 %508  ;;  %v3971_v7 = vpop.permute.xlu0 %478 }
  0xc9   : > { %1051 = vrot.lane.b32.xlu1 %v1049_v61, %s5872_s30  ;;  %1021 = vrot.lane.b32.xlu0 %v1019_v4, %s5872_s30  ;;  %v1203_v61 = vstv %s3381_s16  ;;  %v1234_v4 = vmul.f32 %v1233_v57, %v3937_v50  ;;  %s3398_s16 = sld [smem:[#allocation4 + $0x7b]] }
  0xca   : > { %v1204_v11 = vmul.f32 %v4005_v38, %v1203_v61  ;;  %v1294_v61 = vstv %s3390_s29  ;;  %s3406_s29 = sld [smem:[#allocation4 + $0x89]] }
  0xcb   : > { %v3977_v13 = vpop.permute.xlu1 %488  ;;  %v3981_v9 = vpop.permute.xlu0 %458 }
  0xcd   : > { %1114 = vrot.lane.b32.xlu1 %v1112_v10, %s5870_s26  ;;  %1083 = vrot.lane.b32.xlu0 %v1081_v14, %s5870_s26  ;;  %v1182_v14 = vstv %s3378_s18  ;;  %s3404_s18 = sld [smem:[#allocation4 + $0x81]] }
  0xce   : > { %v1183_v26 = vmul.f32 %v3986_v20, %v1182_v14 }
  0xcf   : > { %v3989_v23 = vpop.permute.xlu1 %548  ;;  %v3992_v27 = vpop.permute.xlu0 %518 }
  0xd1   : > { %1093 = vrot.lane.b32.xlu1 %v1091_v17, %s5870_s26  ;;  %1061 = vrot.lane.b32.xlu0 %v1059_v24, %s5872_s30  ;;  %v1214_v17 = vmul.f32 %v4005_v38, %v1213_v6  ;;  %s4796_s30 = sld [smem:[#allocation4 + $0x95]] }
  0xd3   : > { %v3997_v32 = vpop.permute.xlu1 %528  ;;  %v4000_v18 = vpop.permute.xlu0 %498 }
  0xd5   : > { %1155 = vrot.lane.b32.xlu1 %v1153_v29, %s5870_s26  ;;  %1124 = vrot.lane.b32.xlu0 %v1122_v33, %s5870_s26  ;;  %v1244_v29 = vstv %s3385_s20  ;;  %v1275_v33 = vmul.f32 %v3964_v62, %v1274_v21  ;;  %v1354_v21 = vstv %s3396_s6  ;;  %s3402_s20 = sld [smem:[#allocation4 + $0x88]] }
  0xd6   : > { %v1245_v39 = vmul.f32 %v1244_v29, %v3937_v50  ;;  %s4119_s6 = sld [smem:[#allocation4 + $0x83]] }
  0xd7   : > { %v4008_v41 = vpop.permute.xlu1 %588  ;;  %v4011_v45 = vpop.permute.xlu0 %558 }
  0xd9   : > { %1134 = vrot.lane.b32.xlu1 %v1132_v36, %s5870_s26  ;;  %1103 = vrot.lane.b32.xlu0 %v1101_v42, %s5870_s26  ;;  %v1223_v42 = vstv %s3383_s23  ;;  %s5866_s23 = smov 86  }
  0xda   : > { %v1224_v53 = vmul.f32 %v4005_v38, %v1223_v42  ;;  %v1334_v42 = vstv %s3394_s9  ;;  %s4131_s9 = sld [smem:[#allocation4 + $0x8a]] }
  0xdb   : > { %v4016_v49 = vpop.permute.xlu1 %568  ;;  %v4019_v54 = vpop.permute.xlu0 %538 }
  0xdd   : > { %1196 = vrot.lane.b32.xlu1 %v1194_v47, %s5870_s26  ;;  %1165 = vrot.lane.b32.xlu0 %v1163_v51, %s5870_s26  ;;  %v1255_v47 = vmul.f32 %v1254_v35, %v3937_v50 }
  0xdf   : > { %v4024_v59 = vpop.permute.xlu1 %629  ;;  %v4027_v63 = vpop.permute.xlu0 %599 }
  0xe1   : > { %1175 = vrot.lane.b32.xlu1 %v1173_v56, %s5870_s26  ;;  %1144 = vrot.lane.b32.xlu0 %v1142_v0, %s5870_s26  ;;  %v1284_v56 = vstv %s3389_s28  ;;  %v1315_v0 = vmul.f32 %v3986_v20, %v1314_v48  ;;  %s3405_s28 = sld [smem:[#allocation4 + $0x85]] }
  0xe2   : > { %v1285_v6 = vmul.f32 %v3964_v62, %v1284_v56 }
  0xe3   : > { %v4032_v10 = vpop.permute.xlu1 %609  ;;  %v4035_v16 = vpop.permute.xlu0 %578 }
  0xe5   : > { %1236 = vrot.lane.b32.xlu1 %v1234_v4, %s5868_s24  ;;  %1206 = vrot.lane.b32.xlu0 %v1204_v11, %s5870_s26  ;;  %v1264_v11 = vstv %s3387_s4  ;;  %s3403_s4 = sld [smem:[#allocation4 + $0x8c]] }
  0xe6   : > { %v1265_v29 = vmul.f32 %v1264_v11, %v3937_v50 }
  0xe7   : > { %v4040_v24 = vpop.permute.xlu1 %669  ;;  %v4043_v30 = vpop.permute.xlu0 %639 }
  0xe8   : > { %5903 = vst [vmem:[#allocation8_spill] sm:$0xff] %v4043_v30  ;;  %v309_v30 = vrot.slane %v3869_v1, 1 }
  0xe9   : > { %1216 = vrot.lane.b32.xlu1 %v1214_v17, %s5870_s26  ;;  %1185 = vrot.lane.b32.xlu0 %v1183_v26, %s5870_s26  ;;  %v1295_v17 = vmul.f32 %v3964_v62, %v1294_v61  ;;  %v1394_v61 = vstv %s3400_s11  ;;  %s4144_s11 = sld [smem:[#allocation4 + $0x8e]] }
  0xeb   : > { %v4048_v36 = vpop.permute.xlu1 %649  ;;  %v4051_v44 = vpop.permute.xlu0 %619 }
  0xec   : > { %5904 = vst [vmem:[#allocation9_spill] sm:$0xff] %v4048_v36  ;;  %5905 = vst [vmem:[#allocation10_spill] sm:$0xff] %v4051_v44 }
  0xed   : > { %1277 = vrot.lane.b32.xlu1 %v1275_v33, %s5868_s24  ;;  %1247 = vrot.lane.b32.xlu0 %v1245_v39, %s5868_s24  ;;  %v1324_v33 = vstv %s3393_s7  ;;  %v1355_v39 = vmul.f32 %v4005_v38, %v1354_v21  ;;  %s4125_s7 = sld [smem:[#allocation4 + $0x86]] }
  0xee   : > { %v1325_v48 = vmul.f32 %v3986_v20, %v1324_v33  ;;  %v1374_v33 = vstv %s3398_s16  ;;  %s4153_s16 = sld [smem:[#allocation4 + $0x87]] }
  0xef   : > { %v4056_v51 = vpop.permute.xlu1 %709  ;;  %v4059_v57 = vpop.permute.xlu0 %679 }
  0xf0   : > { %5906 = vst [vmem:[#allocation11_spill] sm:$0xff] %v4056_v51  ;;  %5907 = vst [vmem:[#allocation12_spill] sm:$0xff] %v4059_v57 }
  0xf1   : > { %1257 = vrot.lane.b32.xlu1 %v1255_v47, %s5868_s24  ;;  %1226 = vrot.lane.b32.xlu0 %v1224_v53, %s5870_s26  ;;  %v1304_v53 = vstv %s3391_s10  ;;  %s4137_s10 = sld [smem:[#allocation4 + $0x8d]] }
  0xf2   : > { %v1305_v11 = vmul.f32 %v3964_v62, %v1304_v53  ;;  %v1375_v53 = vmul.f32 %v4005_v38, %v1374_v33  ;;  %s4794_s26 = sld [smem:[#allocation4 + $0x94]] }
  0xf3   : > { %v4064_v4 = vpop.permute.xlu1 %689  ;;  %v4067_v14 = vpop.permute.xlu0 %659 }
  0xf4   : > { %5908 = vst [vmem:[#allocation13_spill] sm:$0xff] %v4064_v4  ;;  %5909 = vst [vmem:[#allocation14_spill] sm:$0xff] %v4067_v14 }
  0xf5   : > { %1317 = vrot.lane.b32.xlu1 %v1315_v0, %s5868_s24  ;;  %1287 = vrot.lane.b32.xlu0 %v1285_v6, %s5868_s24  ;;  %v1335_v0 = vmul.f32 %v3986_v20, %v1334_v42 }
  0xf7   : > { %v4072_v26 = vpop.permute.xlu1 %749  ;;  %v4075_v35 = vpop.permute.xlu0 %719 }
  0xf8   : > { %5910 = vst [vmem:[#allocation15_spill] sm:$0xff] %v4072_v26  ;;  %5911 = vst [vmem:[#allocation16_spill] sm:$0xff] %v4075_v35 }
  0xf9   : > { %1297 = vrot.lane.b32.xlu1 %v1295_v17, %s5868_s24  ;;  %1267 = vrot.lane.b32.xlu0 %v1265_v29, %s5868_s24  ;;  %v1364_v17 = vstv %s3397_s14  ;;  %v1395_v29 = vmul.f32 %v1394_v61, %v3937_v50  ;;  %s4146_s14 = sld [smem:[#allocation4]] }
  0xfa   : > { %v1365_v42 = vmul.f32 %v4005_v38, %v1364_v17 }
  0xfb   : > { %v4080_v47 = vpop.permute.xlu1 %729  ;;  %v4083_v56 = vpop.permute.xlu0 %699 }
  0xfc   : > { %5912 = vst [vmem:[#allocation17_spill] sm:$0xff] %v4080_v47  ;;  %5913 = vst [vmem:[#allocation18_spill] sm:$0xff] %v4083_v56 }
  0xfd   : > { %1357 = vrot.lane.b32.xlu1 %v1355_v39, %s5868_s24  ;;  %1327 = vrot.lane.b32.xlu0 %v1325_v48, %s5868_s24  ;;  %v1344_v48 = vstv %s3395_s17  ;;  %s4155_s17 = sld [smem:[#allocation4 + $0x1]] }
  0xff   : > { %v4088_v6 = vpop.permute.xlu1 %790  ;;  %v4091_v21 = vpop.permute.xlu0 %760 }
 0x100   : > { %5914 = vst [vmem:[#allocation19_spill] sm:$0xff] %v4088_v6  ;;  %5915 = vst [vmem:[#allocation20_spill] sm:$0xff] %v4091_v21  ;;  %v1415_v21 = vstv %s3402_s20  ;;  %s4171_s20 = sld [smem:[#allocation4 + $0x8b]] }
 0x101   : > { %1337 = vrot.lane.b32.xlu1 %v1335_v0, %s5868_s24  ;;  %1307 = vrot.lane.b32.xlu0 %v1305_v11, %s5868_s24  ;;  %v1435_v0 = vstv %s3404_s18  ;;  %v1345_v11 = vmul.f32 %v3986_v20, %v1344_v48  ;;  %v1416_v48 = vmul.f32 %v1415_v21, %v3937_v50  ;;  %v1455_v21 = vstv %s3406_s29  ;;  %s4162_s18 = sld [smem:[#allocation4 + $0x8f]] }
 0x102   : > { %s4188_s29 = sld [smem:[#allocation4 + $0x5]] }
 0x103   : > { %v4096_v39 = vpop.permute.xlu1 %770  ;;  %v4099_v6 = vpop.permute.xlu0 %739 }
 0x104   : > { %5916 = vst [vmem:[#allocation21_spill] sm:$0xff] %v4096_v39  ;;  %5917 = vst [vmem:[#allocation22_spill] sm:$0xff] %v4099_v6  ;;  %v1405_v39 = vstv %s3401_s19  ;;  %v1436_v6 = vmul.f32 %v3964_v62, %v1435_v0  ;;  %s4164_s19 = sld [smem:[#allocation4 + $0x8]] }
 0x105   : > { %1397 = vrot.lane.b32.xlu1 %v1395_v29, %s5866_s23  ;;  %1367 = vrot.lane.b32.xlu0 %v1365_v42, %s5868_s24  ;;  %v1406_v33 = vmul.f32 %v1405_v39, %v3937_v50  ;;  %v1384_v42 = vstv %s3399_s22  ;;  %s4173_s22 = sld [smem:[#allocation4 + $0x9]] }
 0x106   : > { %v1385_v0 = vmul.f32 %v4005_v38, %v1384_v42 }
 0x107   : > { %v4104_v61 = vpop.permute.xlu1 %830  ;;  %v4107_v17 = vpop.permute.xlu0 %800 }
 0x108   : > { %5918 = vst [vmem:[#allocation23_spill] sm:$0xff] %v4104_v61  ;;  %5919 = vst [vmem:[#allocation24_spill] sm:$0xff] %v4107_v17  ;;  %v1475_v17 = vstv %s3408_s25  ;;  %s4179_s25 = sld [smem:[#allocation4 + $0x2]] }
 0x109   : > { %1377 = vrot.lane.b32.xlu1 %v1375_v53, %s5868_s24  ;;  %1347 = vrot.lane.b32.xlu0 %v1345_v11, %s5868_s24  ;;  %v1445_v11 = vstv %s3405_s28  ;;  %s4182_s28 = sld [smem:[#allocation4 + $0x4]] }
 0x10a   : > { %v1446_v42 = vmul.f32 %v3964_v62, %v1445_v11 }
 0x10b   : > { %v4112_v29 = vpop.permute.xlu1 %810  ;;  %v4115_v61 = vpop.permute.xlu0 %780 }
 0x10c   : > { %5920 = vst [vmem:[#allocation25_spill] sm:$0xff] %v4112_v29  ;;  %5921 = vst [vmem:[#allocation26_spill] sm:$0xff] %v4115_v61  ;;  %v219_v29 = vstv %s4173_s22  ;;  %s4704_s22 = sld [smem:[#allocation4 + $0x91]] }
 0x10d   : > { %1438 = vrot.lane.b32.xlu1 %v1436_v6, %s5866_s23  ;;  %1408 = vrot.lane.b32.xlu0 %v1406_v33, %s5866_s23  ;;  %v1476_v6 = vmul.f32 %v3986_v20, %v1475_v17  ;;  %v1456_v17 = vmul.f32 %v3964_v62, %v1455_v21 }
 0x10f   : > { %v4122_v53 = vpop.permute.xlu1 %870  ;;  %v4127_v39 = vpop.permute.xlu0 %840 }
 0x110   : > { %5922 = vst [vmem:[#allocation27_spill] sm:$0xff] %v4122_v53  ;;  %5923 = vst [vmem:[#allocation28_spill] sm:$0xff] %v4127_v39  ;;  %v1425_v53 = vstv %s3403_s4  ;;  %s4192_s4 = sld [smem:[#allocation4 + $0xa]]  ;;  %v201_v39 = vstv %s4164_s19 }
 0x111   : > { %1418 = vrot.lane.b32.xlu1 %v1416_v48, %s5866_s23  ;;  %1387 = vrot.lane.b32.xlu0 %v1385_v0, %s5868_s24  ;;  %v1515_v48 = vstv %s4119_s6  ;;  %v1426_v11 = vmul.f32 %v1425_v53, %v3937_v50  ;;  %s4199_s6 = sld [smem:[#allocation4 + $0x3]] }
 0x112   : > { %v1516_v21 = vmul.f32 %v4005_v38, %v1515_v48  ;;  %s4254_s19 = sld [smem:[#allocation4 + $0xf]] }
 0x113   : > { %v4134_v33 = vpop.permute.xlu1 %850  ;;  %v4139_v61 = vpop.permute.xlu0 %820  ;;  %s4790_s24 = sld [smem:[#allocation4 + $0x9b]] }
 0x114   : > { %5924 = vst [vmem:[#allocation29_spill] sm:$0xff] %v4134_v33  ;;  %5925 = vst [vmem:[#allocation30_spill] sm:$0xff] %v4139_v61  ;;  %v1485_v33 = vstv %s4125_s7  ;;  %v1495_v61 = vstv %s4131_s9  ;;  %s4202_s7 = sld [smem:[#allocation4 + $0xb]] }
 0x115   : > { %1478 = vrot.lane.b32.xlu1 %v1476_v6, %s5866_s23  ;;  %1448 = vrot.lane.b32.xlu0 %v1446_v42, %s5866_s23  ;;  %v1486_v53 = vmul.f32 %v3986_v20, %v1485_v33  ;;  %v1465_v42 = vstv %s4137_s10  ;;  %v1496_v48 = vmul.f32 %v3986_v20, %v1495_v61  ;;  %s4212_s9 = sld [smem:[#allocation4 + $0x6]] }
 0x116   : > { %s4218_s10 = sld [smem:[#allocation4 + $0xc]]  ;;  %v237_v14 = vstv %s4192_s4 }
 0x117   : > { %v4149_v0 = vpop.permute.xlu1 %910  ;;  %v4157_v6 = vpop.permute.xlu0 %880  ;;  %s4738_s4 = sld [smem:[#allocation4 + $0xa8]] }
 0x118   : > { %5926 = vst [vmem:[#allocation31_spill] sm:$0xff] %v4149_v0  ;;  %5927 = vst [vmem:[#allocation32_spill] sm:$0xff] %v4157_v6  ;;  %v4209_v6 = vld [vmem:[%s3738_s27] ss:$4 sm:$0x7] }
 0x119   : > { %1458 = vrot.lane.b32.xlu1 %v1456_v17, %s5866_s23  ;;  %1428 = vrot.lane.b32.xlu0 %v1426_v11, %s5866_s23  ;;  %v1505_v11 = vstv %s4144_s11  ;;  %s4225_s11 = sld [smem:[#allocation4 + $0xd]]  ;;  %v202_v35 = vmul.f32 %v4209_v6, %v201_v39 }
 0x11b   : > { %v4167_v50 = vpop.permute.xlu1 %890  ;;  %v4175_v17 = vpop.permute.xlu0 %860 }
 0x11c   : > { %5928 = vst [vmem:[#allocation33_spill] sm:$0xff] %v4167_v50  ;;  %5929 = vst [vmem:[#allocation34_spill] sm:$0xff] %v4175_v17  ;;  %v1466_v50 = vmul.f32 %v3964_v62, %v1465_v42  ;;  %v1525_v17 = vstv %s4153_s16  ;;  %v1545_v62 = vstv %s4162_s18  ;;  %s4243_s16 = sld [smem:[#allocation4 + $0xe]] }
 0x11d   : > { %1518 = vrot.lane.b32.xlu1 %v1516_v21, %s5866_s23  ;;  %1488 = vrot.lane.b32.xlu0 %v1486_v53, %s5866_s23  ;;  %v193_v21 = vstv %s4146_s14  ;;  %v1506_v53 = vmul.f32 %v3986_v20, %v1505_v11  ;;  %v1535_v20 = vstv %s4171_s20  ;;  %s4234_s14 = sld [smem:[#allocation4 + $0x7]] }
 0x11e   : > { %v3635_v11 = vld [vmem:[%s3738_s27 + $0x1] ss:$4 sm:$0x7]  ;;  %v1536_v56 = vmul.f32 %v4005_v38, %v1535_v20  ;;  %v3674_v20 = vmov 0.0   ;;  %s4697_s20 = sld [smem:[#allocation4 + $0x90]] }
 0x11f   : > { %v4185_v33 = vpop.permute.xlu1 %951  ;;  %v4194_v61 = vpop.permute.xlu0 %921  ;;  %v220_v47 = vmul.f32 %v3635_v11, %v219_v29  ;;  %186 = vst [vmem:[#allocation2] sm:$0xff] %v3674_v20  ;;  %190 = vst.msk [vmem:[#allocation2 + $0x8] sm:$0xff] %vm189_vm2, %v3674_v20  ;;  %s4762_s18 = sld [smem:[#allocation4 + $0xb1]]  ;;  %vm3099_vm2 = vcmask 388352  }
 0x120   : > { %5930 = vst [vmem:[#allocation35_spill] sm:$0xff] %v4185_v33  ;;  %5931 = vst [vmem:[#allocation36_spill] sm:$0xff] %v4194_v61  ;;  %v211_v33 = vstv %s4155_s17  ;;  %v1526_v61 = vmul.f32 %v4005_v38, %v1525_v17  ;;  %v1546_v17 = vmul.f32 %v4005_v38, %v1545_v62  ;;  %s4756_s17 = sld [smem:[#allocation4 + $0xaa]] }
 0x121   : > { %1498 = vrot.lane.b32.xlu1 %v1496_v48, %s5866_s23  ;;  %1468 = vrot.lane.b32.xlu0 %v1466_v50, %s5866_s23  ;;  %v194_v48 = vmul.f32 %v4209_v6, %v193_v21  ;;  %v212_v0 = vmul.f32 %v3635_v11, %v211_v33  ;;  %v197_v21 = vstv %s4182_s28  ;;  %s4720_s28 = sld [smem:[#allocation4 + $0x92]] }
 0x123   : > { %v4205_v42 = vpop.permute.xlu1 %931  ;;  %v4220_v50 = vpop.permute.xlu0 %900  ;;  %v213_v26 = vadd.f32 %v212_v0, %v194_v48  ;;  %v221_v0 = vadd.f32 %v220_v47, %v202_v35  ;;  %v185_v48 = vld [vmem:[%s5937_s1] sm:$0x7]  ;;  %v205_v35 = vstv %s4218_s10  ;;  %v223_v47 = vstv %s4225_s11  ;;  %s4746_s10 = sld [smem:[#allocation4 + $0xb0]] }
 0x124   : > { %5932 = vst [vmem:[#allocation37_spill] sm:$0xff] %v4205_v42  ;;  %5933 = vst [vmem:[#allocation38_spill] sm:$0xff] %v4220_v50  ;;  %v229_v42 = vstv %s4179_s25  ;;  %v215_v50 = vstv %s4188_s29  ;;  %v224_v36 = vmul.f32 %v3635_v11, %v223_v47  ;;  %v206_v20 = vmul.f32 %v4209_v6, %v205_v35  ;;  %s4713_s25 = sld [smem:[#allocation4 + $0x93]]  ;;  %s5865_s29 = smov 21  }
 0x125   : > { %1508 = vrot.lane.b32.xlu1 %v1506_v53, %s5866_s23  ;;  %1528 = vrot.lane.b32.xlu0 %v1526_v61, %s5866_s23  ;;  %v3636_v53 = vld [vmem:[%s3738_s27 + $0x2] ss:$4 sm:$0x7]  ;;  %v247_v61 = vstv %s4199_s6  ;;  %v216_v38 = vmul.f32 %v3635_v11, %v215_v50  ;;  %v310_v47 = vsel %vm269_vm3, %v3869_v1, %v309_v30  ;;  %s4740_s6 = sld [smem:[#allocation4 + $0xa4]] }
 0x126   : > { %v230_v62 = vmul.f32 %v3636_v53, %v229_v42  ;;  %v238_v39 = vmul.f32 %v3636_v53, %v237_v14  ;;  %v233_v42 = vstv %s4212_s9  ;;  %v268_v14 = vrot.slane %v3872_v5, 1  ;;  %s4744_s9 = sld [smem:[#allocation4 + $0xac]] }
 0x127   : > { %v4229_v33 = vpop.permute.xlu1 %991  ;;  %v4238_v4 = vpop.permute.xlu0 %961  ;;  %s4748_s11 = sld [smem:[#allocation4 + $0xa9]] }
 0x128   : > { %5934 = vst [vmem:[#allocation39_spill] sm:$0xff] %v4229_v33  ;;  %5935 = vst [vmem:[#allocation40_spill] sm:$0xff] %v4238_v4  ;;  %v198_v33 = vmul.f32 %v4209_v6, %v197_v21  ;;  %v255_v21 = vstv %s4202_s7  ;;  %v234_v4 = vmul.f32 %v3636_v53, %v233_v42  ;;  %v270_v42 = vsel %vm269_vm3, %v3872_v5, %v268_v14  ;;  %s4742_s7 = sld [smem:[#allocation4 + $0xa5]] }
 0x129   : > { %1548 = vrot.lane.b32.xlu1 %v1546_v17, %s5866_s23  ;;  %1538 = vrot.lane.b32.xlu0 %v1536_v56, %s5866_s23  ;;  %v3637_v17 = vld [vmem:[%s3738_s27 + $0x3] ss:$4 sm:$0x7]  ;;  %v231_v56 = vadd.f32 %v230_v62, %v213_v26  ;;  %v239_v26 = vadd.f32 %v238_v39, %v221_v0  ;;  %v251_v62 = vstv %s4234_s14  ;;  %v279_v0 = vrot.slane %v3880_v12, 1  ;;  %s4752_s14 = sld [smem:[#allocation4 + $0xad]] }
 0x12a   : > { %v248_v50 = vmul.f32 %v3637_v17, %v247_v61  ;;  %v217_v57 = vadd.f32 %v216_v38, %v198_v33  ;;  %v256_v61 = vmul.f32 %v3637_v17, %v255_v21  ;;  %v289_v33 = vrot.slane %v3877_v8, 1  ;;  %s4788_s23 = sld [smem:[#allocation4 + $0x9a]] }
 0x12b   : > { %v4246_v29 = vpop.permute.xlu1 %971  ;;  %v241_v38 = vstv %s4243_s16  ;;  %v259_v6 = vstv %s4254_s19  ;;  %v349_v14 = vrot.slane %v3885_v15, 1  ;;  %s4754_s16 = sld [smem:[#allocation4 + $0xa6]] }
 0x12c   : > { %5936 = vst [vmem:[#allocation41_spill] sm:$0xff] %v4246_v29  ;;  %v4256_v29 = vpop.permute.xlu0 %941  ;;  %v249_v44 = vadd.f32 %v248_v50, %v231_v56  ;;  %v257_v39 = vadd.f32 %v256_v61, %v239_v26  ;;  %v242_v50 = vmul.f32 %v3636_v53, %v241_v38  ;;  %v225_v56 = vadd.f32 %v224_v36, %v206_v20  ;;  %s4764_s19 = sld [smem:[#allocation4 + $0xae]] }
 0x12d   : > { %5938 = vst [vmem:[#allocation42_spill] sm:$0xff] %v4256_v29  ;;  %1559 = vrot.lane.b32.xlu0 %v185_v48, %s5874_s8  ;;  %v252_v48 = vmul.f32 %v3637_v17, %v251_v62  ;;  %v290_v5 = vsel %vm269_vm3, %v3877_v8, %v289_v33  ;;  %v329_v61 = vrot.slane %v3893_v22, 1  ;;  %v280_v36 = vsel %vm269_vm3, %v3880_v12, %v279_v0  ;;  %s4800_s8 = sld [smem:[#allocation4 + $0x96]] }
 0x12e   : > { %v272_v11 = vadd.f32 %v270_v42, %v249_v44  ;;  %v292_v53 = vadd.f32 %v290_v5, %v257_v39  ;;  %v260_v62 = vmul.f32 %v3637_v17, %v259_v6  ;;  %v243_v20 = vadd.f32 %v242_v50, %v225_v56  ;;  %s5192_s1 = sld [smem:[#allocation4 + $0x111]] }
 0x12f   : > { %v4262_v51 = vpop.permute.xlu1 %1031  ;;  %v350_v8 = vsel %vm269_vm3, %v3885_v15, %v349_v14  ;;  %v389_v42 = vrot.slane %v3901_v28, 1  ;;  %v330_v12 = vsel %vm269_vm3, %v3893_v22, %v329_v61  ;;  %v359_v38 = vrot.slane %v3904_v31, 1 }
 0x130   : > { %5939 = vst [vmem:[#allocation43_spill] sm:$0xff] %v4262_v51  ;;  %v4266_v29 = vpop.permute.xlu0 %1001  ;;  %v235_v51 = vadd.f32 %v234_v4, %v217_v57  ;;  %v319_v57 = vrot.slane %v3888_v19, 1  ;;  %v312_v44 = vadd.f32 %v310_v47, %v272_v11  ;;  %v369_v17 = vrot.slane %v3909_v34, 1 }
 0x131   : > { %v339_v39 = vrot.slane %v3912_v37, 1  ;;  %v429_v15 = vrot.slane %v3917_v40, 1  ;;  %v261_v11 = vadd.f32 %v260_v62, %v243_v20  ;;  %v332_v6 = vadd.f32 %v330_v12, %v292_v53 }
 0x132   : > { %v253_v4 = vadd.f32 %v252_v48, %v235_v51  ;;  %v320_v30 = vsel %vm269_vm3, %v3888_v19, %v319_v57  ;;  %v299_v51 = vrot.slane %v3896_v25, 1  ;;  %v352_v0 = vadd.f32 %v350_v8, %v312_v44 }
 0x133   : > { %v4273_v21 = vpop.permute.xlu1 %1011  ;;  %v390_v56 = vsel %vm269_vm3, %v3901_v28, %v389_v42  ;;  %v399_v47 = vrot.slane %v3920_v43, 1  ;;  %v360_v5 = vsel %vm269_vm3, %v3904_v31, %v359_v38  ;;  %v370_v14 = vsel %vm269_vm3, %v3909_v34, %v369_v17 }
 0x134   : > { %v4277_v35 = vpop.permute.xlu0 %981  ;;  %v282_v33 = vadd.f32 %v280_v36, %v253_v4  ;;  %v300_v22 = vsel %vm269_vm3, %v3896_v25, %v299_v51  ;;  %v409_v57 = vrot.slane %v3927_v46, 1  ;;  %v379_v4 = vrot.slane %v3932_v2, 1 }
 0x135   : > { %v340_v25 = vsel %vm269_vm3, %v3912_v37, %v339_v39  ;;  %v431_v28 = vsel %vm430_vm4, %v3917_v40, %v429_v15  ;;  %v470_v36 = vrot.slane %v3942_v52, 1  ;;  %v440_v44 = vrot.slane %v3945_v55, 1 }
 0x136   : > { %v322_v19 = vadd.f32 %v320_v30, %v282_v33  ;;  %v302_v31 = vadd.f32 %v300_v22, %v261_v11  ;;  %v392_v53 = vadd.f32 %v390_v56, %v352_v0  ;;  %v450_v34 = vrot.slane %v3953_v58, 1 }
 0x137   : > { %v4286_v26 = vpop.permute.xlu1 %1072  ;;  %v372_v8 = vadd.f32 %v370_v14, %v332_v6  ;;  %v400_v30 = vsel %vm269_vm3, %v3920_v43, %v399_v47  ;;  %v410_v40 = vsel %vm269_vm3, %v3927_v46, %v409_v57  ;;  %v380_v42 = vsel %vm269_vm3, %v3932_v2, %v379_v4 }
 0x138   : > { %v4290_v1 = vpop.permute.xlu0 %1041  ;;  %v362_v20 = vadd.f32 %v360_v5, %v322_v19  ;;  %v342_v51 = vadd.f32 %v340_v25, %v302_v31  ;;  %v433_v37 = vadd.f32 %v431_v28, %v392_v53  ;;  %v471_v12 = vsel %vm430_vm4, %v3942_v52, %v470_v36 }
 0x139   : > { %v441_v38 = vsel %vm430_vm4, %v3945_v55, %v440_v44  ;;  %v419_v17 = vrot.slane %v3959_v60, 1  ;;  %v510_v43 = vrot.slane %v3968_v3, 1  ;;  %v451_v15 = vsel %vm430_vm4, %v3953_v58, %v450_v34 }
 0x13a   : > { %v402_v39 = vadd.f32 %v400_v30, %v362_v20  ;;  %v480_v46 = vrot.slane %v3971_v7, 1  ;;  %v490_v2 = vrot.slane %v3977_v13, 1  ;;  %v412_v19 = vadd.f32 %v410_v40, %v372_v8 }
 0x13b   : > { %v4302_v48 = vpop.permute.xlu1 %1051  ;;  %v460_v52 = vrot.slane %v3981_v9, 1  ;;  %v550_v11 = vrot.slane %v3989_v23, 1  ;;  %v382_v55 = vadd.f32 %v380_v42, %v342_v51  ;;  %v473_v6 = vadd.f32 %v471_v12, %v433_v37 }
 0x13c   : > { %v4306_v50 = vpop.permute.xlu0 %1021  ;;  %v443_v22 = vadd.f32 %v441_v38, %v402_v39  ;;  %v453_v47 = vadd.f32 %v451_v15, %v412_v19  ;;  %v420_v58 = vsel %vm269_vm3, %v3959_v60, %v419_v17  ;;  %v511_v5 = vsel %vm430_vm4, %v3968_v3, %v510_v43 }
 0x13d   : > { %v520_v14 = vrot.slane %v3992_v27, 1  ;;  %v481_v57 = vsel %vm430_vm4, %v3971_v7, %v480_v46  ;;  %v491_v4 = vsel %vm430_vm4, %v3977_v13, %v490_v2  ;;  %v530_v25 = vrot.slane %v3997_v32, 1 }
 0x13e   : > { %v500_v28 = vrot.slane %v4000_v18, 1  ;;  %v461_v60 = vsel %vm430_vm4, %v3981_v9, %v460_v52  ;;  %v551_v3 = vsel %vm430_vm4, %v3989_v23, %v550_v11  ;;  %v590_v44 = vrot.slane %v4008_v41, 1 }
 0x13f   : > { %v4319_v61 = vpop.permute.xlu1 %1114  ;;  %v560_v31 = vrot.slane %v4011_v45, 1  ;;  %v422_v7 = vadd.f32 %v420_v58, %v382_v55  ;;  %v513_v53 = vadd.f32 %v511_v5, %v473_v6  ;;  %v570_v13 = vrot.slane %v4016_v49, 1  ;;  %v5940_v6 = vld [vmem:[#allocation8_spill] sm:$0xff]  ;;  %v5941_v5 = vld [vmem:[#allocation9_spill] sm:$0xff] }
 0x140   : > { %v4328_v62 = vpop.permute.xlu0 %1083  ;;  %v483_v20 = vadd.f32 %v481_v57, %v443_v22  ;;  %v493_v8 = vadd.f32 %v491_v4, %v453_v47  ;;  %v521_v30 = vsel %vm430_vm4, %v3992_v27, %v520_v14  ;;  %v531_v23 = vsel %vm430_vm4, %v3997_v32, %v530_v25  ;;  %v5942_v57 = vld [vmem:[#allocation10_spill] sm:$0xff] }
 0x141   : > { %v463_v9 = vadd.f32 %v461_v60, %v422_v7  ;;  %v553_v51 = vadd.f32 %v551_v3, %v513_v53  ;;  %v501_v37 = vsel %vm430_vm4, %v4000_v18, %v500_v28  ;;  %v592_v42 = vsel %vm591_vm5, %v4008_v41, %v590_v44  ;;  %v5943_v28 = vld [vmem:[#allocation11_spill] sm:$0xff]  ;;  %v5944_v3 = vld [vmem:[#allocation12_spill] sm:$0xff]  ;;  %v5945_v7 = vld [vmem:[#allocation13_spill] sm:$0xff] }
 0x142   : > { %v561_v12 = vsel %vm430_vm4, %v4011_v45, %v560_v31  ;;  %v540_v38 = vrot.slane %v4019_v54, 1  ;;  %v631_v27 = vrot.slane %v4024_v59, 1  ;;  %v523_v17 = vadd.f32 %v521_v30, %v483_v20 }
 0x143   : > { %v4336_v33 = vpop.permute.xlu1 %1093  ;;  %v571_v43 = vsel %vm430_vm4, %v4016_v49, %v570_v13  ;;  %v601_v32 = vrot.slane %v4027_v63, 1  ;;  %v611_v18 = vrot.slane %v4032_v10, 1  ;;  %v533_v15 = vadd.f32 %v531_v23, %v493_v8 }
 0x144   : > { %v4348_v0 = vpop.permute.xlu0 %1061  ;;  %v580_v41 = vrot.slane %v4035_v16, 1  ;;  %v671_v46 = vrot.slane %v4040_v24, 1  ;;  %v503_v45 = vadd.f32 %v501_v37, %v463_v9  ;;  %v594_v2 = vadd.f32 %v592_v42, %v553_v51  ;;  %v5946_v42 = vld [vmem:[#allocation14_spill] sm:$0xff] }
 0x145   : > { %v563_v19 = vadd.f32 %v561_v12, %v523_v17  ;;  %v573_v11 = vadd.f32 %v571_v43, %v533_v15  ;;  %v541_v49 = vsel %vm430_vm4, %v4019_v54, %v540_v38  ;;  %v632_v55 = vsel %vm591_vm5, %v4024_v59, %v631_v27  ;;  %v5947_v38 = vld [vmem:[#allocation15_spill] sm:$0xff]  ;;  %v5949_v15 = vld [vmem:[#allocation17_spill] sm:$0xff] }
 0x146   : > { %v641_v22 = vrot.slane %v5940_v6, 1  ;;  %v602_v47 = vsel %vm591_vm5, %v4027_v63, %v601_v32  ;;  %v612_v58 = vsel %vm591_vm5, %v4032_v10, %v611_v18  ;;  %v651_v14 = vrot.slane %v5941_v5, 1  ;;  %v5948_v32 = vld [vmem:[#allocation16_spill] sm:$0xff] }
 0x147   : > { %v4352_v56 = vpop.permute.xlu1 %1155  ;;  %v621_v4 = vrot.slane %v5942_v57, 1  ;;  %v581_v54 = vsel %vm430_vm4, %v4035_v16, %v580_v41  ;;  %v672_v59 = vsel %vm591_vm5, %v4040_v24, %v671_v46  ;;  %v711_v60 = vrot.slane %v5943_v28, 1 }
 0x148   : > { %v4365_v36 = vpop.permute.xlu0 %1124  ;;  %v681_v44 = vrot.slane %v5944_v3, 1  ;;  %v543_v63 = vadd.f32 %v541_v49, %v503_v45  ;;  %v634_v31 = vadd.f32 %v632_v55, %v594_v2  ;;  %v691_v10 = vrot.slane %v5945_v7, 1  ;;  %v5950_v2 = vld [vmem:[#allocation18_spill] sm:$0xff] }
 0x149   : > { %v604_v13 = vadd.f32 %v602_v47, %v563_v19  ;;  %v614_v20 = vadd.f32 %v612_v58, %v573_v11  ;;  %v642_v8 = vsel %vm591_vm5, %v5940_v6, %v641_v22  ;;  %v652_v24 = vsel %vm591_vm5, %v5941_v5, %v651_v14  ;;  %v5951_v11 = vld [vmem:[#allocation19_spill] sm:$0xff] }
 0x14a   : > { %v583_v16 = vadd.f32 %v581_v54, %v543_v63  ;;  %v674_v30 = vadd.f32 %v672_v59, %v634_v31  ;;  %v622_v9 = vsel %vm591_vm5, %v5942_v57, %v621_v4  ;;  %v712_v23 = vsel %vm591_vm5, %v5943_v28, %v711_v60  ;;  %v5952_v57 = vld [vmem:[#allocation20_spill] sm:$0xff]  ;;  %v5953_v28 = vld [vmem:[#allocation21_spill] sm:$0xff] }
 0x14b   : > { %v4374_v34 = vpop.permute.xlu1 %1134  ;;  %v682_v37 = vsel %vm591_vm5, %v5944_v3, %v681_v44  ;;  %v661_v12 = vrot.slane %v5946_v42, 1  ;;  %v751_v27 = vrot.slane %v5947_v38, 1  ;;  %v644_v17 = vadd.f32 %v642_v8, %v604_v13  ;;  %v5954_v3 = vld [vmem:[#allocation22_spill] sm:$0xff] }
 0x14c   : > { %v4382_v40 = vpop.permute.xlu0 %1103  ;;  %v692_v43 = vsel %vm591_vm5, %v5945_v7, %v691_v10  ;;  %v721_v18 = vrot.slane %v5948_v32, 1  ;;  %v731_v41 = vrot.slane %v5949_v15, 1  ;;  %v654_v45 = vadd.f32 %v652_v24, %v614_v20  ;;  %v5955_v10 = vld [vmem:[#allocation23_spill] sm:$0xff]  ;;  %v5956_v20 = vld [vmem:[#allocation24_spill] sm:$0xff]  ;;  %v5957_v24 = vld [vmem:[#allocation25_spill] sm:$0xff] }
 0x14d   : > { %v701_v19 = vrot.slane %v5950_v2, 1  ;;  %v792_v49 = vrot.slane %v5951_v11, 1  ;;  %v624_v55 = vadd.f32 %v622_v9, %v583_v16  ;;  %v714_v6 = vadd.f32 %v712_v23, %v674_v30 }
 0x14e   : > { %v684_v22 = vadd.f32 %v682_v37, %v644_v17  ;;  %v694_v58 = vadd.f32 %v692_v43, %v654_v45  ;;  %v662_v5 = vsel %vm591_vm5, %v5946_v42, %v661_v12  ;;  %v753_v14 = vsel %vm752_vm6, %v5947_v38, %v751_v27 }
 0x14f   : > { %v4394_v39 = vpop.permute.xlu1 %1196  ;;  %v762_v4 = vrot.slane %v5952_v57, 1  ;;  %v722_v54 = vsel %vm591_vm5, %v5948_v32, %v721_v18  ;;  %v732_v59 = vsel %vm591_vm5, %v5949_v15, %v731_v41  ;;  %v772_v60 = vrot.slane %v5953_v28, 1  ;;  %v5958_v41 = vld [vmem:[#allocation26_spill] sm:$0xff] }
 0x150   : > { %v4398_v52 = vpop.permute.xlu0 %1165  ;;  %v741_v44 = vrot.slane %v5954_v3, 1  ;;  %v702_v31 = vsel %vm591_vm5, %v5950_v2, %v701_v19  ;;  %v793_v7 = vsel %vm752_vm6, %v5951_v11, %v792_v49  ;;  %v832_v13 = vrot.slane %v5955_v10, 1  ;;  %v5959_v2 = vld [vmem:[#allocation27_spill] sm:$0xff] }
 0x151   : > { %v802_v8 = vrot.slane %v5956_v20, 1  ;;  %v664_v16 = vadd.f32 %v662_v5, %v624_v55  ;;  %v755_v30 = vadd.f32 %v753_v14, %v714_v6  ;;  %v812_v9 = vrot.slane %v5957_v24, 1  ;;  %v5960_v55 = vld [vmem:[#allocation28_spill] sm:$0xff] }
 0x152   : > { %v724_v37 = vadd.f32 %v722_v54, %v684_v22  ;;  %v734_v42 = vadd.f32 %v732_v59, %v694_v58  ;;  %v763_v12 = vsel %vm752_vm6, %v5952_v57, %v762_v4  ;;  %v773_v17 = vsel %vm752_vm6, %v5953_v28, %v772_v60  ;;  %v5961_v22 = vld [vmem:[#allocation29_spill] sm:$0xff]  ;;  %v5962_v57 = vld [vmem:[#allocation30_spill] sm:$0xff]  ;;  %v5963_v54 = vld [vmem:[#allocation31_spill] sm:$0xff] }
 0x153   : > { %v4411_v25 = vpop.permute.xlu1 %1175  ;;  %v704_v38 = vadd.f32 %v702_v31, %v664_v16  ;;  %v795_v27 = vadd.f32 %v793_v7, %v755_v30  ;;  %v742_v43 = vsel %vm591_vm5, %v5954_v3, %v741_v44  ;;  %v833_v18 = vsel %vm752_vm6, %v5955_v10, %v832_v13  ;;  %v5964_v13 = vld [vmem:[#allocation32_spill] sm:$0xff]  ;;  %v5965_v30 = vld [vmem:[#allocation33_spill] sm:$0xff] }
 0x154   : > { %v4420_v53 = vpop.permute.xlu0 %1144  ;;  %v803_v15 = vsel %vm752_vm6, %v5956_v20, %v802_v8  ;;  %v782_v45 = vrot.slane %v5958_v41, 1  ;;  %v872_v19 = vrot.slane %v5959_v2, 1  ;;  %v765_v11 = vadd.f32 %v763_v12, %v724_v37 }
 0x155   : > { %v813_v49 = vsel %vm752_vm6, %v5957_v24, %v812_v9  ;;  %v842_v6 = vrot.slane %v5960_v55, 1  ;;  %v852_v58 = vrot.slane %v5961_v22, 1  ;;  %v775_v14 = vadd.f32 %v773_v17, %v734_v42  ;;  %v5966_v9 = vld [vmem:[#allocation34_spill] sm:$0xff] }
 0x156   : > { %v822_v4 = vrot.slane %v5962_v57, 1  ;;  %v912_v59 = vrot.slane %v5963_v54, 1  ;;  %v744_v28 = vadd.f32 %v742_v43, %v704_v38  ;;  %v835_v60 = vadd.f32 %v833_v18, %v795_v27  ;;  %v5967_v27 = vld [vmem:[#allocation35_spill] sm:$0xff]  ;;  %v5968_v43 = vld [vmem:[#allocation36_spill] sm:$0xff] }
 0x157   : > { %v4428_v51 = vpop.permute.xlu1 %1236  ;;  %v805_v3 = vadd.f32 %v803_v15, %v765_v11  ;;  %v815_v31 = vadd.f32 %v813_v49, %v775_v14  ;;  %v783_v7 = vsel %vm752_vm6, %v5958_v41, %v782_v45  ;;  %v873_v10 = vsel %vm752_vm6, %v5959_v2, %v872_v19  ;;  %v5969_v45 = vld [vmem:[#allocation37_spill] sm:$0xff] }
 0x158   : > { %v4440_v46 = vpop.permute.xlu0 %1206  ;;  %v882_v20 = vrot.slane %v5964_v13, 1  ;;  %v843_v8 = vsel %vm752_vm6, %v5960_v55, %v842_v6  ;;  %v853_v16 = vsel %vm752_vm6, %v5961_v22, %v852_v58  ;;  %v892_v24 = vrot.slane %v5965_v30, 1 }
 0x159   : > { %v862_v37 = vrot.slane %v5966_v9, 1  ;;  %v823_v12 = vsel %vm752_vm6, %v5962_v57, %v822_v4  ;;  %v914_v38 = vsel %vm913_vm7, %v5963_v54, %v912_v59  ;;  %v953_v17 = vrot.slane %v5967_v27, 1  ;;  %v5970_v59 = vld [vmem:[#allocation38_spill] sm:$0xff] }
 0x15a   : > { %v923_v18 = vrot.slane %v5968_v43, 1  ;;  %v785_v15 = vadd.f32 %v783_v7, %v744_v28  ;;  %v875_v41 = vadd.f32 %v873_v10, %v835_v60  ;;  %v933_v2 = vrot.slane %v5969_v45, 1  ;;  %v5971_v60 = vld [vmem:[#allocation39_spill] sm:$0xff]  ;;  %v5972_v10 = vld [vmem:[#allocation40_spill] sm:$0xff] }
 0x15b   : > { %v4444_v47 = vpop.permute.xlu1 %1216  ;;  %v845_v11 = vadd.f32 %v843_v8, %v805_v3  ;;  %v855_v49 = vadd.f32 %v853_v16, %v815_v31  ;;  %v883_v55 = vsel %vm752_vm6, %v5964_v13, %v882_v20  ;;  %v893_v58 = vsel %vm752_vm6, %v5965_v30, %v892_v24  ;;  %v5973_v20 = vld [vmem:[#allocation41_spill] sm:$0xff]  ;;  %v5974_v24 = vld [vmem:[#allocation42_spill] sm:$0xff] }
 0x15c   : > { %v4457_v63 = vpop.permute.xlu0 %1185  ;;  %v825_v6 = vadd.f32 %v823_v12, %v785_v15  ;;  %v916_v22 = vadd.f32 %v914_v38, %v875_v41  ;;  %v863_v14 = vsel %vm752_vm6, %v5966_v9, %v862_v37  ;;  %v954_v4 = vsel %vm913_vm7, %v5967_v27, %v953_v17  ;;  %v5975_v37 = vld [vmem:[#allocation43_spill] sm:$0xff] }
 0x15d   : > { %v924_v54 = vsel %vm913_vm7, %v5968_v43, %v923_v18  ;;  %v902_v28 = vrot.slane %v5970_v59, 1  ;;  %v993_v3 = vrot.slane %v5971_v60, 1  ;;  %v885_v31 = vadd.f32 %v883_v55, %v845_v11 }
 0x15e   : > { %v934_v7 = vsel %vm913_vm7, %v5969_v45, %v933_v2  ;;  %v963_v13 = vrot.slane %v5972_v10, 1  ;;  %v973_v8 = vrot.slane %v5973_v20, 1  ;;  %v895_v30 = vadd.f32 %v893_v58, %v855_v49 }
 0x15f   : > { %v4466_v23 = vpop.permute.xlu1 %1277  ;;  %v943_v9 = vrot.slane %v5974_v24, 1  ;;  %v1033_v12 = vrot.slane %v5975_v37, 1  ;;  %v865_v38 = vadd.f32 %v863_v14, %v825_v6  ;;  %v956_v27 = vadd.f32 %v954_v4, %v916_v22 }
 0x160   : > { %v4474_v32 = vpop.permute.xlu0 %1247  ;;  %v926_v17 = vadd.f32 %v924_v54, %v885_v31  ;;  %v936_v18 = vadd.f32 %v934_v7, %v895_v30  ;;  %v903_v15 = vsel %vm752_vm6, %v5970_v59, %v902_v28  ;;  %v994_v41 = vsel %vm913_vm7, %v5971_v60, %v993_v3 }
 0x161   : > { %v1003_v45 = vrot.slane %v4266_v29, 1  ;;  %v964_v2 = vsel %vm913_vm7, %v5972_v10, %v963_v13  ;;  %v974_v11 = vsel %vm913_vm7, %v5973_v20, %v973_v8  ;;  %v1013_v49 = vrot.slane %v4273_v21, 1 }
 0x162   : > { %v983_v55 = vrot.slane %v4277_v35, 1  ;;  %v944_v22 = vsel %vm913_vm7, %v5974_v24, %v943_v9  ;;  %v1034_v58 = vsel %vm913_vm7, %v5975_v37, %v1033_v12  ;;  %v1074_v14 = vrot.slane %v4286_v26, 1 }
 0x163   : > { %v4486_v5 = vpop.permute.xlu1 %1257  ;;  %v1043_v4 = vrot.slane %v4290_v1, 1  ;;  %v905_v54 = vadd.f32 %v903_v15, %v865_v38  ;;  %v996_v59 = vadd.f32 %v994_v41, %v956_v27  ;;  %v1053_v28 = vrot.slane %v4302_v48, 1 }
 0x164   : > { %v4490_v44 = vpop.permute.xlu0 %1226  ;;  %v966_v3 = vadd.f32 %v964_v2, %v926_v17  ;;  %v976_v31 = vadd.f32 %v974_v11, %v936_v18  ;;  %v1004_v7 = vsel %vm913_vm7, %v4266_v29, %v1003_v45  ;;  %v1014_v20 = vsel %vm913_vm7, %v4273_v21, %v1013_v49 }
 0x165   : > { %v946_v10 = vadd.f32 %v944_v22, %v905_v54  ;;  %v1036_v13 = vadd.f32 %v1034_v58, %v996_v59  ;;  %v984_v8 = vsel %vm913_vm7, %v4277_v35, %v983_v55  ;;  %v1076_v24 = vsel %vm1075_vm8, %v4286_v26, %v1074_v14 }
 0x166   : > { %v1044_v9 = vsel %vm913_vm7, %v4290_v1, %v1043_v4  ;;  %v1023_v37 = vrot.slane %v4306_v50, 1  ;;  %v1116_v29 = vrot.slane %v4319_v61, 1  ;;  %v1006_v12 = vadd.f32 %v1004_v7, %v966_v3 }
 0x167   : > { %v4503_v42 = vpop.permute.xlu1 %1317  ;;  %v1054_v38 = vsel %vm913_vm7, %v4302_v48, %v1053_v28  ;;  %v1085_v21 = vrot.slane %v4328_v62, 1  ;;  %v1095_v35 = vrot.slane %v4336_v33, 1  ;;  %v1016_v17 = vadd.f32 %v1014_v20, %v976_v31 }
 0x168   : > { %v4512_v19 = vpop.permute.xlu0 %1287  ;;  %v1063_v26 = vrot.slane %v4348_v0, 1  ;;  %v1157_v18 = vrot.slane %v4352_v56, 1  ;;  %v986_v1 = vadd.f32 %v984_v8, %v946_v10  ;;  %v1078_v15 = vadd.f32 %v1076_v24, %v1036_v13 }
 0x169   : > { %v1046_v41 = vadd.f32 %v1044_v9, %v1006_v12  ;;  %v1056_v2 = vadd.f32 %v1054_v38, %v1016_v17  ;;  %v1024_v48 = vsel %vm913_vm7, %v4306_v50, %v1023_v37  ;;  %v1117_v11 = vsel %vm1075_vm8, %v4319_v61, %v1116_v29 }
 0x16a   : > { %v1126_v49 = vrot.slane %v4365_v36, 1  ;;  %v1086_v55 = vsel %vm1075_vm8, %v4328_v62, %v1085_v21  ;;  %v1096_v22 = vsel %vm1075_vm8, %v4336_v33, %v1095_v35  ;;  %v1136_v58 = vrot.slane %v4374_v34, 1 }
 0x16b   : > { %v4520_v57 = vpop.permute.xlu1 %1297  ;;  %v1105_v14 = vrot.slane %v4382_v40, 1  ;;  %v1064_v50 = vsel %vm913_vm7, %v4348_v0, %v1063_v26  ;;  %v1158_v61 = vsel %vm1075_vm8, %v4352_v56, %v1157_v18  ;;  %v1198_v54 = vrot.slane %v4394_v39, 1 }
 0x16c   : > { %v4532_v16 = vpop.permute.xlu0 %1267  ;;  %v1167_v59 = vrot.slane %v4398_v52, 1  ;;  %v1026_v62 = vadd.f32 %v1024_v48, %v986_v1  ;;  %v1119_v28 = vadd.f32 %v1117_v11, %v1078_v15  ;;  %v1088_v3 = vadd.f32 %v1086_v55, %v1046_v41 }
 0x16d   : > { %v1098_v31 = vadd.f32 %v1096_v22, %v1056_v2  ;;  %v1127_v7 = vsel %vm1075_vm8, %v4365_v36, %v1126_v49  ;;  %v1177_v10 = vrot.slane %v4411_v25, 1  ;;  %v1137_v56 = vsel %vm1075_vm8, %v4374_v34, %v1136_v58 }
 0x16e   : > { %v1066_v0 = vadd.f32 %v1064_v50, %v1026_v62  ;;  %v1160_v13 = vadd.f32 %v1158_v61, %v1119_v28  ;;  %v1106_v20 = vsel %vm1075_vm8, %v4382_v40, %v1105_v14  ;;  %v1199_v24 = vsel %vm1075_vm8, %v4394_v39, %v1198_v54 }
 0x16f   : > { %v4536_v43 = vpop.permute.xlu1 %1357  ;;  %v1168_v9 = vsel %vm1075_vm8, %v4398_v52, %v1167_v59  ;;  %v1146_v36 = vrot.slane %v4420_v53, 1  ;;  %v1238_v37 = vrot.slane %v4428_v51, 1  ;;  %v1129_v29 = vadd.f32 %v1127_v7, %v1088_v3 }
 0x170   : > { %v4549_v6 = vpop.permute.xlu0 %1327  ;;  %v1208_v12 = vrot.slane %v4440_v46, 1  ;;  %v1218_v34 = vrot.slane %v4444_v47, 1  ;;  %v1187_v38 = vrot.slane %v4457_v63, 1  ;;  %v1178_v21 = vsel %vm1075_vm8, %v4411_v25, %v1177_v10 }
 0x171   : > { %v1279_v39 = vrot.slane %v4466_v23, 1  ;;  %v1139_v35 = vadd.f32 %v1137_v56, %v1098_v31  ;;  %v1108_v52 = vadd.f32 %v1106_v20, %v1066_v0  ;;  %v1201_v17 = vadd.f32 %v1199_v24, %v1160_v13 }
 0x172   : > { %v1170_v26 = vadd.f32 %v1168_v9, %v1129_v29  ;;  %v1147_v1 = vsel %vm1075_vm8, %v4420_v53, %v1146_v36  ;;  %v1240_v15 = vsel %vm1239_vm9, %v4428_v51, %v1238_v37  ;;  %v1249_v41 = vrot.slane %v4474_v32, 1 }
 0x173   : > { %v4558_v60 = vpop.permute.xlu1 %1337  ;;  %v1259_v2 = vrot.slane %v4486_v5, 1  ;;  %v1180_v48 = vadd.f32 %v1178_v21, %v1139_v35  ;;  %v1209_v25 = vsel %vm1075_vm8, %v4440_v46, %v1208_v12  ;;  %v1219_v11 = vsel %vm1075_vm8, %v4444_v47, %v1218_v34 }
 0x174   : > { %v4566_v30 = vpop.permute.xlu0 %1307  ;;  %v1188_v49 = vsel %vm1075_vm8, %v4457_v63, %v1187_v38  ;;  %v1280_v53 = vsel %vm1239_vm9, %v4466_v23, %v1279_v39  ;;  %v1228_v51 = vrot.slane %v4490_v44, 1  ;;  %v1319_v22 = vrot.slane %v4503_v42, 1 }
 0x175   : > { %v1289_v58 = vrot.slane %v4512_v19, 1  ;;  %v1149_v14 = vadd.f32 %v1147_v1, %v1108_v52  ;;  %v1242_v46 = vadd.f32 %v1240_v15, %v1201_v17  ;;  %v1299_v50 = vrot.slane %v4520_v57, 1 }
 0x176   : > { %v1269_v47 = vrot.slane %v4532_v16, 1  ;;  %v1250_v63 = vsel %vm1239_vm9, %v4474_v32, %v1249_v41  ;;  %v1260_v23 = vsel %vm1239_vm9, %v4486_v5, %v1259_v2  ;;  %v1359_v54 = vrot.slane %v4536_v43, 1 }
 0x177   : > { %v4578_v27 = vpop.permute.xlu1 %1397  ;;  %v1329_v59 = vrot.slane %v4549_v6, 1  ;;  %v1211_v62 = vadd.f32 %v1209_v25, %v1170_v26  ;;  %v1221_v28 = vadd.f32 %v1219_v11, %v1180_v48  ;;  %v1190_v3 = vadd.f32 %v1188_v49, %v1149_v14 }
 0x178   : > { %v4582_v45 = vpop.permute.xlu0 %1367  ;;  %v1282_v31 = vadd.f32 %v1280_v53, %v1242_v46  ;;  %v1229_v10 = vsel %vm1075_vm8, %v4490_v44, %v1228_v51  ;;  %v1320_v0 = vsel %vm1239_vm9, %v4503_v42, %v1319_v22  ;;  %v1290_v32 = vsel %vm1239_vm9, %v4512_v19, %v1289_v58 }
 0x179   : > { %v1339_v5 = vrot.slane %v4558_v60, 1  ;;  %v1252_v13 = vadd.f32 %v1250_v63, %v1211_v62  ;;  %v1262_v56 = vadd.f32 %v1260_v23, %v1221_v28  ;;  %v1300_v20 = vsel %vm1239_vm9, %v4520_v57, %v1299_v50 }
 0x17a   : > { %v1270_v24 = vsel %vm1239_vm9, %v4532_v16, %v1269_v47  ;;  %v1360_v44 = vsel %vm1239_vm9, %v4536_v43, %v1359_v54  ;;  %v1330_v42 = vsel %vm1239_vm9, %v4549_v6, %v1329_v59  ;;  %v1309_v19 = vrot.slane %v4566_v30, 1 }
 0x17b   : > { %v4595_v4 = vpop.permute.xlu1 %1377  ;;  %v1399_v36 = vrot.slane %v4578_v27, 1  ;;  %v1231_v37 = vadd.f32 %v1229_v10, %v1190_v3  ;;  %v1322_v29 = vadd.f32 %v1320_v0, %v1282_v31  ;;  %v1292_v12 = vadd.f32 %v1290_v32, %v1252_v13 }
 0x17c   : > { %v4603_v33 = vpop.permute.xlu0 %1347  ;;  %v1369_v57 = vrot.slane %v4582_v45, 1  ;;  %v1340_v16 = vsel %vm1239_vm9, %v4558_v60, %v1339_v5  ;;  %v1302_v21 = vadd.f32 %v1300_v20, %v1262_v56  ;;  %v1310_v17 = vsel %vm1239_vm9, %v4566_v30, %v1309_v19 }
 0x17d   : > { %v1349_v38 = vrot.slane %v4603_v33, 1  ;;  %v1272_v39 = vadd.f32 %v1270_v24, %v1231_v37  ;;  %v1362_v6 = vadd.f32 %v1360_v44, %v1322_v29  ;;  %v1332_v35 = vadd.f32 %v1330_v42, %v1292_v12 }
 0x17e   : > { %v1401_v26 = vsel %vm1400_vm10, %v4578_v27, %v1399_v36  ;;  %v1342_v60 = vadd.f32 %v1340_v16, %v1302_v21  ;;  %v1370_v41 = vsel %vm1239_vm9, %v4582_v45, %v1369_v57  ;;  %v1379_v2 = vrot.slane %v4595_v4, 1 }
 0x17f   : > { %v4612_v8 = vpop.permute.xlu1 %1438  ;;  %v1350_v11 = vsel %vm1239_vm9, %v4603_v33, %v1349_v38  ;;  %v1312_v53 = vadd.f32 %v1310_v17, %v1272_v39  ;;  %v1403_v51 = vadd.f32 %v1401_v26, %v1362_v6  ;;  %v1372_v14 = vadd.f32 %v1370_v41, %v1332_v35 }
 0x180   : > { %v4623_v40 = vpop.permute.xlu0 %1408  ;;  %v1440_v43 = vrot.slane %v4612_v8, 1  ;;  %v1555_v44 = vstv %s4697_s20  ;;  %v1578_v16 = vstv %s4704_s22  ;;  %v1604_v35 = vstv %s4713_s25  ;;  %s4768_s20 = sld [smem:[#allocation4 + $0xa7]] }
 0x181   : > { %v1410_v1 = vrot.slane %v4623_v40, 1  ;;  %v1352_v47 = vadd.f32 %v1350_v11, %v1312_v53  ;;  %v1591_v41 = vstv %s4720_s28  ;;  %s4774_s22 = sld [smem:[#allocation4 + $0xab]] }
 0x182   : > { %v1441_v30 = vsel %vm1400_vm10, %v4612_v8, %v1440_v43  ;;  %v1380_v8 = vsel %vm1239_vm9, %v4595_v4, %v1379_v2  ;;  %s4776_s25 = sld [smem:[#allocation4 + $0xb2]] }
 0x183   : > { %v4628_v18 = vpop.permute.xlu1 %1418  ;;  %v1411_v46 = vsel %vm1400_vm10, %v4623_v40, %v1410_v1  ;;  %v1443_v63 = vadd.f32 %v1441_v30, %v1403_v51  ;;  %v1382_v5 = vadd.f32 %v1380_v8, %v1342_v60  ;;  %s4778_s28 = sld [smem:[#allocation4 + $0x98]] }
 0x184   : > { %v4642_v55 = vpop.permute.xlu0 %1387  ;;  %v1420_v22 = vrot.slane %v4628_v18, 1 }
 0x185   : > { %v1389_v15 = vrot.slane %v4642_v55, 1 }
 0x186   : > { %v1421_v4 = vsel %vm1400_vm10, %v4628_v18, %v1420_v22 }
 0x187   : > { %v4651_v61 = vpop.permute.xlu1 %1478  ;;  %v1390_v33 = vsel %vm1239_vm9, %v4642_v55, %v1389_v15  ;;  %v1413_v55 = vadd.f32 %v1411_v46, %v1372_v14  ;;  %v1423_v36 = vadd.f32 %v1421_v4, %v1382_v5 }
 0x188   : > { %v1449_v7 = vpop.permute.xlu0 %1448  ;;  %v1480_v48 = vrot.slane %v4651_v61, 1  ;;  %v1392_v3 = vadd.f32 %v1390_v33, %v1352_v47 }
 0x189   : > { %v1450_v27 = vrot.slane %v1449_v7, 1 }
 0x18a   : > { %v1481_v23 = vsel %vm1400_vm10, %v4651_v61, %v1480_v48 }
 0x18b   : > { %v4670_v9 = vpop.permute.xlu1 %1458  ;;  %v1451_v59 = vsel %vm1400_vm10, %v1449_v7, %v1450_v27  ;;  %v1483_v13 = vadd.f32 %v1481_v23, %v1443_v63 }
 0x18c   : > { %v1429_v34 = vpop.permute.xlu0 %1428  ;;  %v1460_v62 = vrot.slane %v4670_v9, 1  ;;  %v1453_v56 = vadd.f32 %v1451_v59, %v1413_v55 }
 0x18d   : > { %v1430_v49 = vrot.slane %v1429_v34, 1 }
 0x18e   : > { %v1461_v18 = vsel %vm1400_vm10, %v4670_v9, %v1460_v62 }
 0x18f   : > { %v1519_v52 = vpop.permute.xlu1 %1518  ;;  %v1431_v40 = vsel %vm1400_vm10, %v1429_v34, %v1430_v49  ;;  %v1463_v21 = vadd.f32 %v1461_v18, %v1423_v36  ;;  %v1715_v18 = vstv %s4746_s10  ;;  %s4836_s10 = sld [smem:[#allocation4 + $0xa2]] }
 0x190   : > { %v1489_v25 = vpop.permute.xlu0 %1488  ;;  %v1520_v45 = vrot.slane %v1519_v52, 1  ;;  %v1433_v20 = vadd.f32 %v1431_v40, %v1392_v3 }
 0x191   : > { %v1490_v50 = vrot.slane %v1489_v25, 1 }
 0x192   : > { %v1521_v31 = vsel %vm1400_vm10, %v1519_v52, %v1520_v45 }
 0x193   : > { %v1499_v58 = vpop.permute.xlu1 %1498  ;;  %v1491_v61 = vsel %vm1400_vm10, %v1489_v25, %v1490_v50  ;;  %v1523_v37 = vadd.f32 %v1521_v31, %v1483_v13  ;;  %v5881_v50 = vlaneseq  ;;  %v1725_v13 = vstv %s4742_s7  ;;  %s4820_s7 = sld [smem:[#allocation4 + $0x9f]] }
 0x194   : > { %v1469_v54 = vpop.permute.xlu0 %1468  ;;  %v1500_v0 = vrot.slane %v1499_v58, 1  ;;  %v1493_v29 = vadd.f32 %v1491_v61, %v1453_v56  ;;  %v1685_v61 = vstv %s4740_s6  ;;  %v1705_v56 = vstv %s4744_s9  ;;  %s4814_s6 = sld [smem:[#allocation4 + $0x9d]] }
 0x195   : > { %v1470_v28 = vrot.slane %v1469_v54, 1  ;;  %v1556_v26 = vadd.f32 %v1555_v44, %v1523_v37  ;;  %vm1573_vm11 = vcmp.ge.s32.totalorder %v5881_v50, 21  ;;  %vm1574_vm12 = vcmp.lt.s32.totalorder %v5881_v50, 379  ;;  %s4824_s9 = sld [smem:[#allocation4 + $0xa0]] }
 0x196   : > { %v1501_v34 = vsel %vm1400_vm10, %v1499_v58, %v1500_v0  ;;  %vm4758_vm14 = vmand %vm1573_vm11, %vm1574_vm12  ;;  %v1735_v44 = vstv %s4748_s11  ;;  %s4848_s11 = sld [smem:[#allocation4 + $0xa3]] }
 0x197   : > { %v1509_v10 = vpop.permute.xlu1 %1508  ;;  %v1471_v7 = vsel %vm1400_vm10, %v1469_v54, %v1470_v28  ;;  %v1503_v1 = vadd.f32 %v1501_v34, %v1463_v21  ;;  %v1557_v27 = vmax.f32 %v1556_v26, 0.0  ;;  %v1785_v34 = vstv %s4764_s19  ;;  %s3462_s19 = sld [smem:[#allocation4 + $0xbe]] }
 0x198   : > { %v1510_v32 = vrot.slane %v1509_v10, 1  ;;  %v1529_v24 = vpop.permute.xlu0 %1528  ;;  %v1473_v12 = vadd.f32 %v1471_v7, %v1433_v20  ;;  %v1622_v21 = vstv %s4778_s28  ;;  %s3468_s28 = sld [smem:[#allocation4 + $0xc4]] }
 0x199   : > { %v1530_v19 = vrot.slane %v1529_v24, 1 }
 0x19a   : > { %v1511_v42 = vsel %vm1400_vm10, %v1509_v10, %v1510_v32  ;;  %v1695_v10 = vstv %s4738_s4  ;;  %s4810_s4 = sld [smem:[#allocation4 + $0x9c]] }
 0x19b   : > { %v1549_v57 = vpop.permute.xlu1 %1548  ;;  %v1531_v38 = vsel %vm1400_vm10, %v1529_v24, %v1530_v19  ;;  %v1513_v39 = vadd.f32 %v1511_v42, %v1473_v12  ;;  %v1745_v42 = vstv %s4752_s14  ;;  %v1765_v19 = vstv %s4754_s16  ;;  %s3458_s14 = sld [smem:[#allocation4 + $0xbd]] }
 0x19c   : > { %v1550_v43 = vrot.slane %v1549_v57, 1  ;;  %v1533_v9 = vadd.f32 %v1531_v38, %v1493_v29  ;;  %v1539_v6 = vpop.permute.xlu0 %1538  ;;  %v1775_v29 = vstv %s4756_s17  ;;  %v1755_v12 = vstv %s4762_s18  ;;  %s3460_s16 = sld [smem:[#allocation4 + $0xb6]] }
 0x19d   : > { %v1540_v17 = vrot.slane %v1539_v6, 1  ;;  %v1815_v38 = vstv %s4774_s22  ;;  %s3461_s17 = sld [smem:[#allocation4 + $0xba]] }
 0x19e   : > { %v1551_v52 = vsel %vm1400_vm10, %v1549_v57, %v1550_v43  ;;  %v1579_v15 = vadd.f32 %v1578_v16, %v1533_v9  ;;  %v1805_v16 = vstv %s4768_s20  ;;  %v1795_v43 = vstv %s4776_s25  ;;  %s3459_s18 = sld [smem:[#allocation4 + $0xc1]] }
 0x19f   : > { %v1553_v60 = vadd.f32 %v1551_v52, %v1513_v39  ;;  %v1541_v2 = vsel %vm1400_vm10, %v1539_v6, %v1540_v17  ;;  %v1656_v9 = vstv %s4788_s23  ;;  %v1673_v6 = vstv %s4790_s24  ;;  %s3457_s24 = sld [smem:[#allocation4 + $0xb9]] }
 0x1a0   : > { %v1543_v25 = vadd.f32 %v1541_v2, %v1503_v1  ;;  %v1560_v11 = vpop.permute.xlu0 %1559  ;;  %v1580_v49 = vmax.f32 %v1579_v15, 0.0  ;;  %v1635_v52 = vstv %s4796_s30  ;;  %v1652_v1 = vstv %s4800_s8  ;;  %s3451_s8 = sld [smem:[#allocation4 + $0xb3]] }
 0x1a1   : > { %v1605_v48 = vadd.f32 %v1604_v35, %v1553_v60  ;;  %v1561_v30 = vrot.slane %v1560_v11, 1  ;;  %v1618_v35 = vstv %s4794_s26  ;;  %v1669_v15 = vstv %s4804_s15  ;;  %s4891_s15 = sld [smem:[#allocation4 + $0xb8]] }
 0x1a2   : > { %v1592_v53 = vadd.f32 %v1591_v41, %v1543_v25  ;;  %v1626_v60 = vstv %s4810_s4  ;;  %v1643_v41 = vstv %s4814_s6  ;;  %v1660_v2 = vstv %s4816_s21  ;;  %s4875_s21 = sld [smem:[#allocation4 + $0xaf]] }
 0x1a3   : > { %v1562_v51 = vsel %vm752_vm6, %v1560_v11, %v1561_v30  ;;  %v1606_v22 = vmax.f32 %v1605_v48, 0.0  ;;  %v1677_v48 = vstv %s4820_s7  ;;  %v1630_v11 = vstv %s4824_s9  ;;  %s3454_s30 = sld [smem:[#allocation4 + $0xbc]] }
 0x1a4   : > { %v1593_v45 = vmax.f32 %v1592_v53, 0.0  ;;  %v1581_v58 = vmul.f32 %v1580_v49, %v1562_v51  ;;  %v1564_v14 = vmul.f32 %v1562_v51, %v1557_v27  ;;  %v1647_v30 = vstv %s4828_s0  ;;  %s4879_s0 = sld [smem:[#allocation4 + $0xb4]] }
 0x1a5   : > { %v1607_v46 = vmul.f32 %v1606_v22, %v1562_v51  ;;  %s3456_s26 = sld [smem:[#allocation4 + $0xb5]] }
 0x1a6   : > { %1583 = vrot.lane.b32.xlu0 %v1581_v58, %s5865_s29  ;;  %1566 = vrot.lane.b32.xlu1 %v1564_v14, %s5865_s29  ;;  %v1594_v33 = vmul.f32 %v1593_v45, %v1562_v51  ;;  %s3455_s23 = sld [smem:[#allocation4 + $0xc0]] }
 0x1a7   : > { %s3465_s20 = sld [smem:[#allocation4 + $0xbb]] }
 0x1a8   : > { %s3463_s22 = sld [smem:[#allocation4 + $0xc2]] }
 0x1a9   : > { %s3466_s25 = sld [smem:[#allocation4 + $0xbf]] }
 0x1aa   : > { %1609 = vrot.lane.b32.xlu0 %v1607_v46, %s5865_s29  ;;  %1596 = vrot.lane.b32.xlu1 %v1594_v33, %s5865_s29  ;;  %s4782_s29 = sld [smem:[#allocation4 + $0x99]]  ;;  %v1664_v46 = vstv %s4836_s10 }
 0x1ab   : > { %s3469_s4 = sld [smem:[#allocation4 + $0xc8]] }
 0x1ac   : > { %s3467_s6 = sld [smem:[#allocation4 + $0xc3]] }
 0x1ad   : > { %s3470_s7 = sld [smem:[#allocation4 + $0xcc]] }
 0x1ae   : > { %s3472_s9 = sld [smem:[#allocation4 + $0xc5]] }
 0x1af   : > { %s3473_s10 = sld [smem:[#allocation4 + $0xc9]] }
 0x1b0   : > { %v1639_v39 = vstv %s4782_s29  ;;  %s5978_s29 = smov 126  }
 0x218   : > { %v1584_v8 = vpop.permute.xlu0 %1583  ;;  %v1567_v47 = vpop.permute.xlu1 %1566 }
 0x219   : > { %v1585_v23 = vrot.slane %v1584_v8, 7  ;;  %v1568_v54 = vrot.slane %v1567_v47, 7 }
 0x21b   : > { %v1586_v59 = vsel %vm1569_vm13, %v1585_v23, %v1584_v8  ;;  %v1570_v62 = vsel %vm1569_vm13, %v1568_v54, %v1567_v47 }
 0x21c   : > { %1589 = vst.msk [vmem:[#allocation2 + $0x1] ss:$4 sm:$0x7] %vm4758_vm14, %v1586_v59  ;;  %1576 = vst.msk [vmem:[#allocation2] ss:$4 sm:$0x7] %vm4758_vm14, %v1570_v62  ;;  %v1610_v40 = vpop.permute.xlu0 %1609  ;;  %v1597_v28 = vpop.permute.xlu1 %1596  ;;  %v1681_v62 = vstv %s4848_s11 }
 0x21d   : > { %v1611_v55 = vrot.slane %v1610_v40, 7  ;;  %v1598_v4 = vrot.slane %v1597_v28, 7  ;;  %s3471_s11 = sld [smem:[#allocation4 + $0xd0]] }
 0x21f   : > { %v1612_v3 = vsel %vm1569_vm13, %v1611_v55, %v1610_v40  ;;  %v1599_v31 = vsel %vm1569_vm13, %v1598_v4, %v1597_v28 }
 0x220   : > { %1615 = vst.msk [vmem:[#allocation2 + $0x3] ss:$4 sm:$0x7] %vm4758_vm14, %v1612_v3  ;;  %1602 = vst.msk [vmem:[#allocation2 + $0x2] ss:$4 sm:$0x7] %vm4758_vm14, %v1599_v31 }
 0x223   : > { %v4798_v0 = vld [vmem:[#allocation2] ss:$4 sm:$0x7]  ;;  %v4806_v5 = vld [vmem:[#allocation2 + $0x1] ss:$4 sm:$0x7] }
 0x224   : > { %v1696_v7 = vmul.f32 %v1695_v10, %v4798_v0  ;;  %v1686_v32 = vmul.f32 %v1685_v61, %v4798_v0  ;;  %v1726_v20 = vmul.f32 %v1725_v13, %v4806_v5  ;;  %v1706_v24 = vmul.f32 %v1705_v56, %v4798_v0 }
 0x225   : > { %v1716_v36 = vmul.f32 %v1715_v18, %v4798_v0  ;;  %v1736_v37 = vmul.f32 %v1735_v44, %v4806_v5  ;;  %v1746_v17 = vmul.f32 %v1745_v42, %v4806_v5  ;;  %v1640_v25 = vmul.f32 %v1639_v39, %v4806_v5 }
 0x226   : > { %1698 = vrot.lane.b32.xlu0 %v1696_v7, %s3666_s5  ;;  %1688 = vrot.lane.b32.xlu1 %v1686_v32, %s3666_s5  ;;  %v1623_v49 = vmul.f32 %v1622_v21, %v4798_v0  ;;  %v1619_v51 = vmul.f32 %v1618_v35, %v4798_v0  ;;  %v1636_v22 = vmul.f32 %v1635_v52, %v4806_v5  ;;  %v1865_v39 = vstv %s3454_s30  ;;  %s3475_s30 = sld [smem:[#allocation4 + $0xd1]] }
 0x227   : > { %v4838_v57 = vld [vmem:[#allocation2 + $0x2] ss:$4 sm:$0x7]  ;;  %v4867_v27 = vld [vmem:[#allocation2 + $0x3] ss:$4 sm:$0x7]  ;;  %v1756_v58 = vmul.f32 %v1755_v12, %v4806_v5  ;;  %v1627_v47 = vmul.f32 %v1626_v60, %v4798_v0  ;;  %v1644_v63 = vmul.f32 %v1643_v41, %v4806_v5  ;;  %v1648_v31 = vmul.f32 %v1647_v30, %v4806_v5 }
 0x228   : > { %v1766_v26 = vmul.f32 %v1765_v19, %v4838_v57  ;;  %v1657_v53 = vmul.f32 %v1656_v9, %v4838_v57  ;;  %v1776_v45 = vmul.f32 %v1775_v29, %v4838_v57  ;;  %v1653_v14 = vmul.f32 %v1652_v1, %v4838_v57 }
 0x229   : > { %v1641_v33 = vadd.f32 %v1640_v25, %v1623_v49  ;;  %v1637_v8 = vadd.f32 %v1636_v22, %v1619_v51  ;;  %v1806_v23 = vmul.f32 %v1805_v16, %v4867_v27  ;;  %v1674_v54 = vmul.f32 %v1673_v6, %v4867_v27 }
 0x22a   : > { %1728 = vrot.lane.b32.xlu0 %v1726_v20, %s3666_s5  ;;  %1708 = vrot.lane.b32.xlu1 %v1706_v24, %s3666_s5  ;;  %v1661_v59 = vmul.f32 %v1660_v2, %v4838_v57  ;;  %v1670_v55 = vmul.f32 %v1669_v15, %v4867_v27  ;;  %v1645_v4 = vadd.f32 %v1644_v63, %v1627_v47  ;;  %v1855_v16 = vstv %s4891_s15  ;;  %s3476_s15 = sld [smem:[#allocation4 + $0xc6]] }
 0x22b   : > { %v1658_v40 = vadd.f32 %v1657_v53, %v1641_v33  ;;  %v1654_v28 = vadd.f32 %v1653_v14, %v1637_v8  ;;  %v1786_v3 = vmul.f32 %v1785_v34, %v4838_v57  ;;  %v1631_v10 = vmul.f32 %v1630_v11, %v4798_v0 }
 0x22c   : > { %v1665_v61 = vmul.f32 %v1664_v46, %v4838_v57  ;;  %v1662_v13 = vadd.f32 %v1661_v59, %v1645_v4  ;;  %v1678_v56 = vmul.f32 %v1677_v48, %v4867_v27  ;;  %v1816_v18 = vmul.f32 %v1815_v38, %v4867_v27 }
 0x22d   : > { %v4896_v7 = vadd.f32 %v1674_v54, %v1658_v40  ;;  %v4898_v32 = vadd.f32 %v1670_v55, %v1654_v28  ;;  %v1649_v20 = vadd.f32 %v1648_v31, %v1631_v10  ;;  %v1796_v44 = vmul.f32 %v1795_v43, %v4838_v57 }
 0x22e   : > { %1718 = vrot.lane.b32.xlu0 %v1716_v36, %s3666_s5  ;;  %1738 = vrot.lane.b32.xlu1 %v1736_v37, %s3666_s5  ;;  %v4903_v24 = vadd.f32 %v1678_v56, %v1662_v13  ;;  %v1682_v42 = vmul.f32 %v1681_v62, %v4867_v27  ;;  %v1825_v36 = vstv %s4875_s21  ;;  %v1845_v37 = vstv %s4879_s0  ;;  %s5979_s21 = smov 108   ;;  %s3474_s0 = sld [smem:[#allocation4 + $0xcd]] }
 0x22f   : > { %v1666_v19 = vadd.f32 %v1665_v61, %v1649_v20  ;;  %v1826_v12 = vmul.f32 %v1825_v36, %v4867_v27  ;;  %v1846_v34 = vmul.f32 %v1845_v37, %v4798_v0  ;;  %v1835_v38 = vstv %s3451_s8  ;;  %s3477_s8 = sld [smem:[#allocation4 + $0xca]] }
 0x230   : > { %v1856_v43 = vmul.f32 %v1855_v16, %v4798_v0  ;;  %v1836_v21 = vmul.f32 %v1835_v38, %v4867_v27  ;;  %v1885_v9 = vstv %s3456_s26  ;;  %v1866_v6 = vmul.f32 %v1865_v39, %v4798_v0  ;;  %s3478_s26 = sld [smem:[#allocation4 + $0xce]] }
 0x231   : > { %v4916_v29 = vadd.f32 %v1682_v42, %v1666_v19  ;;  %v1886_v35 = vmul.f32 %v1885_v9, %v4806_v5  ;;  %v1895_v52 = vstv %s3457_s24  ;;  %v1905_v15 = vstv %s3458_s14  ;;  %s3480_s24 = sld [smem:[#allocation4 + $0xc7]] }
 0x232   : > { %1748 = vrot.lane.b32.xlu1 %v1746_v17, %s3666_s5  ;;  %1768 = vrot.lane.b32.xlu0 %v1766_v26, %s3666_s5  ;;  %v1875_v17 = vstv %s3455_s23  ;;  %v1896_v26 = vmul.f32 %v1895_v52, %v4806_v5  ;;  %v1925_v60 = vstv %s3460_s16  ;;  %v1906_v41 = vmul.f32 %v1905_v15, %v4806_v5  ;;  %s3481_s23 = sld [smem:[#allocation4 + $0xcb]] }
 0x233   : > { %v1876_v1 = vmul.f32 %v1875_v17, %v4798_v0  ;;  %v1926_v2 = vmul.f32 %v1925_v60, %v4838_v57  ;;  %v1935_v48 = vstv %s3461_s17  ;;  %v1915_v25 = vstv %s3459_s18  ;;  %s3482_s14 = sld [smem:[#allocation4 + $0xcf]] }
 0x234   : > { %v1936_v11 = vmul.f32 %v1935_v48, %v4838_v57  ;;  %v1916_v30 = vmul.f32 %v1915_v25, %v4806_v5  ;;  %v1945_v49 = vstv %s3462_s19  ;;  %v1985_v33 = vstv %s3466_s25  ;;  %s3484_s16 = sld [smem:[#allocation4 + $0xd4]]  ;;  %s5980_s25 = smov 107  }
 0x235   : > { %v1946_v51 = vmul.f32 %v1945_v49, %v4838_v57  ;;  %v2005_v8 = vstv %s3468_s28  ;;  %v1986_v47 = vmul.f32 %v1985_v33, %v4867_v27  ;;  %v1995_v54 = vstv %s3467_s6  ;;  %s3485_s17 = sld [smem:[#allocation4 + $0xd8]] }
 0x236   : > { %1778 = vrot.lane.b32.xlu1 %v1776_v45, %s3666_s5  ;;  %1758 = vrot.lane.b32.xlu0 %v1756_v58, %s3666_s5  ;;  %v1975_v45 = vstv %s3465_s20  ;;  %v1955_v58 = vstv %s3463_s22  ;;  %v2006_v63 = vmul.f32 %v2005_v8, %v4798_v0  ;;  %v1996_v62 = vmul.f32 %v1995_v54, %v4867_v27  ;;  %s3483_s18 = sld [smem:[#allocation4 + $0xd3]] }
 0x237   : > { %v1976_v14 = vmul.f32 %v1975_v45, %v4867_v27  ;;  %v1956_v46 = vmul.f32 %v1955_v58, %v4838_v57  ;;  %v2025_v40 = vstv %s3470_s7  ;;  %v2045_v28 = vstv %s3472_s9  ;;  %s3486_s19 = sld [smem:[#allocation4 + $0xdc]] }
 0x238   : > { %v2026_v55 = vmul.f32 %v2025_v40, %v4798_v0  ;;  %v2046_v4 = vmul.f32 %v2045_v28, %v4806_v5  ;;  %v2035_v31 = vstv %s3471_s11  ;;  %v2065_v13 = vstv %s3474_s0  ;;  %s3489_s20 = sld [smem:[#allocation4 + $0xd9]] }
 0x239   : > { %v2036_v61 = vmul.f32 %v2035_v31, %v4798_v0  ;;  %v2085_v56 = vstv %s3476_s15  ;;  %v2066_v20 = vmul.f32 %v2065_v13, %v4806_v5  ;;  %v2075_v42 = vstv %s3475_s30  ;;  %s3487_s22 = sld [smem:[#allocation4 + $0xe0]] }
 0x23a   : > { %1788 = vrot.lane.b32.xlu1 %v1786_v3, %s3666_s5  ;;  %1808 = vrot.lane.b32.xlu0 %v1806_v23, %s3666_s5  ;;  %v2015_v23 = vstv %s3469_s4  ;;  %v2055_v3 = vstv %s3473_s10  ;;  %v2076_v36 = vmul.f32 %v2075_v42, %v4806_v5  ;;  %s3490_s28 = sld [smem:[#allocation4 + $0xdd]] }
 0x23b   : > { %v2016_v59 = vmul.f32 %v2015_v23, %v4798_v0  ;;  %v2056_v10 = vmul.f32 %v2055_v3, %v4806_v5  ;;  %v2105_v37 = vstv %s3478_s26  ;;  %v2135_v38 = vstv %s3481_s23  ;;  %s3492_s4 = sld [smem:[#allocation4 + $0xd6]] }
 0x23c   : > { %v2145_v9 = vstv %s3482_s14  ;;  %v2175_v17 = vstv %s3485_s17  ;;  %s3493_s6 = sld [smem:[#allocation4 + $0xda]]  ;;  %s5981_s14 = smov 106  }
 0x23d   : > { %v2185_v60 = vstv %s3486_s19  ;;  %s3491_s7 = sld [smem:[#allocation4 + $0xe1]] }
 0x23e   : > { %1818 = vrot.lane.b32.xlu1 %v1816_v18, %s3666_s5  ;;  %1798 = vrot.lane.b32.xlu0 %v1796_v44, %s3666_s5  ;;  %v2086_v18 = vmul.f32 %v2085_v56, %v4838_v57  ;;  %v2095_v44 = vstv %s3477_s8  ;;  %v2215_v25 = vstv %s3489_s20  ;;  %s3494_s9 = sld [smem:[#allocation4 + $0xde]] }
 0x23f   : > { %v2096_v19 = vmul.f32 %v2095_v44, %v4838_v57  ;;  %s3496_s10 = sld [smem:[#allocation4 + $0xd7]] }
 0x240   : > { %s3497_s11 = sld [smem:[#allocation4 + $0xdb]] }
 0x241   : > { %s3498_s0 = sld [smem:[#allocation4 + $0xdf]] }
 0x242   : > { %1828 = vrot.lane.b32.xlu1 %v1826_v12, %s3666_s5  ;;  %1848 = vrot.lane.b32.xlu0 %v1846_v34, %s5978_s29  ;;  %v2125_v12 = vstv %s3480_s24  ;;  %v2106_v34 = vmul.f32 %v2105_v37, %v4838_v57  ;;  %v2255_v58 = vstv %s3493_s6  ;;  %s3500_s15 = sld [smem:[#allocation4 + $0xe4]] }
 0x243   : > { %v2126_v16 = vmul.f32 %v2125_v12, %v4867_v27  ;;  %s3501_s8 = sld [smem:[#allocation4 + $0xe8]] }
 0x244   : > { %v2265_v8 = vstv %s3494_s9  ;;  %s3499_s30 = sld [smem:[#allocation4 + $0xe3]] }
 0x245   : > { %v2266_v54 = vmul.f32 %v2265_v8, %v4838_v57  ;;  %s3502_s26 = sld [smem:[#allocation4 + $0xec]] }
 0x246   : > { %1858 = vrot.lane.b32.xlu1 %v1856_v43, %s5978_s29  ;;  %1838 = vrot.lane.b32.xlu0 %v1836_v21, %s3666_s5  ;;  %s3464_s5 = sld [smem:[#allocation4 + $0xb7]]  ;;  %v2136_v21 = vmul.f32 %v2135_v38, %v4867_v27 }
 0x247   : > { %v2305_v31 = vstv %s3498_s0  ;;  %s3504_s24 = sld [smem:[#allocation4 + $0xe5]] }
 0x248   : > { %v2306_v56 = vmul.f32 %v2305_v31, %v4867_v27  ;;  %s5029_s23 = sld [smem:[#allocation4 + $0xe9]] }
 0x249   : > { %s5041_s17 = sld [smem:[#allocation4 + $0xe6]] }
 0x24a   : > { %1868 = vrot.lane.b32.xlu1 %v1866_v6, %s5978_s29  ;;  %1888 = vrot.lane.b32.xlu0 %v1886_v35, %s5978_s29  ;;  %v2165_v6 = vstv %s3484_s16  ;;  %v2146_v35 = vmul.f32 %v2145_v9, %v4867_v27  ;;  %v2315_v44 = vstv %s3499_s30  ;;  %s5039_s16 = sld [smem:[#allocation4 + $0xed]] }
 0x24b   : > { %v2166_v52 = vmul.f32 %v2165_v6, %v4798_v0  ;;  %v2316_v37 = vmul.f32 %v2315_v44, %v4867_v27  ;;  %v2345_v12 = vstv %s3502_s26  ;;  %s5047_s19 = sld [smem:[#allocation4 + $0xf1]] }
 0x24c   : > { %v1965_v53 = vstv %s3464_s5  ;;  %s3488_s5 = sld [smem:[#allocation4 + $0xd5]] }
 0x24d   : > { %v1966_v22 = vmul.f32 %v1965_v53, %v4867_v27  ;;  %v2225_v53 = vstv %s3490_s28  ;;  %s5058_s20 = sld [smem:[#allocation4 + $0xe7]] }
 0x24e   : > { %1898 = vrot.lane.b32.xlu1 %v1896_v26, %s5978_s29  ;;  %1878 = vrot.lane.b32.xlu0 %v1876_v1, %s5978_s29  ;;  %v2155_v26 = vstv %s3483_s18  ;;  %v2176_v1 = vmul.f32 %v2175_v17, %v4798_v0  ;;  %s5045_s18 = sld [smem:[#allocation4 + $0xea]] }
 0x24f   : > { %v2156_v15 = vmul.f32 %v2155_v26, %v4867_v27  ;;  %s5064_s28 = sld [smem:[#allocation4 + $0xf2]] }
 0x250   : > { %v2385_v26 = vstv %s5039_s16  ;;  %s5076_s6 = sld [smem:[#allocation4 + $0xf4]] }
 0x251   : > { %s5082_s9 = sld [smem:[#allocation4 + $0xf3]] }
 0x252   : > { %1908 = vrot.lane.b32.xlu1 %v1906_v41, %s5978_s29  ;;  %1928 = vrot.lane.b32.xlu0 %v1926_v2, %s5978_s29  ;;  %v2205_v41 = vstv %s3488_s5  ;;  %v2186_v2 = vmul.f32 %v2185_v60, %v4798_v0  ;;  %s5055_s5 = sld [smem:[#allocation4 + $0xee]] }
 0x253   : > { %v2206_v48 = vmul.f32 %v2205_v41, %v4806_v5  ;;  %s5100_s0 = sld [smem:[#allocation4 + $0x100]] }
 0x254   : > { %s5116_s30 = sld [smem:[#allocation4 + $0xfa]] }
 0x255   : > { %s5118_s26 = sld [smem:[#allocation4 + $0x101]] }
 0x256   : > { %1938 = vrot.lane.b32.xlu1 %v1936_v11, %s5978_s29  ;;  %1918 = vrot.lane.b32.xlu0 %v1916_v30, %s5978_s29  ;;  %v2195_v11 = vstv %s3487_s22  ;;  %v2216_v30 = vmul.f32 %v2215_v25, %v4806_v5  ;;  %s5062_s22 = sld [smem:[#allocation4 + $0xeb]] }
 0x257   : > { %v2196_v49 = vmul.f32 %v2195_v11, %v4798_v0  ;;  %s5136_s16 = sld [smem:[#allocation4 + $0x102]] }
 0x25a   : > { %1948 = vrot.lane.b32.xlu1 %v1946_v51, %s5978_s29  ;;  %1968 = vrot.lane.b32.xlu0 %v1966_v22, %s5978_s29  ;;  %v2245_v51 = vstv %s3492_s4  ;;  %v2226_v22 = vmul.f32 %v2225_v53, %v4806_v5  ;;  %s5072_s4 = sld [smem:[#allocation4 + $0xef]]  ;;  %v2425_v53 = vstv %s5055_s5 }
 0x25b   : > { %v2246_v45 = vmul.f32 %v2245_v51, %v4838_v57  ;;  %v2445_v51 = vstv %s5058_s20  ;;  %s5156_s5 = sld [smem:[#allocation4 + $0x103]] }
 0x25c   : > { %s5164_s20 = sld [smem:[#allocation4 + $0x105]] }
 0x25e   : > { %1978 = vrot.lane.b32.xlu1 %v1976_v14, %s5978_s29  ;;  %1958 = vrot.lane.b32.xlu0 %v1956_v46, %s5978_s29  ;;  %v2235_v14 = vstv %s3491_s7  ;;  %v2256_v46 = vmul.f32 %v2255_v58, %v4838_v57  ;;  %s5080_s7 = sld [smem:[#allocation4 + $0xf8]]  ;;  %v2446_v58 = vmul.f32 %v2445_v51, %v4867_v27 }
 0x25f   : > { %v2236_v33 = vmul.f32 %v2235_v14, %v4806_v5  ;;  %v2455_v14 = vstv %s5062_s22  ;;  %s5168_s22 = sld [smem:[#allocation4 + $0x10c]] }
 0x262   : > { %1988 = vrot.lane.b32.xlu1 %v1986_v47, %s5978_s29  ;;  %2008 = vrot.lane.b32.xlu0 %v2006_v63, %s5979_s21  ;;  %v2285_v47 = vstv %s3496_s10  ;;  %s5090_s10 = sld [smem:[#allocation4 + $0xfc]] }
 0x266   : > { %2018 = vrot.lane.b32.xlu1 %v2016_v59, %s5979_s21  ;;  %1998 = vrot.lane.b32.xlu0 %v1996_v62, %s5978_s29  ;;  %s3479_s29 = sld [smem:[#allocation4 + $0xd2]]  ;;  %v2286_v59 = vmul.f32 %v2285_v47, %v4867_v27  ;;  %v2295_v62 = vstv %s3497_s11  ;;  %v2456_v47 = vmul.f32 %v2455_v14, %v4867_v27 }
 0x267   : > { %s5094_s11 = sld [smem:[#allocation4 + $0xf5]] }
 0x26a   : > { %2028 = vrot.lane.b32.xlu1 %v2026_v55, %s5979_s21  ;;  %2048 = vrot.lane.b32.xlu0 %v2046_v4, %s5979_s21  ;;  %v2296_v4 = vmul.f32 %v2295_v62, %v4867_v27  ;;  %v2465_v62 = vstv %s5072_s4  ;;  %s5172_s4 = sld [smem:[#allocation4 + $0x110]] }
 0x26c   : > { %v2115_v43 = vstv %s3479_s29  ;;  %s3503_s29 = sld [smem:[#allocation4 + $0xf0]] }
 0x26d   : > { %v2116_v39 = vmul.f32 %v2115_v43, %v4838_v57  ;;  %v2346_v43 = vmul.f32 %v2345_v12, %v4798_v0  ;;  %v2506_v12 = vstv %s5090_s10  ;;  %s5202_s10 = sld [smem:[#allocation4 + $0x107]] }
 0x26e   : > { %2058 = vrot.lane.b32.xlu1 %v2056_v10, %s5979_s21  ;;  %2038 = vrot.lane.b32.xlu0 %v2036_v61, %s5979_s21  ;;  %v2325_v10 = vstv %s3500_s15  ;;  %s5108_s15 = sld [smem:[#allocation4 + $0xfd]] }
 0x272   : > { %2068 = vrot.lane.b32.xlu1 %v2066_v20, %s5979_s21  ;;  %2088 = vrot.lane.b32.xlu0 %v2086_v18, %s5979_s21  ;;  %v2326_v20 = vmul.f32 %v2325_v10, %v4798_v0  ;;  %v2335_v18 = vstv %s3501_s8  ;;  %v2355_v9 = vstv %s3503_s29  ;;  %s5112_s8 = sld [smem:[#allocation4 + $0xf6]] }
 0x273   : > { %v2356_v17 = vmul.f32 %v2355_v9, %v4798_v0  ;;  %s5134_s29 = sld [smem:[#allocation4 + $0xfb]]  ;;  %v2496_v10 = vstv %s5080_s7 }
 0x274   : > { %s5182_s7 = sld [smem:[#allocation4 + $0x106]] }
 0x276   : > { %2098 = vrot.lane.b32.xlu1 %v2096_v19, %s5979_s21  ;;  %2078 = vrot.lane.b32.xlu0 %v2076_v36, %s5979_s21  ;;  %v2336_v36 = vmul.f32 %v2335_v18, %v4798_v0  ;;  %v2386_v0 = vmul.f32 %v2385_v26, %v4806_v5 }
 0x27a   : > { %2108 = vrot.lane.b32.xlu1 %v2106_v34, %s5979_s21  ;;  %2128 = vrot.lane.b32.xlu0 %v2126_v16, %s5979_s21  ;;  %v2365_v34 = vstv %s3504_s24  ;;  %s5126_s24 = sld [smem:[#allocation4 + $0xfe]] }
 0x27e   : > { %2138 = vrot.lane.b32.xlu1 %v2136_v21, %s5979_s21  ;;  %2118 = vrot.lane.b32.xlu0 %v2116_v39, %s5979_s21  ;;  %v2366_v21 = vmul.f32 %v2365_v34, %v4806_v5  ;;  %v2375_v39 = vstv %s5029_s23  ;;  %s5130_s23 = sld [smem:[#allocation4 + $0xf7]]  ;;  %v2527_v34 = vstv %s5094_s11 }
 0x27f   : > { %s5210_s11 = sld [smem:[#allocation4 + $0x112]] }
 0x282   : > { %2148 = vrot.lane.b32.xlu1 %v2146_v35, %s5979_s21  ;;  %2168 = vrot.lane.b32.xlu0 %v2166_v52, %s5980_s25  ;;  %v2376_v52 = vmul.f32 %v2375_v39, %v4806_v5 }
 0x284   : > { %v2609_v51 = vstv %s5130_s23  ;;  %s5565_s23 = sld [smem:[#allocation4 + $0x116]] }
 0x286   : > { %2178 = vrot.lane.b32.xlu1 %v2176_v1, %s5980_s25  ;;  %2158 = vrot.lane.b32.xlu0 %v2156_v15, %s5979_s21  ;;  %s3495_s21 = sld [smem:[#allocation4 + $0xe2]]  ;;  %v2405_v1 = vstv %s5041_s17 }
 0x287   : > { %v2406_v41 = vmul.f32 %v2405_v1, %v4838_v57  ;;  %s5144_s17 = sld [smem:[#allocation4 + $0xff]] }
 0x28a   : > { %2188 = vrot.lane.b32.xlu1 %v2186_v2, %s5980_s25  ;;  %2208 = vrot.lane.b32.xlu0 %v2206_v48, %s5980_s25  ;;  %v2415_v2 = vstv %s5045_s18  ;;  %v2395_v48 = vstv %s5047_s19  ;;  %s5150_s18 = sld [smem:[#allocation4 + $0x104]] }
 0x28b   : > { %s5154_s19 = sld [smem:[#allocation4 + $0x108]] }
 0x28c   : > { %v2275_v40 = vstv %s3495_s21  ;;  %s5098_s21 = sld [smem:[#allocation4 + $0xf9]] }
 0x28d   : > { %v2276_v3 = vmul.f32 %v2275_v40, %v4838_v57  ;;  %v2486_v40 = vstv %s5076_s6  ;;  %s5174_s6 = sld [smem:[#allocation4 + $0x109]]  ;;  %v2629_v14 = vstv %s5144_s17 }
 0x28e   : > { %2218 = vrot.lane.b32.xlu1 %v2216_v30, %s5980_s25  ;;  %2198 = vrot.lane.b32.xlu0 %v2196_v49, %s5980_s25  ;;  %v2416_v30 = vmul.f32 %v2415_v2, %v4838_v57  ;;  %v2396_v49 = vmul.f32 %v2395_v48, %v4806_v5  ;;  %v2426_v5 = vmul.f32 %v2425_v53, %v4838_v57  ;;  %v2568_v2 = vstv %s5112_s8  ;;  %v5224_v48 = vld [vmem:[#allocation2 + $0x2] ss:$4 sm:$0xf]  ;;  %s5537_s8 = sld [smem:[#allocation4 + $0x11c]] }
 0x28f   : > { %5988 = vst [vmem:[#allocation13_spill] sm:$0xff] %v5224_v48  ;;  %v2588_v53 = vstv %s5126_s24  ;;  %s6010_s24 = smov 86   ;;  %s5581_s17 = sld [smem:[#allocation4 + $0x11a]] }
 0x292   : > { %2228 = vrot.lane.b32.xlu1 %v2226_v22, %s5980_s25  ;;  %2248 = vrot.lane.b32.xlu0 %v2246_v45, %s5980_s25  ;;  %v2537_v9 = vstv %s5098_s21  ;;  %s5222_s21 = sld [smem:[#allocation4 + $0x114]] }
 0x296   : > { %2258 = vrot.lane.b32.xlu1 %v2256_v46, %s5980_s25  ;;  %2238 = vrot.lane.b32.xlu0 %v2236_v33, %s5980_s25  ;;  %v2435_v46 = vstv %s5064_s28  ;;  %s5982_s28 = smov 88  }
 0x298   : > { %v5007_v63 = vpop.permute.xlu0 %1698  ;;  %v5009_v23 = vpop.permute.xlu1 %1688 }
 0x29a   : > { %2268 = vrot.lane.b32.xlu1 %v2266_v54, %s5980_s25  ;;  %2288 = vrot.lane.b32.xlu0 %v2286_v59, %s5980_s25  ;;  %v2436_v54 = vmul.f32 %v2435_v46, %v4838_v57  ;;  %v5146_v59 = vld [vmem:[#allocation2] ss:$4 sm:$0xf]  ;;  %v2649_v46 = vstv %s5150_s18  ;;  %s5589_s18 = sld [smem:[#allocation4 + $0x117]] }
 0x29b   : > { %v2487_v31 = vmul.f32 %v2486_v40, %v5146_v59  ;;  %v2497_v44 = vmul.f32 %v2496_v10, %v5146_v59  ;;  %v2689_v10 = vstv %s5164_s20  ;;  %s5605_s20 = sld [smem:[#allocation4 + $0x11b]] }
 0x29c   : > { %v5015_v28 = vpop.permute.xlu0 %1728  ;;  %v5017_v55 = vpop.permute.xlu1 %1708 }
 0x29e   : > { %2298 = vrot.lane.b32.xlu1 %v2296_v4, %s5980_s25  ;;  %2278 = vrot.lane.b32.xlu0 %v2276_v3, %s5980_s25  ;;  %v2466_v3 = vmul.f32 %v2465_v62, %v4867_v27 }
 0x2a0   : > { %v5023_v61 = vpop.permute.xlu0 %1718  ;;  %v5025_v13 = vpop.permute.xlu1 %1738 }
 0x2a2   : > { %2308 = vrot.lane.b32.xlu1 %v2306_v56, %s5980_s25  ;;  %2328 = vrot.lane.b32.xlu0 %v2326_v20, %s5981_s14  ;;  %v2475_v56 = vstv %s5082_s9  ;;  %s5188_s9 = sld [smem:[#allocation4 + $0x10d]] }
 0x2a4   : > { %v5033_v42 = vpop.permute.xlu0 %1768  ;;  %v5035_v19 = vpop.permute.xlu1 %1748 }
 0x2a6   : > { %2338 = vrot.lane.b32.xlu1 %v2336_v36, %s5981_s14  ;;  %2318 = vrot.lane.b32.xlu0 %v2316_v37, %s5980_s25  ;;  %v2476_v36 = vmul.f32 %v2475_v56, %v4867_v27  ;;  %v5184_v37 = vld [vmem:[#allocation2 + $0x1] ss:$4 sm:$0xf]  ;;  %v2669_v56 = vstv %s5168_s22  ;;  %s5613_s22 = sld [smem:[#allocation4 + $0x123]] }
 0x2a7   : > { %5983 = vst [vmem:[#allocation8_spill] sm:$0xff] %v5184_v37  ;;  %v2528_v39 = vmul.f32 %v2527_v34, %v5184_v37  ;;  %v2538_v1 = vmul.f32 %v2537_v9, %v5184_v37  ;;  %v2739_v9 = vstv %s5194_s2  ;;  %s5502_s2 = sld [smem:[#allocation4 + $0x113]] }
 0x2a8   : > { %v5049_v16 = vpop.permute.xlu0 %1758  ;;  %v5051_v38 = vpop.permute.xlu1 %1778  ;;  %v2709_v34 = vstv %s5188_s9  ;;  %s5753_s9 = sld [smem:[#allocation4 + $0x129]] }
 0x2aa   : > { %2348 = vrot.lane.b32.xlu1 %v2346_v43, %s5981_s14  ;;  %2368 = vrot.lane.b32.xlu0 %v2366_v21, %s5981_s14  ;;  %v2507_v21 = vmul.f32 %v2506_v12, %v5146_v59  ;;  %v2729_v12 = vstv %s5182_s7  ;;  %s5750_s7 = sld [smem:[#allocation4 + $0x128]] }
 0x2ac   : > { %v5066_v6 = vpop.permute.xlu0 %1808  ;;  %v5068_v35 = vpop.permute.xlu1 %1788 }
 0x2ae   : > { %2378 = vrot.lane.b32.xlu1 %v2376_v52, %s5981_s14  ;;  %2358 = vrot.lane.b32.xlu0 %v2356_v17, %s5981_s14  ;;  %v2516_v52 = vstv %s5100_s0  ;;  %s5234_s0 = sld [smem:[#allocation4 + $0x10f]] }
 0x2b0   : > { %v5084_v15 = vpop.permute.xlu0 %1798  ;;  %v5086_v60 = vpop.permute.xlu1 %1818 }
 0x2b2   : > { %2388 = vrot.lane.b32.xlu1 %v2386_v0, %s5981_s14  ;;  %2408 = vrot.lane.b32.xlu0 %v2406_v41, %s5981_s14  ;;  %v2517_v0 = vmul.f32 %v2516_v52, %v5146_v59  ;;  %v2547_v41 = vstv %s5108_s15  ;;  %v2769_v52 = vstv %s5202_s10  ;;  %s5530_s15 = sld [smem:[#allocation4 + $0x115]] }
 0x2b3   : > { %s5757_s10 = sld [smem:[#allocation4 + $0x127]] }
 0x2b4   : > { %v5102_v25 = vpop.permute.xlu0 %1848  ;;  %v5104_v11 = vpop.permute.xlu1 %1828 }
 0x2b6   : > { %2418 = vrot.lane.b32.xlu1 %v2416_v30, %s5981_s14  ;;  %2398 = vrot.lane.b32.xlu0 %v2396_v49, %s5981_s14  ;;  %v2578_v30 = vstv %s5116_s30  ;;  %v2557_v49 = vstv %s5118_s26  ;;  %s5549_s30 = sld [smem:[#allocation4 + $0x120]] }
 0x2b7   : > { %s5554_s26 = sld [smem:[#allocation4 + $0x119]] }
 0x2b8   : > { %v5120_v22 = vpop.permute.xlu0 %1838  ;;  %v5122_v45 = vpop.permute.xlu1 %1858 }
 0x2ba   : > { %2428 = vrot.lane.b32.xlu1 %v2426_v5, %s5981_s14  ;;  %2448 = vrot.lane.b32.xlu0 %v2446_v58, %s5981_s14  ;;  %v2619_v5 = vstv %s5134_s29  ;;  %v2598_v58 = vstv %s5136_s16  ;;  %s5569_s29 = sld [smem:[#allocation4 + $0x11d]] }
 0x2bb   : > { %s5577_s16 = sld [smem:[#allocation4 + $0x121]] }
 0x2bc   : > { %v5138_v33 = vpop.permute.xlu0 %1888  ;;  %v5140_v8 = vpop.permute.xlu1 %1868 }
 0x2be   : > { %2458 = vrot.lane.b32.xlu1 %v2456_v47, %s5981_s14  ;;  %2438 = vrot.lane.b32.xlu0 %v2436_v54, %s5981_s14  ;;  %v2659_v47 = vstv %s5154_s19  ;;  %v2639_v54 = vstv %s5156_s5  ;;  %s5593_s19 = sld [smem:[#allocation4 + $0x11e]] }
 0x2bf   : > { %s5601_s5 = sld [smem:[#allocation4 + $0x122]] }
 0x2c0   : > { %v5158_v4 = vpop.permute.xlu0 %1878  ;;  %v5160_v57 = vpop.permute.xlu1 %1898 }
 0x2c2   : > { %2468 = vrot.lane.b32.xlu1 %v2466_v3, %s5981_s14  ;;  %2489 = vrot.lane.b32.xlu0 %v2487_v31, %s5982_s28  ;;  %v2548_v3 = vmul.f32 %v2547_v41, %v5184_v37  ;;  %v2569_v31 = vmul.f32 %v2568_v2, %v5224_v48  ;;  %v2779_v41 = vstv %s5212_s12  ;;  %s5518_s12 = sld [smem:[#allocation4 + $0x118]] }
 0x2c4   : > { %v5176_v20 = vpop.permute.xlu0 %1928  ;;  %v5178_v18 = vpop.permute.xlu1 %1908 }
 0x2c6   : > { %2499 = vrot.lane.b32.xlu1 %v2497_v44, %s5982_s28  ;;  %2478 = vrot.lane.b32.xlu0 %v2476_v36, %s5981_s14  ;;  %s5206_s14 = sld [smem:[#allocation4 + $0x10e]]  ;;  %v2679_v44 = vstv %s5172_s4  ;;  %v2699_v36 = vstv %s5174_s6 }
 0x2c7   : > { %s5677_s4 = sld [smem:[#allocation4 + $0x124]] }
 0x2c8   : > { %v5196_v43 = vpop.permute.xlu0 %1918  ;;  %v5198_v27 = vpop.permute.xlu1 %1938  ;;  %s5744_s6 = sld [smem:[#allocation4 + $0x125]] }
 0x2c9   : > { %5984 = vst [vmem:[#allocation9_spill] sm:$0xff] %v5196_v43  ;;  %5985 = vst [vmem:[#allocation10_spill] sm:$0xff] %v5198_v27  ;;  %v2599_v27 = vmul.f32 %v2598_v58, %v5224_v48  ;;  %v1690_v58 = vrot.slane %v5009_v23, 1 }
 0x2ca   : > { %2509 = vrot.lane.b32.xlu1 %v2507_v21, %s5982_s28  ;;  %2530 = vrot.lane.b32.xlu0 %v2528_v39, %s5982_s28  ;;  %v5252_v21 = vld [vmem:[#allocation2 + $0x3] ss:$4 sm:$0xf]  ;;  %v2719_v39 = vstv %s5192_s1  ;;  %s5997_s1 = smov 87  }
 0x2cb   : > { %v5274_v43 = vmul.f32 %v2629_v14, %v5252_v21  ;;  %v5289_v14 = vmul.f32 %v2689_v10, %v5184_v37  ;;  %v1730_v10 = vrot.slane %v5015_v28, 1 }
 0x2cc   : > { %v5214_v17 = vpop.permute.xlu0 %1968  ;;  %v5216_v26 = vpop.permute.xlu1 %1948 }
 0x2cd   : > { %5986 = vst [vmem:[#allocation11_spill] sm:$0xff] %v5214_v17  ;;  %5987 = vst [vmem:[#allocation12_spill] sm:$0xff] %v5216_v26  ;;  %v2589_v26 = vmul.f32 %v2588_v53, %v5224_v48  ;;  %v2620_v17 = vmul.f32 %v2619_v5, %v5252_v21  ;;  %v5283_v53 = vmul.f32 %v2639_v54, %v5252_v21  ;;  %v1700_v5 = vrot.slane %v5007_v63, 1 }
 0x2ce   : > { %2540 = vrot.lane.b32.xlu1 %v2538_v1, %s5982_s28  ;;  %2519 = vrot.lane.b32.xlu0 %v2517_v0, %s5982_s28  ;;  %v2749_v1 = vstv %s5206_s14  ;;  %v2759_v0 = vstv %s5210_s11  ;;  %v5302_v54 = vmul.f32 %v2699_v36, %v5184_v37  ;;  %v5322_v36 = vmul.f32 %v2769_v52, %v5252_v21  ;;  %s5763_s14 = sld [smem:[#allocation4 + $0x126]] }
 0x2cf   : > { %s5773_s11 = sld [smem:[#allocation4 + $0x12a]] }
 0x2d0   : > { %v5240_v62 = vpop.permute.xlu0 %1958  ;;  %v5242_v40 = vpop.permute.xlu1 %1978  ;;  %5995 = vst [vmem:[#allocation20_spill] sm:$0xff] %v5322_v36 }
 0x2d1   : > { %5989 = vst [vmem:[#allocation14_spill] sm:$0xff] %v5240_v62  ;;  %5990 = vst [vmem:[#allocation15_spill] sm:$0xff] %v5242_v40  ;;  %v2579_v40 = vmul.f32 %v2578_v30, %v5224_v48  ;;  %v2558_v62 = vmul.f32 %v2557_v49, %v5184_v37  ;;  %v2650_v30 = vmul.f32 %v2649_v46, %v5146_v59 }
 0x2d2   : > { %2550 = vrot.lane.b32.xlu1 %v2548_v3, %s5982_s28  ;;  %2571 = vrot.lane.b32.xlu0 %v2569_v31, %s5982_s28  ;;  %v2809_v3 = vstv %s5222_s21  ;;  %v2610_v31 = vmul.f32 %v2609_v51, %v5252_v21  ;;  %v5280_v49 = vmul.f32 %v2659_v47, %v5146_v59  ;;  %v2789_v51 = vstv %s5234_s0  ;;  %s3571_s21 = sld [smem:[#allocation4 + $0x12b]]  ;;  %s6013_s0 = smov 21  }
 0x2d3   : > { %v5299_v47 = vmul.f32 %v2679_v44, %v5146_v59  ;;  %v1720_v44 = vrot.slane %v5023_v61, 1 }
 0x2d4   : > { %v5262_v2 = vpop.permute.xlu0 %2008  ;;  %v5264_v50 = vpop.permute.xlu1 %1988 }
 0x2d5   : > { %5991 = vst [vmem:[#allocation16_spill] sm:$0xff] %v5262_v2  ;;  %5992 = vst [vmem:[#allocation17_spill] sm:$0xff] %v5264_v50  ;;  %v5305_v50 = vmul.f32 %v2729_v12, %v5224_v48  ;;  %v5308_v2 = vmul.f32 %v2709_v34, %v5184_v37  ;;  %v5325_v12 = vmul.f32 %v2749_v1, %v5224_v48 }
 0x2d6   : > { %2581 = vrot.lane.b32.xlu1 %v2579_v40, %s5982_s28  ;;  %2560 = vrot.lane.b32.xlu0 %v2558_v62, %s5982_s28  ;;  %v5292_v40 = vmul.f32 %v2669_v56, %v5146_v59  ;;  %v1710_v56 = vrot.slane %v5017_v55, 1  ;;  %v5328_v34 = vmul.f32 %v2759_v0, %v5224_v48  ;;  %v5342_v1 = vmul.f32 %v2779_v41, %v5252_v21 }
 0x2d7   : > { %v5345_v0 = vmul.f32 %v2809_v3, %v5146_v59  ;;  %v1721_v3 = vsel %vm269_vm3, %v5023_v61, %v1720_v44  ;;  %v1850_v44 = vrot.slane %v5102_v25, 1 }
 0x2d8   : > { %v5294_v62 = vpop.permute.xlu0 %1998  ;;  %v5296_v46 = vpop.permute.xlu1 %2018  ;;  %5996 = vst [vmem:[#allocation21_spill] sm:$0xff] %v5328_v34 }
 0x2d9   : > { %5993 = vst [vmem:[#allocation18_spill] sm:$0xff] %v5294_v62  ;;  %5994 = vst [vmem:[#allocation19_spill] sm:$0xff] %v5296_v46  ;;  %v5313_v62 = vmul.f32 %v2719_v39, %v5184_v37  ;;  %v5316_v46 = vmul.f32 %v2739_v9, %v5224_v48  ;;  %v1701_v39 = vsel %vm269_vm3, %v5007_v63, %v1700_v5  ;;  %v1740_v37 = vrot.slane %v5025_v13, 1 }
 0x2da   : > { %2591 = vrot.lane.b32.xlu1 %v2589_v26, %s5982_s28  ;;  %2612 = vrot.lane.b32.xlu0 %v2610_v31, %s5982_s28  ;;  %v1691_v9 = vsel %vm269_vm3, %v5009_v23, %v1690_v58  ;;  %v1770_v26 = vrot.slane %v5033_v42, 1  ;;  %v1750_v31 = vrot.slane %v5035_v19, 1  ;;  %v5348_v63 = vmul.f32 %v2789_v51, %v5252_v21 }
 0x2db   : > { %v1731_v23 = vsel %vm269_vm3, %v5015_v28, %v1730_v10  ;;  %v1711_v5 = vsel %vm269_vm3, %v5017_v55, %v1710_v56  ;;  %v1760_v58 = vrot.slane %v5049_v16, 1  ;;  %v1780_v48 = vrot.slane %v5051_v38, 1 }
 0x2dc   : > { %v5337_v52 = vpop.permute.xlu0 %2048  ;;  %v5339_v36 = vpop.permute.xlu1 %2028  ;;  %v1703_v34 = vadd.f32 %v1701_v39, %v4896_v7  ;;  %v1693_v41 = vadd.f32 %v1691_v9, %v4898_v32  ;;  %v1741_v28 = vsel %vm269_vm3, %v5025_v13, %v1740_v37  ;;  %v1771_v55 = vsel %vm269_vm3, %v5033_v42, %v1770_v26 }
 0x2dd   : > { %v1810_v51 = vrot.slane %v5066_v6, 1  ;;  %v1790_v10 = vrot.slane %v5068_v35, 1  ;;  %v1713_v32 = vadd.f32 %v1711_v5, %v4903_v24  ;;  %v1751_v61 = vsel %vm269_vm3, %v5035_v19, %v1750_v31 }
 0x2de   : > { %2622 = vrot.lane.b32.xlu1 %v2620_v17, %s5982_s28  ;;  %2601 = vrot.lane.b32.xlu0 %v2599_v27, %s5982_s28  ;;  %v1733_v7 = vadd.f32 %v1731_v23, %v1693_v41  ;;  %v1800_v17 = vrot.slane %v5084_v15, 1  ;;  %v1761_v13 = vsel %vm269_vm3, %v5049_v16, %v1760_v58  ;;  %v1781_v42 = vsel %vm269_vm3, %v5051_v38, %v1780_v48 }
 0x2df   : > { %v1820_v37 = vrot.slane %v5086_v60, 1  ;;  %v1723_v24 = vadd.f32 %v1721_v3, %v4916_v29  ;;  %v1743_v39 = vadd.f32 %v1741_v28, %v1703_v34  ;;  %v1830_v9 = vrot.slane %v5104_v11, 1 }
 0x2e0   : > { %v5372_v56 = vpop.permute.xlu0 %2038  ;;  %v5374_v27 = vpop.permute.xlu1 %2058  ;;  %v1773_v19 = vadd.f32 %v1771_v55, %v1733_v7  ;;  %v1811_v16 = vsel %vm269_vm3, %v5066_v6, %v1810_v51  ;;  %v1791_v38 = vsel %vm269_vm3, %v5068_v35, %v1790_v10  ;;  %v1840_v48 = vrot.slane %v5120_v22, 1 }
 0x2e1   : > { %v1860_v26 = vrot.slane %v5122_v45, 1  ;;  %v1753_v29 = vadd.f32 %v1751_v61, %v1713_v32  ;;  %v1763_v34 = vadd.f32 %v1761_v13, %v1723_v24  ;;  %v1783_v31 = vadd.f32 %v1781_v42, %v1743_v39  ;;  %v5998_v61 = vld [vmem:[#allocation9_spill] sm:$0xff]  ;;  %v6000_v39 = vld [vmem:[#allocation11_spill] sm:$0xff] }
 0x2e2   : > { %2632 = vrot.lane.b32.xlu1 %v5274_v43, %s5982_s28  ;;  %2652 = vrot.lane.b32.xlu0 %v2650_v30, %s5997_s1  ;;  %v1801_v23 = vsel %vm269_vm3, %v5084_v15, %v1800_v17  ;;  %v1821_v6 = vsel %vm269_vm3, %v5086_v60, %v1820_v37  ;;  %v1851_v35 = vsel %vm430_vm4, %v5102_v25, %v1850_v44  ;;  %v1890_v30 = vrot.slane %v5138_v33, 1  ;;  %v5999_v44 = vld [vmem:[#allocation10_spill] sm:$0xff] }
 0x2e3   : > { %v1870_v58 = vrot.slane %v5140_v8, 1  ;;  %v1813_v41 = vadd.f32 %v1811_v16, %v1773_v19  ;;  %v1793_v3 = vadd.f32 %v1791_v38, %v1753_v29  ;;  %v1831_v28 = vsel %vm269_vm3, %v5104_v11, %v1830_v9  ;;  %v6001_v9 = vld [vmem:[#allocation12_spill] sm:$0xff]  ;;  %v6002_v29 = vld [vmem:[#allocation14_spill] sm:$0xff] }
 0x2e4   : > { %v5395_v5 = vpop.permute.xlu0 %2088  ;;  %v5397_v43 = vpop.permute.xlu1 %2068  ;;  %v1841_v15 = vsel %vm269_vm3, %v5120_v22, %v1840_v48  ;;  %v1861_v60 = vsel %vm430_vm4, %v5122_v45, %v1860_v26  ;;  %v1880_v25 = vrot.slane %v5158_v4, 1  ;;  %v1900_v55 = vrot.slane %v5160_v57, 1 }
 0x2e5   : > { %v1803_v51 = vadd.f32 %v1801_v23, %v1763_v34  ;;  %v1823_v10 = vadd.f32 %v1821_v6, %v1783_v31  ;;  %v1853_v7 = vadd.f32 %v1851_v35, %v1813_v41  ;;  %v1930_v11 = vrot.slane %v5176_v20, 1  ;;  %v6003_v31 = vld [vmem:[#allocation15_spill] sm:$0xff]  ;;  %v6004_v6 = vld [vmem:[#allocation16_spill] sm:$0xff] }
 0x2e6   : > { %2662 = vrot.lane.b32.xlu1 %v5280_v49, %s5997_s1  ;;  %2642 = vrot.lane.b32.xlu0 %v5283_v53, %s5982_s28  ;;  %v1891_v53 = vsel %vm430_vm4, %v5138_v33, %v1890_v30  ;;  %v1871_v22 = vsel %vm430_vm4, %v5140_v8, %v1870_v58  ;;  %v1910_v45 = vrot.slane %v5178_v18, 1  ;;  %v1920_v17 = vrot.slane %v5998_v61, 1  ;;  %s5617_s28 = sld [smem:[#allocation4 + $0x11f]] }
 0x2e7   : > { %v1833_v13 = vadd.f32 %v1831_v28, %v1793_v3  ;;  %v1843_v42 = vadd.f32 %v1841_v15, %v1803_v51  ;;  %v1863_v37 = vadd.f32 %v1861_v60, %v1823_v10  ;;  %v1940_v24 = vrot.slane %v5999_v44, 1  ;;  %v6005_v3 = vld [vmem:[#allocation17_spill] sm:$0xff]  ;;  %v6006_v15 = vld [vmem:[#allocation18_spill] sm:$0xff] }
 0x2e8   : > { %v5418_v32 = vpop.permute.xlu0 %2078  ;;  %v5420_v49 = vpop.permute.xlu1 %2098  ;;  %v1881_v33 = vsel %vm430_vm4, %v5158_v4, %v1880_v25  ;;  %v1901_v8 = vsel %vm430_vm4, %v5160_v57, %v1900_v55  ;;  %v1970_v19 = vrot.slane %v6000_v39, 1  ;;  %v1950_v16 = vrot.slane %v6001_v9, 1 }
 0x2e9   : > { %v1893_v38 = vadd.f32 %v1891_v53, %v1853_v7  ;;  %v1873_v48 = vadd.f32 %v1871_v22, %v1833_v13  ;;  %v1931_v26 = vsel %vm430_vm4, %v5176_v20, %v1930_v11  ;;  %v1911_v4 = vsel %vm430_vm4, %v5178_v18, %v1910_v45  ;;  %v6007_v53 = vld [vmem:[#allocation19_spill] sm:$0xff] }
 0x2ea   : > { %2692 = vrot.lane.b32.xlu0 %v5289_v14, %s5997_s1  ;;  %2672 = vrot.lane.b32.xlu1 %v5292_v40, %s5997_s1  ;;  %v1960_v14 = vrot.slane %v6002_v29, 1  ;;  %v1921_v57 = vsel %vm430_vm4, %v5998_v61, %v1920_v17  ;;  %v1980_v23 = vrot.slane %v6003_v31, 1  ;;  %v2010_v35 = vrot.slane %v6004_v6, 1 }
 0x2eb   : > { %v1883_v30 = vadd.f32 %v1881_v33, %v1843_v42  ;;  %v1903_v58 = vadd.f32 %v1901_v8, %v1863_v37  ;;  %v1941_v20 = vsel %vm430_vm4, %v5999_v44, %v1940_v24  ;;  %v1971_v18 = vsel %vm430_vm4, %v6000_v39, %v1970_v19 }
 0x2ec   : > { %v5442_v34 = vpop.permute.xlu0 %2128  ;;  %v5444_v40 = vpop.permute.xlu1 %2108  ;;  %v1951_v41 = vsel %vm430_vm4, %v6001_v9, %v1950_v16  ;;  %v1990_v28 = vrot.slane %v6005_v3, 1  ;;  %v2000_v60 = vrot.slane %v6006_v15, 1  ;;  %v1933_v25 = vadd.f32 %v1931_v26, %v1893_v38 }
 0x2ed   : > { %v1913_v55 = vadd.f32 %v1911_v4, %v1873_v48  ;;  %v1923_v51 = vadd.f32 %v1921_v57, %v1883_v30  ;;  %v1961_v10 = vsel %vm430_vm4, %v6002_v29, %v1960_v14  ;;  %v2011_v11 = vsel %vm591_vm5, %v6004_v6, %v2010_v35 }
 0x2ee   : > { %2682 = vrot.lane.b32.xlu0 %v5299_v47, %s5997_s1  ;;  %2702 = vrot.lane.b32.xlu1 %v5302_v54, %s5997_s1  ;;  %v1981_v54 = vsel %vm430_vm4, %v6003_v31, %v1980_v23  ;;  %v2020_v22 = vrot.slane %v6007_v53, 1  ;;  %v2050_v45 = vrot.slane %v5337_v52, 1  ;;  %v1943_v61 = vadd.f32 %v1941_v20, %v1903_v58 }
 0x2ef   : > { %v1973_v17 = vadd.f32 %v1971_v18, %v1933_v25  ;;  %v1953_v13 = vadd.f32 %v1951_v41, %v1913_v55  ;;  %v2030_v42 = vrot.slane %v5339_v36, 1  ;;  %v1991_v37 = vsel %vm430_vm4, %v6005_v3, %v1990_v28  ;;  %v6008_v28 = vld [vmem:[#allocation20_spill] sm:$0xff] }
 0x2f0   : > { %v5466_v47 = vpop.permute.xlu0 %2118  ;;  %v5468_v7 = vpop.permute.xlu1 %2138  ;;  %v2001_v44 = vsel %vm430_vm4, %v6006_v15, %v2000_v60  ;;  %v2040_v24 = vrot.slane %v5372_v56, 1  ;;  %v2090_v33 = vrot.slane %v5395_v5, 1  ;;  %v1963_v8 = vadd.f32 %v1961_v10, %v1923_v51 }
 0x2f1   : > { %v1983_v39 = vadd.f32 %v1981_v54, %v1943_v61  ;;  %v2013_v19 = vadd.f32 %v2011_v11, %v1973_v17  ;;  %v2060_v9 = vrot.slane %v5374_v27, 1  ;;  %v2051_v38 = vsel %vm591_vm5, %v5337_v52, %v2050_v45  ;;  %v6009_v17 = vld [vmem:[#allocation21_spill] sm:$0xff] }
 0x2f2   : > { %2732 = vrot.lane.b32.xlu0 %v5305_v50, %s5997_s1  ;;  %2712 = vrot.lane.b32.xlu1 %v5308_v2, %s5997_s1  ;;  %v2021_v2 = vsel %vm591_vm5, %v6007_v53, %v2020_v22  ;;  %v2080_v48 = vrot.slane %v5418_v32, 1  ;;  %v2130_v26 = vrot.slane %v5442_v34, 1  ;;  %v1993_v29 = vadd.f32 %v1991_v37, %v1953_v13 }
 0x2f3   : > { %v2003_v14 = vadd.f32 %v2001_v44, %v1963_v8  ;;  %v2031_v4 = vsel %vm591_vm5, %v5339_v36, %v2030_v42  ;;  %v2041_v52 = vsel %vm591_vm5, %v5372_v56, %v2040_v24  ;;  %v2091_v57 = vsel %vm591_vm5, %v5395_v5, %v2090_v33 }
 0x2f4   : > { %v2169_v16 = vpop.permute.xlu0 %2168  ;;  %v5488_v50 = vpop.permute.xlu1 %2148  ;;  %v2100_v31 = vrot.slane %v5420_v49, 1  ;;  %v2023_v6 = vadd.f32 %v2021_v2, %v1983_v39  ;;  %v2053_v35 = vadd.f32 %v2051_v38, %v2013_v19  ;;  %v2061_v36 = vsel %vm591_vm5, %v5374_v27, %v2060_v9 }
 0x2f5   : > { %v2170_v23 = vrot.slane %v2169_v16, 1  ;;  %v2081_v58 = vsel %vm591_vm5, %v5418_v32, %v2080_v48  ;;  %v2131_v56 = vsel %vm591_vm5, %v5442_v34, %v2130_v26  ;;  %v2120_v5 = vrot.slane %v5466_v47, 1 }
 0x2f6   : > { %2722 = vrot.lane.b32.xlu0 %v5313_v62, %s5997_s1  ;;  %2742 = vrot.lane.b32.xlu1 %v5316_v46, %s5997_s1  ;;  %v2070_v62 = vrot.slane %v5397_v43, 1  ;;  %v2140_v20 = vrot.slane %v5468_v7, 1  ;;  %v2033_v18 = vadd.f32 %v2031_v4, %v1993_v29  ;;  %v2043_v41 = vadd.f32 %v2041_v52, %v2003_v14 }
 0x2f7   : > { %v2093_v3 = vadd.f32 %v2091_v57, %v2053_v35  ;;  %v2110_v27 = vrot.slane %v5444_v40, 1  ;;  %v2101_v32 = vsel %vm591_vm5, %v5420_v49, %v2100_v31  ;;  %v2171_v34 = vsel %vm752_vm6, %v2169_v16, %v2170_v23 }
 0x2f8   : > { %v2159_v30 = vpop.permute.xlu0 %2158  ;;  %v2179_v46 = vpop.permute.xlu1 %2178  ;;  %v2063_v25 = vadd.f32 %v2061_v36, %v2023_v6  ;;  %v2071_v55 = vsel %vm591_vm5, %v5397_v43, %v2070_v62  ;;  %v2083_v51 = vadd.f32 %v2081_v58, %v2043_v41  ;;  %v2141_v49 = vsel %vm591_vm5, %v5468_v7, %v2140_v20 }
 0x2f9   : > { %v2160_v15 = vrot.slane %v2159_v30, 1  ;;  %v2180_v60 = vrot.slane %v2179_v46, 1  ;;  %v2133_v10 = vadd.f32 %v2131_v56, %v2093_v3  ;;  %v2150_v53 = vrot.slane %v5488_v50, 1 }
 0x2fa   : > { %2772 = vrot.lane.b32.xlu0 %v6008_v28, %s5997_s1  ;;  %2752 = vrot.lane.b32.xlu1 %v5325_v12, %s5997_s1  ;;  %v2121_v12 = vsel %vm591_vm5, %v5466_v47, %v2120_v5  ;;  %v2103_v45 = vadd.f32 %v2101_v32, %v2063_v25  ;;  %v2111_v43 = vsel %vm591_vm5, %v5444_v40, %v2110_v27  ;;  %v2799_v47 = vstv %s5502_s2  ;;  %s3572_s2 = sld [smem:[#allocation4 + $0x12c]] }
 0x2fb   : > { %v2173_v61 = vadd.f32 %v2171_v34, %v2133_v10  ;;  %v2161_v7 = vsel %vm591_vm5, %v2159_v30, %v2160_v15  ;;  %v2181_v13 = vsel %vm752_vm6, %v2179_v46, %v2180_v60  ;;  %v2073_v44 = vadd.f32 %v2071_v55, %v2033_v18  ;;  %v6011_v18 = vld [vmem:[#allocation8_spill] sm:$0xff] }
 0x2fc   : > { %v2209_v54 = vpop.permute.xlu0 %2208  ;;  %v2189_v11 = vpop.permute.xlu1 %2188  ;;  %v2123_v24 = vadd.f32 %v2121_v12, %v2083_v51  ;;  %v2143_v33 = vadd.f32 %v2141_v49, %v2103_v45  ;;  %v2819_v16 = vstv %s5518_s12  ;;  %v2800_v14 = vmul.f32 %v2799_v47, %v5252_v21  ;;  %s3575_s12 = sld [smem:[#allocation4 + $0x12d]] }
 0x2fd   : > { %v2210_v22 = vrot.slane %v2209_v54, 1  ;;  %v2190_v37 = vrot.slane %v2189_v11, 1  ;;  %v2113_v2 = vadd.f32 %v2111_v43, %v2073_v44  ;;  %v2820_v6 = vmul.f32 %v2819_v16, %v5146_v59 }
 0x2fe   : > { %2762 = vrot.lane.b32.xlu0 %v6009_v17, %s5997_s1  ;;  %2782 = vrot.lane.b32.xlu1 %v5342_v1, %s5997_s1  ;;  %v2151_v1 = vsel %vm591_vm5, %v5488_v50, %v2150_v53  ;;  %v2163_v38 = vadd.f32 %v2161_v7, %v2123_v24  ;;  %v2183_v48 = vadd.f32 %v2181_v13, %v2143_v33  ;;  %v2829_v36 = vstv %s5537_s8  ;;  %v6012_v7 = vld [vmem:[#allocation13_spill] sm:$0xff]  ;;  %s3581_s8 = sld [smem:[#allocation4 + $0x12f]] }
 0x2ff   : > { %v2211_v42 = vsel %vm752_vm6, %v2209_v54, %v2210_v22  ;;  %v2191_v26 = vsel %vm752_vm6, %v2189_v11, %v2190_v37  ;;  %v2153_v4 = vadd.f32 %v2151_v1, %v2113_v2  ;;  %v2830_v3 = vmul.f32 %v2829_v36, %v5146_v59 }
 0x300   : > { %v2213_v40 = vadd.f32 %v2211_v42, %v2173_v61  ;;  %v2199_v8 = vpop.permute.xlu0 %2198  ;;  %v2219_v39 = vpop.permute.xlu1 %2218  ;;  %v2839_v32 = vstv %s5549_s30  ;;  %v2859_v34 = vstv %s5554_s26  ;;  %v2889_v53 = vstv %s5565_s23  ;;  %s3576_s30 = sld [smem:[#allocation4 + $0x131]] }
 0x301   : > { %v2200_v19 = vrot.slane %v2199_v8, 1  ;;  %v2220_v9 = vrot.slane %v2219_v39, 1  ;;  %v2193_v62 = vadd.f32 %v2191_v26, %v2153_v4  ;;  %v2840_v54 = vmul.f32 %v2839_v32, %v5146_v59  ;;  %s3573_s26 = sld [smem:[#allocation4 + $0x130]] }
 0x302   : > { %2812 = vrot.lane.b32.xlu0 %v5345_v0, %s6010_s24  ;;  %2792 = vrot.lane.b32.xlu1 %v5348_v63, %s5997_s1  ;;  %v2849_v63 = vstv %s5530_s15  ;;  %v2860_v11 = vmul.f32 %v2859_v34, %v6011_v18  ;;  %v2869_v22 = vstv %s5569_s29  ;;  %v2890_v13 = vmul.f32 %v2889_v53, %v6012_v7  ;;  %s3578_s15 = sld [smem:[#allocation4 + $0x12e]]  ;;  %s3677_s29 = smov 103  }
 0x303   : > { %v2201_v50 = vsel %vm752_vm6, %v2199_v8, %v2200_v19  ;;  %v2221_v29 = vsel %vm752_vm6, %v2219_v39, %v2220_v9  ;;  %v2850_v41 = vmul.f32 %v2849_v63, %v6011_v18  ;;  %v2870_v42 = vmul.f32 %v2869_v22, %v6011_v18  ;;  %s3579_s23 = sld [smem:[#allocation4 + $0x132]] }
 0x304   : > { %v2203_v52 = vadd.f32 %v2201_v50, %v2163_v38  ;;  %v2223_v57 = vadd.f32 %v2221_v29, %v2183_v48  ;;  %v2249_v31 = vpop.permute.xlu0 %2248  ;;  %v2229_v23 = vpop.permute.xlu1 %2228  ;;  %v2879_v24 = vstv %s5577_s16  ;;  %v2899_v33 = vstv %s5581_s17  ;;  %s3678_s16 = smov 63   ;;  %s3679_s17 = smov 99  }
 0x305   : > { %v2250_v0 = vrot.slane %v2249_v31, 1  ;;  %v2230_v35 = vrot.slane %v2229_v23, 1  ;;  %v2880_v16 = vmul.f32 %v2879_v24, %v6011_v18  ;;  %v2900_v2 = vmul.f32 %v2899_v33, %v6012_v7 }
 0x306   : > { %2802 = vrot.lane.b32.xlu0 %v2800_v14, %s5997_s1  ;;  %2822 = vrot.lane.b32.xlu1 %v2820_v6, %s6010_s24  ;;  %v2929_v26 = vstv %s5589_s18  ;;  %v2909_v50 = vstv %s5593_s19  ;;  %s3680_s18 = smov 71   ;;  %s3681_s19 = smov 67   ;;  %vm3161_vm3 = vcmask 515072   ;;  %vm3106_vm4 = vcmask 519552  }
 0x307   : > { %v2251_v30 = vsel %vm752_vm6, %v2249_v31, %v2250_v0  ;;  %v2231_v46 = vsel %vm752_vm6, %v2229_v23, %v2230_v35  ;;  %v2930_v23 = vmul.f32 %v2929_v26, %v5252_v21  ;;  %v2910_v6 = vmul.f32 %v2909_v50, %v6012_v7 }
 0x308   : > { %v2253_v58 = vadd.f32 %v2251_v30, %v2213_v40  ;;  %v2233_v56 = vadd.f32 %v2231_v46, %v2193_v62  ;;  %v2239_v5 = vpop.permute.xlu0 %2238  ;;  %v2259_v20 = vpop.permute.xlu1 %2258  ;;  %v2919_v63 = vstv %s5601_s5  ;;  %v2939_v36 = vstv %s5605_s20  ;;  %s3683_s5 = smov 95   ;;  %s3684_s20 = smov 55  }
 0x309   : > { %v2240_v27 = vrot.slane %v2239_v5, 1  ;;  %v2260_v28 = vrot.slane %v2259_v20, 1  ;;  %v2940_v18 = vmul.f32 %v2939_v36, %v5252_v21  ;;  %vm3113_vm5 = vcmask 650752  }
 0x30a   : > { %2852 = vrot.lane.b32.xlu0 %v2850_v41, %s6010_s24  ;;  %2832 = vrot.lane.b32.xlu1 %v2830_v3, %s6010_s24 }
 0x30b   : > { %v2241_v15 = vsel %vm752_vm6, %v2239_v5, %v2240_v27  ;;  %v2261_v60 = vsel %vm752_vm6, %v2259_v20, %v2260_v28  ;;  %v2920_v20 = vmul.f32 %v2919_v63, %v6012_v7  ;;  %v2959_v27 = vstv %s5613_s22  ;;  %s3685_s22 = smov 59  }
 0x30c   : > { %v2243_v25 = vadd.f32 %v2241_v15, %v2203_v52  ;;  %v2263_v55 = vadd.f32 %v2261_v60, %v2223_v57  ;;  %v2289_v51 = vpop.permute.xlu0 %2288  ;;  %v2269_v10 = vpop.permute.xlu1 %2268  ;;  %v2949_v28 = vstv %s5617_s28  ;;  %s3686_s28 = smov 51  }
 0x30d   : > { %v2290_v12 = vrot.slane %v2289_v51, 1  ;;  %v2270_v49 = vrot.slane %v2269_v10, 1 }
 0x30e   : > { %2842 = vrot.lane.b32.xlu0 %v2840_v54, %s6010_s24  ;;  %2862 = vrot.lane.b32.xlu1 %v2860_v11, %s6010_s24 }
 0x30f   : > { %v2291_v45 = vsel %vm752_vm6, %v2289_v51, %v2290_v12  ;;  %v2271_v59 = vsel %vm752_vm6, %v2269_v10, %v2270_v49  ;;  %v2960_v51 = vmul.f32 %v2959_v27, %v5252_v21  ;;  %v2950_v10 = vmul.f32 %v2949_v28, %v5252_v21 }
 0x310   : > { %v2293_v43 = vadd.f32 %v2291_v45, %v2253_v58  ;;  %v2273_v61 = vadd.f32 %v2271_v59, %v2233_v56  ;;  %v2279_v17 = vpop.permute.xlu0 %2278  ;;  %v2299_v47 = vpop.permute.xlu1 %2298 }
 0x311   : > { %v2280_v37 = vrot.slane %v2279_v17, 1  ;;  %v2300_v44 = vrot.slane %v2299_v47, 1 }
 0x312   : > { %2892 = vrot.lane.b32.xlu0 %v2890_v13, %s6010_s24  ;;  %2872 = vrot.lane.b32.xlu1 %v2870_v42, %s6010_s24 }
 0x313   : > { %v2281_v40 = vsel %vm752_vm6, %v2279_v17, %v2280_v37  ;;  %v2301_v8 = vsel %vm752_vm6, %v2299_v47, %v2300_v44 }
 0x314   : > { %v2283_v39 = vadd.f32 %v2281_v40, %v2243_v25  ;;  %v2303_v1 = vadd.f32 %v2301_v8, %v2263_v55  ;;  %v2329_v19 = vpop.permute.xlu0 %2328  ;;  %v2309_v9 = vpop.permute.xlu1 %2308 }
 0x315   : > { %v2330_v38 = vrot.slane %v2329_v19, 1  ;;  %v2310_v48 = vrot.slane %v2309_v9, 1 }
 0x316   : > { %2882 = vrot.lane.b32.xlu0 %v2880_v16, %s6010_s24  ;;  %2902 = vrot.lane.b32.xlu1 %v2900_v2, %s6010_s24 }
 0x317   : > { %v2331_v29 = vsel %vm913_vm7, %v2329_v19, %v2330_v38  ;;  %v2311_v14 = vsel %vm752_vm6, %v2309_v9, %v2310_v48 }
 0x318   : > { %v2333_v4 = vadd.f32 %v2331_v29, %v2293_v43  ;;  %v2313_v52 = vadd.f32 %v2311_v14, %v2273_v61  ;;  %v2319_v57 = vpop.permute.xlu0 %2318  ;;  %v2339_v31 = vpop.permute.xlu1 %2338 }
 0x319   : > { %v2320_v0 = vrot.slane %v2319_v57, 1  ;;  %v2340_v35 = vrot.slane %v2339_v31, 1 }
 0x31a   : > { %2932 = vrot.lane.b32.xlu0 %v2930_v23, %s6010_s24  ;;  %2912 = vrot.lane.b32.xlu1 %v2910_v6, %s6010_s24 }
 0x31b   : > { %v2321_v62 = vsel %vm752_vm6, %v2319_v57, %v2320_v0  ;;  %v2341_v30 = vsel %vm913_vm7, %v2339_v31, %v2340_v35 }
 0x31c   : > { %v2323_v46 = vadd.f32 %v2321_v62, %v2283_v39  ;;  %v2343_v58 = vadd.f32 %v2341_v30, %v2303_v1  ;;  %v2369_v56 = vpop.permute.xlu0 %2368  ;;  %v2349_v5 = vpop.permute.xlu1 %2348 }
 0x31d   : > { %v2370_v41 = vrot.slane %v2369_v56, 1  ;;  %v2350_v3 = vrot.slane %v2349_v5, 1 }
 0x31e   : > { %2922 = vrot.lane.b32.xlu0 %v2920_v20, %s6010_s24  ;;  %2942 = vrot.lane.b32.xlu1 %v2940_v18, %s6010_s24 }
 0x31f   : > { %v2371_v32 = vsel %vm913_vm7, %v2369_v56, %v2370_v41  ;;  %v2351_v34 = vsel %vm913_vm7, %v2349_v5, %v2350_v3 }
 0x320   : > { %v2373_v15 = vadd.f32 %v2371_v32, %v2333_v4  ;;  %v2353_v60 = vadd.f32 %v2351_v34, %v2313_v52  ;;  %v2359_v25 = vpop.permute.xlu0 %2358  ;;  %v2379_v55 = vpop.permute.xlu1 %2378 }
 0x321   : > { %v2360_v54 = vrot.slane %v2359_v25, 1  ;;  %v2380_v11 = vrot.slane %v2379_v55, 1 }
 0x322   : > { %2962 = vrot.lane.b32.xlu0 %v2960_v51, %s6010_s24  ;;  %2952 = vrot.lane.b32.xlu1 %v2950_v10, %s6010_s24  ;;  %s3582_s24 = sld [smem:[#allocation4 + $0x133]] }
 0x323   : > { %v2361_v12 = vsel %vm913_vm7, %v2359_v25, %v2360_v54  ;;  %v2381_v49 = vsel %vm913_vm7, %v2379_v55, %v2380_v11 }
 0x324   : > { %v2363_v53 = vadd.f32 %v2361_v12, %v2323_v46  ;;  %v2383_v22 = vadd.f32 %v2381_v49, %v2343_v58  ;;  %v2409_v45 = vpop.permute.xlu0 %2408  ;;  %v2389_v59 = vpop.permute.xlu1 %2388 }
 0x325   : > { %v2410_v43 = vrot.slane %v2409_v45, 1  ;;  %v2390_v61 = vrot.slane %v2389_v59, 1 }
 0x327   : > { %v2411_v17 = vsel %vm913_vm7, %v2409_v45, %v2410_v43  ;;  %v2391_v21 = vsel %vm913_vm7, %v2389_v59, %v2390_v61 }
 0x328   : > { %v2413_v47 = vadd.f32 %v2411_v17, %v2373_v15  ;;  %v2393_v7 = vadd.f32 %v2391_v21, %v2353_v60  ;;  %v2399_v13 = vpop.permute.xlu0 %2398  ;;  %v2419_v42 = vpop.permute.xlu1 %2418 }
 0x329   : > { %v2400_v37 = vrot.slane %v2399_v13, 1  ;;  %v2420_v44 = vrot.slane %v2419_v42, 1 }
 0x32b   : > { %v2401_v24 = vsel %vm913_vm7, %v2399_v13, %v2400_v37  ;;  %v2421_v33 = vsel %vm913_vm7, %v2419_v42, %v2420_v44 }
 0x32c   : > { %v2403_v40 = vadd.f32 %v2401_v24, %v2363_v53  ;;  %v2423_v8 = vadd.f32 %v2421_v33, %v2383_v22  ;;  %v2449_v39 = vpop.permute.xlu0 %2448  ;;  %v2429_v1 = vpop.permute.xlu1 %2428 }
 0x32d   : > { %v2450_v19 = vrot.slane %v2449_v39, 1  ;;  %v2430_v9 = vrot.slane %v2429_v1, 1 }
 0x32f   : > { %v2451_v16 = vsel %vm913_vm7, %v2449_v39, %v2450_v19  ;;  %v2431_v2 = vsel %vm913_vm7, %v2429_v1, %v2430_v9 }
 0x330   : > { %v2453_v38 = vadd.f32 %v2451_v16, %v2413_v47  ;;  %v2433_v48 = vadd.f32 %v2431_v2, %v2393_v7  ;;  %v2439_v26 = vpop.permute.xlu0 %2438  ;;  %v2459_v50 = vpop.permute.xlu1 %2458 }
 0x331   : > { %v2440_v29 = vrot.slane %v2439_v26, 1  ;;  %v2460_v14 = vrot.slane %v2459_v50, 1 }
 0x333   : > { %v2441_v4 = vsel %vm913_vm7, %v2439_v26, %v2440_v29  ;;  %v2461_v52 = vsel %vm913_vm7, %v2459_v50, %v2460_v14 }
 0x334   : > { %v2443_v57 = vadd.f32 %v2441_v4, %v2403_v40  ;;  %v2463_v31 = vadd.f32 %v2461_v52, %v2423_v8  ;;  %v2490_v23 = vpop.permute.xlu0 %2489  ;;  %v2469_v6 = vpop.permute.xlu1 %2468 }
 0x335   : > { %v2491_v0 = vrot.slane %v2490_v23, 1  ;;  %v2470_v35 = vrot.slane %v2469_v6, 1 }
 0x337   : > { %v2492_v63 = vsel %vm1075_vm8, %v2490_v23, %v2491_v0  ;;  %v2471_v36 = vsel %vm913_vm7, %v2469_v6, %v2470_v35 }
 0x338   : > { %v2494_v62 = vadd.f32 %v2492_v63, %v2453_v38  ;;  %v2473_v30 = vadd.f32 %v2471_v36, %v2433_v48  ;;  %v2479_v46 = vpop.permute.xlu0 %2478  ;;  %v2500_v58 = vpop.permute.xlu1 %2499  ;;  %v2969_v36 = vstv %s5677_s4  ;;  %s3687_s4 = smov 83  }
 0x339   : > { %v2480_v56 = vrot.slane %v2479_v46, 1  ;;  %v2501_v5 = vrot.slane %v2500_v58, 1 }
 0x33b   : > { %v2481_v20 = vsel %vm913_vm7, %v2479_v46, %v2480_v56  ;;  %v2502_v18 = vsel %vm1075_vm8, %v2500_v58, %v2501_v5  ;;  %vm3129_vm7 = vcmask 913152  }
 0x33c   : > { %v2483_v41 = vadd.f32 %v2481_v20, %v2443_v57  ;;  %v2504_v3 = vadd.f32 %v2502_v18, %v2463_v31  ;;  %v2531_v27 = vpop.permute.xlu0 %2530  ;;  %v2510_v28 = vpop.permute.xlu1 %2509 }
 0x33d   : > { %v2532_v32 = vrot.slane %v2531_v27, 1  ;;  %v2511_v34 = vrot.slane %v2510_v28, 1 }
 0x33f   : > { %v2533_v15 = vsel %vm1075_vm8, %v2531_v27, %v2532_v32  ;;  %v2512_v60 = vsel %vm1075_vm8, %v2510_v28, %v2511_v34 }
 0x340   : > { %v2535_v25 = vadd.f32 %v2533_v15, %v2494_v62  ;;  %v2514_v55 = vadd.f32 %v2512_v60, %v2473_v30  ;;  %v2520_v51 = vpop.permute.xlu0 %2519  ;;  %v2541_v10 = vpop.permute.xlu1 %2540 }
 0x341   : > { %v2521_v54 = vrot.slane %v2520_v51, 1  ;;  %v2542_v11 = vrot.slane %v2541_v10, 1 }
 0x343   : > { %v2522_v12 = vsel %vm1075_vm8, %v2520_v51, %v2521_v54  ;;  %v2543_v49 = vsel %vm1075_vm8, %v2541_v10, %v2542_v11 }
 0x344   : > { %v2524_v53 = vadd.f32 %v2522_v12, %v2483_v41  ;;  %v2545_v22 = vadd.f32 %v2543_v49, %v2504_v3  ;;  %v2572_v45 = vpop.permute.xlu0 %2571  ;;  %v2551_v59 = vpop.permute.xlu1 %2550 }
 0x345   : > { %v2573_v26 = vrot.slane %v2572_v45, 1  ;;  %v2552_v50 = vrot.slane %v2551_v59, 1 }
 0x347   : > { %v2574_v31 = vsel %vm1075_vm8, %v2572_v45, %v2573_v26  ;;  %v2553_v23 = vsel %vm1075_vm8, %v2551_v59, %v2552_v50 }
 0x348   : > { %v2561_v43 = vpop.permute.xlu0 %2560  ;;  %v2582_v61 = vpop.permute.xlu1 %2581  ;;  %v2576_v56 = vadd.f32 %v2574_v31, %v2535_v25  ;;  %v2555_v5 = vadd.f32 %v2553_v23, %v2514_v55 }
 0x349   : > { %v2562_v4 = vrot.slane %v2561_v43, 1  ;;  %v2583_v52 = vrot.slane %v2582_v61, 1 }
 0x34b   : > { %v2563_v62 = vsel %vm1075_vm8, %v2561_v43, %v2562_v4  ;;  %v2584_v30 = vsel %vm1075_vm8, %v2582_v61, %v2583_v52 }
 0x34c   : > { %v2613_v17 = vpop.permute.xlu0 %2612  ;;  %v2592_v21 = vpop.permute.xlu1 %2591  ;;  %v2565_v32 = vadd.f32 %v2563_v62, %v2524_v53  ;;  %v2586_v34 = vadd.f32 %v2584_v30, %v2545_v22 }
 0x34d   : > { %v2614_v57 = vrot.slane %v2613_v17, 1  ;;  %v2593_v6 = vrot.slane %v2592_v21, 1 }
 0x34f   : > { %v2615_v20 = vsel %vm1075_vm8, %v2613_v17, %v2614_v57  ;;  %v2594_v41 = vsel %vm1075_vm8, %v2592_v21, %v2593_v6 }
 0x350   : > { %v2602_v47 = vpop.permute.xlu0 %2601  ;;  %v2623_v7 = vpop.permute.xlu1 %2622  ;;  %v2617_v12 = vadd.f32 %v2615_v20, %v2576_v56  ;;  %v2596_v49 = vadd.f32 %v2594_v41, %v2555_v5 }
 0x351   : > { %v2603_v0 = vrot.slane %v2602_v47, 1  ;;  %v2624_v46 = vrot.slane %v2623_v7, 1 }
 0x353   : > { %v2604_v3 = vsel %vm1075_vm8, %v2602_v47, %v2603_v0  ;;  %v2625_v54 = vsel %vm1075_vm8, %v2623_v7, %v2624_v46 }
 0x354   : > { %v2653_v13 = vpop.permute.xlu0 %2652  ;;  %v2633_v42 = vpop.permute.xlu1 %2632  ;;  %v2606_v45 = vadd.f32 %v2604_v3, %v2565_v32  ;;  %v2627_v17 = vadd.f32 %v2625_v54, %v2586_v34 }
 0x355   : > { %v2654_v58 = vrot.slane %v2653_v13, 1  ;;  %v2634_v18 = vrot.slane %v2633_v42, 1 }
 0x357   : > { %v2655_v25 = vsel %vm1239_vm9, %v2653_v13, %v2654_v58  ;;  %v2635_v59 = vsel %vm1075_vm8, %v2633_v42, %v2634_v18 }
 0x358   : > { %v2643_v37 = vpop.permute.xlu0 %2642  ;;  %v2663_v44 = vpop.permute.xlu1 %2662  ;;  %v2657_v21 = vadd.f32 %v2655_v25, %v2617_v12  ;;  %v2637_v4 = vadd.f32 %v2635_v59, %v2596_v49 }
 0x359   : > { %v2644_v27 = vrot.slane %v2643_v37, 1  ;;  %v2664_v28 = vrot.slane %v2663_v44, 1 }
 0x35b   : > { %v2645_v43 = vsel %vm1075_vm8, %v2643_v37, %v2644_v27  ;;  %v2665_v53 = vsel %vm1239_vm9, %v2663_v44, %v2664_v28  ;;  %vm3136_vm8 = vcmask 1044352  }
 0x35c   : > { %v2693_v24 = vpop.permute.xlu0 %2692  ;;  %v2673_v33 = vpop.permute.xlu1 %2672  ;;  %v2647_v52 = vadd.f32 %v2645_v43, %v2606_v45  ;;  %v2667_v57 = vadd.f32 %v2665_v53, %v2627_v17 }
 0x35d   : > { %v2694_v15 = vrot.slane %v2693_v24, 1  ;;  %v2674_v60 = vrot.slane %v2673_v33, 1 }
 0x35f   : > { %v2695_v47 = vsel %vm1239_vm9, %v2693_v24, %v2694_v15  ;;  %v2675_v7 = vsel %vm1239_vm9, %v2673_v33, %v2674_v60 }
 0x360   : > { %v2683_v40 = vpop.permute.xlu0 %2682  ;;  %v2703_v8 = vpop.permute.xlu1 %2702  ;;  %v2677_v6 = vadd.f32 %v2675_v7, %v2637_v4 }
 0x361   : > { %v2684_v55 = vrot.slane %v2683_v40, 1  ;;  %v2704_v11 = vrot.slane %v2703_v8, 1 }
 0x363   : > { %v2685_v50 = vsel %vm1239_vm9, %v2683_v40, %v2684_v55  ;;  %v2705_v42 = vsel %vm1239_vm9, %v2703_v8, %v2704_v11  ;;  %v2697_v8 = vadd.f32 %v2695_v47, %v2657_v21 }
 0x364   : > { %v5661_v39 = vpop.permute.xlu0 %2732  ;;  %v5663_v1 = vpop.permute.xlu1 %2712  ;;  %v2687_v0 = vadd.f32 %v2685_v50, %v2647_v52  ;;  %v2707_v62 = vadd.f32 %v2705_v42, %v2667_v57 }
 0x365   : > { %v2734_v22 = vrot.slane %v5661_v39, 1  ;;  %v2714_v61 = vrot.slane %v5663_v1, 1 }
 0x367   : > { %v2735_v24 = vsel %vm1239_vm9, %v5661_v39, %v2734_v22  ;;  %v2715_v33 = vsel %vm1239_vm9, %v5663_v1, %v2714_v61 }
 0x368   : > { %v5665_v19 = vpop.permute.xlu0 %2722  ;;  %v5667_v9 = vpop.permute.xlu1 %2742  ;;  %v2737_v1 = vadd.f32 %v2735_v24, %v2697_v8  ;;  %v2717_v20 = vadd.f32 %v2715_v33, %v2677_v6 }
 0x369   : > { %v2724_v37 = vrot.slane %v5665_v19, 1  ;;  %v2744_v31 = vrot.slane %v5667_v9, 1 }
 0x36b   : > { %v2725_v58 = vsel %vm1239_vm9, %v5665_v19, %v2724_v37  ;;  %v2745_v18 = vsel %vm1239_vm9, %v5667_v9, %v2744_v31 }
 0x36c   : > { %v5669_v16 = vpop.permute.xlu0 %2772  ;;  %v5671_v2 = vpop.permute.xlu1 %2752  ;;  %v2747_v9 = vadd.f32 %v2745_v18, %v2707_v62 }
 0x36d   : > { %v2774_v44 = vrot.slane %v5669_v16, 1  ;;  %v2754_v23 = vrot.slane %v5671_v2, 1 }
 0x36f   : > { %v2775_v56 = vsel %vm1239_vm9, %v5669_v16, %v2774_v44  ;;  %v2755_v3 = vsel %vm1239_vm9, %v5671_v2, %v2754_v23  ;;  %v2727_v16 = vadd.f32 %v2725_v58, %v2687_v0 }
 0x370   : > { %v5673_v38 = vpop.permute.xlu0 %2762  ;;  %v5675_v48 = vpop.permute.xlu1 %2782  ;;  %v2777_v32 = vadd.f32 %v2775_v56, %v2737_v1  ;;  %v2757_v11 = vadd.f32 %v2755_v3, %v2717_v20  ;;  %v2985_v3 = vstv %s5750_s7  ;;  %s3586_s7 = sshll.u32 %s6017_s13, 3 }
 0x371   : > { %v2784_v39 = vrot.slane %v5675_v48, 1  ;;  %v2764_v41 = vrot.slane %v5673_v38, 1 }
 0x373   : > { %v2785_v25 = vsel %vm1239_vm9, %v5675_v48, %v2784_v39  ;;  %v2973_v39 = vstv %s5744_s6  ;;  %s3689_s6 = smov 79  }
 0x374   : > { %v5679_v29 = vpop.permute.xlu0 %2812  ;;  %v5681_v14 = vpop.permute.xlu1 %2792  ;;  %v2787_v48 = vadd.f32 %v2785_v25, %v2747_v9 }
 0x375   : > { %v2814_v40 = vrot.slane %v5679_v29, 1  ;;  %v2794_v34 = vrot.slane %v5681_v14, 1 }
 0x377   : > { %v2815_v27 = vsel %vm1400_vm10, %v5679_v29, %v2814_v40  ;;  %v2765_v29 = vsel %vm1239_vm9, %v5673_v38, %v2764_v41 }
 0x378   : > { %v5685_v35 = vpop.permute.xlu0 %2802  ;;  %v5687_v63 = vpop.permute.xlu1 %2822  ;;  %v2817_v12 = vadd.f32 %v2815_v27, %v2777_v32  ;;  %v2767_v50 = vadd.f32 %v2765_v29, %v2727_v16  ;;  %v2988_v27 = vstv %s5753_s9 }
 0x379   : > { %v2824_v19 = vrot.slane %v5687_v63, 1  ;;  %v2804_v15 = vrot.slane %v5685_v35, 1 }
 0x37b   : > { %v2825_v45 = vsel %vm1400_vm10, %v5687_v63, %v2824_v19  ;;  %v2805_v38 = vsel %vm1239_vm9, %v5685_v35, %v2804_v15  ;;  %v2981_v15 = vstv %s5757_s10 }
 0x37c   : > { %v2853_v51 = vpop.permute.xlu0 %2852  ;;  %v5695_v10 = vpop.permute.xlu1 %2832  ;;  %v2827_v42 = vadd.f32 %v2825_v45, %v2787_v48  ;;  %v2807_v57 = vadd.f32 %v2805_v38, %v2767_v50  ;;  %v2992_v45 = vstv %s5773_s11  ;;  %v2996_v48 = vstv %s3571_s21  ;;  %v3004_v50 = vld [vmem:[%s3738_s27] ss:$4 sm:$0x7] }
 0x37d   : > { %v2854_v5 = vrot.slane %v2853_v51, 1  ;;  %v2834_v49 = vrot.slane %v5695_v10, 1 }
 0x37f   : > { %v2855_v2 = vsel %vm1400_vm10, %v2853_v51, %v2854_v5  ;;  %v2795_v51 = vsel %vm1239_vm9, %v5681_v14, %v2794_v34  ;;  %v2835_v14 = vsel %vm1400_vm10, %v5695_v10, %v2834_v49 }
 0x380   : > { %v5706_v13 = vpop.permute.xlu0 %2842  ;;  %v2863_v26 = vpop.permute.xlu1 %2862  ;;  %v2857_v22 = vadd.f32 %v2855_v2, %v2817_v12  ;;  %v2797_v52 = vadd.f32 %v2795_v51, %v2757_v11 }
 0x381   : > { %v2864_v55 = vrot.slane %v2863_v26, 1  ;;  %v2844_v59 = vrot.slane %v5706_v13, 1 }
 0x382   : > { %v2837_v6 = vadd.f32 %v2835_v14, %v2797_v52  ;;  %v3577_v14 = vld [vmem:[%s3738_s27 + $0x2] ss:$4 sm:$0x7]  ;;  %v3049_v52 = vstv %s3578_s15 }
 0x383   : > { %v2865_v63 = vsel %vm1400_vm10, %v2863_v26, %v2864_v55  ;;  %v2845_v35 = vsel %vm1400_vm10, %v5706_v13, %v2844_v59 }
 0x384   : > { %v2893_v30 = vpop.permute.xlu0 %2892  ;;  %v2873_v46 = vpop.permute.xlu1 %2872  ;;  %v2867_v31 = vadd.f32 %v2865_v63, %v2827_v42  ;;  %v2847_v0 = vadd.f32 %v2845_v35, %v2807_v57  ;;  %v3574_v42 = vld [vmem:[%s3738_s27 + $0x1] ss:$4 sm:$0x7]  ;;  %v3580_v35 = vld [vmem:[%s3738_s27 + $0x3] ss:$4 sm:$0x7]  ;;  %v3066_v57 = vstv %s3581_s8 }
 0x385   : > { %v2894_v28 = vrot.slane %v2893_v30, 1  ;;  %v2874_v21 = vrot.slane %v2873_v46, 1  ;;  %s3676_s27 = smov 75  }
 0x387   : > { %v2895_v43 = vsel %vm1400_vm10, %v2893_v30, %v2894_v28  ;;  %v2875_v23 = vsel %vm1400_vm10, %v2873_v46, %v2874_v21 }
 0x388   : > { %v2883_v60 = vpop.permute.xlu0 %2882  ;;  %v2903_v54 = vpop.permute.xlu1 %2902  ;;  %v2897_v37 = vadd.f32 %v2895_v43, %v2857_v22  ;;  %v2877_v46 = vadd.f32 %v2875_v23, %v2837_v6 }
 0x389   : > { %v2904_v53 = vrot.slane %v2903_v54, 1  ;;  %v2884_v47 = vrot.slane %v2883_v60, 1 }
 0x38b   : > { %v2905_v44 = vsel %vm1400_vm10, %v2903_v54, %v2904_v53  ;;  %v2885_v40 = vsel %vm1400_vm10, %v2883_v60, %v2884_v47  ;;  %v2977_v54 = vstv %s5763_s14  ;;  %s5803_s14 = scalar_lea.vmem %s5828_s3, %s3586_s7 }
 0x38c   : > { %v2933_v61 = vpop.permute.xlu0 %2932  ;;  %v2913_v17 = vpop.permute.xlu1 %2912  ;;  %v2907_v62 = vadd.f32 %v2905_v44, %v2867_v31  ;;  %v2887_v1 = vadd.f32 %v2885_v40, %v2847_v0  ;;  %v3035_v40 = vstv %s3576_s30 }
 0x38d   : > { %v2934_v7 = vrot.slane %v2933_v61, 1  ;;  %v2914_v4 = vrot.slane %v2913_v17, 1 }
 0x38f   : > { %v2935_v26 = vsel %vm1400_vm10, %v2933_v61, %v2934_v7  ;;  %v2915_v58 = vsel %vm1400_vm10, %v2913_v17, %v2914_v4  ;;  %v3032_v4 = vstv %s3575_s12 }
 0x390   : > { %v2937_v24 = vadd.f32 %v2935_v26, %v2897_v37  ;;  %v2923_v10 = vpop.permute.xlu0 %2922  ;;  %v2943_v33 = vpop.permute.xlu1 %2942  ;;  %v2917_v16 = vadd.f32 %v2915_v58, %v2877_v46  ;;  %v3013_v26 = vstv %s3572_s2  ;;  %v3052_v58 = vstv %s3579_s23 }
 0x391   : > { %v2924_v13 = vrot.slane %v2923_v10, 1  ;;  %v2944_v8 = vrot.slane %v2943_v33, 1 }
 0x392   : > { %v2970_v30 = vadd.f32 %v2969_v36, %v2937_v24 }
 0x393   : > { %v2925_v56 = vsel %vm1400_vm10, %v2923_v10, %v2924_v13  ;;  %v2945_v5 = vsel %vm1400_vm10, %v2943_v33, %v2944_v8  ;;  %v3016_v13 = vstv %s3573_s26 }
 0x394   : > { %v2947_v20 = vadd.f32 %v2945_v5, %v2907_v62  ;;  %v2963_v18 = vpop.permute.xlu0 %2962  ;;  %v2953_v41 = vpop.permute.xlu1 %2952  ;;  %v2971_v28 = vmax.f32 %v2970_v30, 0.0  ;;  %v2927_v32 = vadd.f32 %v2925_v56, %v2887_v1  ;;  %v3069_v30 = vstv %s3582_s24 }
 0x395   : > { %v2964_v36 = vrot.slane %v2963_v18, 1  ;;  %v2954_v19 = vrot.slane %v2953_v41, 1 }
 0x396   : > { %v2974_v34 = vadd.f32 %v2973_v39, %v2947_v20  ;;  %v2986_v11 = vmul.f32 %v2985_v3, %v2971_v28 }
 0x397   : > { %v2965_v60 = vsel %vm1400_vm10, %v2963_v18, %v2964_v36  ;;  %v2955_v9 = vsel %vm1400_vm10, %v2953_v41, %v2954_v19  ;;  %v6014_v36 = vlaneseq }
 0x398   : > { %v2975_v25 = vmax.f32 %v2974_v34, 0.0  ;;  %v2967_v2 = vadd.f32 %v2965_v60, %v2927_v32  ;;  %v2957_v55 = vadd.f32 %v2955_v9, %v2917_v16 }
 0x399   : > { %vm3026_vm15 = vcmp.lt.s32.totalorder %v6014_v36, 358 }
 0x39a   : > { %v2989_v29 = vmul.f32 %v2988_v27, %v2975_v25  ;;  %v2982_v12 = vadd.f32 %v2981_v15, %v2967_v2  ;;  %v2978_v49 = vadd.f32 %v2977_v54, %v2957_v55 }
 0x39c   : > { %v2990_v59 = vadd.f32 %v2989_v29, %v2986_v11  ;;  %v2983_v43 = vmax.f32 %v2982_v12, 0.0  ;;  %v2979_v53 = vmax.f32 %v2978_v49, 0.0 }
 0x39e   : > { %v2993_v51 = vmul.f32 %v2992_v45, %v2979_v53  ;;  %v2997_v38 = vmul.f32 %v2996_v48, %v2983_v43 }
 0x3a0   : > { %v2994_v22 = vadd.f32 %v2993_v51, %v2990_v59 }
 0x3a2   : > { %v2998_v61 = vadd.f32 %v2997_v38, %v2994_v22 }
 0x3a4   : > { %v2999_v17 = vsub.f32 0.0, %v2998_v61 }
 0x3a6   : > { %v3000_v63 = vmul.f32 1.442695, %v2999_v17 }
 0x3a8   : > { %3630 = vpow2.f32 %v3000_v63 }
 0x3b5   : > { %v3631_v21 = vpop.eup %3630 }
 0x3b6   : > { %v3002_v47 = vadd.f32 1.0, %v3631_v21 }
 0x3b8   : > { %3632 = vrcp.f32 %v3002_v47 }
 0x3c5   : > { %v3633_v7 = vpop.eup %3632 }
 0x3c6   : > { %3007 = vrot.lane.b32.xlu1 %v3633_v7, %s6013_s0 }
 0x438   : > { %v3008_v37 = vpop.permute.xlu1 %3007 }
 0x439   : > { %v3009_v44 = vrot.slane %v3008_v37, 7 }
 0x43b   : > { %v3010_v31 = vsel %vm1569_vm13, %v3009_v44, %v3008_v37 }
 0x43c   : > { %v3012_v24 = vmul.f32 %v3010_v31, %v3004_v50  ;;  %v3031_v10 = vmul.f32 %v3574_v42, %v3010_v31  ;;  %v3048_v33 = vmul.f32 %v3577_v14, %v3010_v31  ;;  %v3065_v23 = vmul.f32 %v3580_v35, %v3010_v31 }
 0x43e   : > { %v3014_v8 = vmul.f32 %v3013_v26, %v3012_v24  ;;  %v3033_v6 = vmul.f32 %v3032_v4, %v3031_v10  ;;  %v3050_v0 = vmul.f32 %v3049_v52, %v3048_v33  ;;  %v3067_v62 = vmul.f32 %v3066_v57, %v3065_v23 }
 0x440   : > { %v3036_v56 = vadd.f32 %v3035_v40, %v3033_v6  ;;  %v3017_v39 = vadd.f32 %v3016_v13, %v3014_v8  ;;  %v3070_v1 = vadd.f32 %v3069_v30, %v3067_v62  ;;  %v3053_v20 = vadd.f32 %v3052_v58, %v3050_v0 }
 0x442   : > { %v3037_v5 = vmax.f32 %v3036_v56, 0.0  ;;  %v3018_v46 = vmax.f32 %v3017_v39, 0.0  ;;  %v3071_v18 = vmax.f32 %v3070_v1, 0.0  ;;  %v3054_v41 = vmax.f32 %v3053_v20, 0.0 }
 0x444   : > { %3039 = vrot.lane.b32.xlu1 %v3037_v5, %s5980_s25  ;;  %3020 = vrot.lane.b32.xlu0 %v3018_v46, %s5980_s25 }
 0x448   : > { %3073 = vrot.lane.b32.xlu1 %v3071_v18, %s5980_s25  ;;  %3056 = vrot.lane.b32.xlu0 %v3054_v41, %s5980_s25 }
 0x4b6   : > { %v3040_v3 = vpop.permute.xlu1 %3039  ;;  %v3021_v27 = vpop.permute.xlu0 %3020 }
 0x4b7   : > { %v3041_v19 = vrot.slane %v3040_v3, 1  ;;  %v3022_v28 = vrot.slane %v3021_v27, 1 }
 0x4b9   : > { %v3042_v16 = vsel %vm752_vm6, %v3040_v3, %v3041_v19  ;;  %v3023_v32 = vsel %vm752_vm6, %v3021_v27, %v3022_v28 }
 0x4ba   : > { %3045 = vst.msk [vmem:[#allocation3 + $0x1] ss:$4 sm:$0x7] %vm3026_vm15, %v3042_v16  ;;  %3028 = vst.msk [vmem:[#allocation3] ss:$4 sm:$0x7] %vm3026_vm15, %v3023_v32  ;;  %v3074_v34 = vpop.permute.xlu1 %3073  ;;  %v3057_v15 = vpop.permute.xlu0 %3056 }
 0x4bb   : > { %v3075_v60 = vrot.slane %v3074_v34, 1  ;;  %v3058_v54 = vrot.slane %v3057_v15, 1 }
 0x4bd   : > { %v3076_v9 = vsel %vm752_vm6, %v3074_v34, %v3075_v60  ;;  %v3059_v25 = vsel %vm752_vm6, %v3057_v15, %v3058_v54  ;;  %vm3122_vm6 = vcmask 781952  }
 0x4be   : > { %3079 = vst.msk [vmem:[#allocation3 + $0x3] ss:$4 sm:$0x7] %vm3026_vm15, %v3076_v9  ;;  %3062 = vst.msk [vmem:[#allocation3 + $0x2] ss:$4 sm:$0x7] %vm3026_vm15, %v3059_v25 }
 0x4c5   : > { %v3138_v2 = vld [vmem:[#allocation3 + $0x4] sm:$0xf]  ;;  %v3080_v55 = vld [vmem:[#allocation3] sm:$0xf]  ;;  %v3171_v48 = vld [vmem:[#allocation3 + $0x8] sm:$0xf] }
 0x4c6   : > { %3140 = vrot.lane.b32.xlu1 %v3138_v2, %s3676_s27  ;;  %3082 = vrot.lane.b32.xlu0 %v3080_v55, %s5980_s25  ;;  %v3087_v11 = vld [vmem:[#allocation3] sm:$0xf]  ;;  %v3156_v29 = vld [vmem:[#allocation3 + $0x4] sm:$0xff]  ;;  %s3682_s25 = smov 91  }
 0x4c7   : > { %v3094_v12 = vld [vmem:[#allocation3] sm:$0xf]  ;;  %v3144_v49 = vld [vmem:[#allocation3 + $0x4] sm:$0xf]  ;;  %v3165_v51 = vld [vmem:[#allocation3 + $0x8] sm:$0xf] }
 0x4c8   : > { %v3150_v45 = vld [vmem:[#allocation3 + $0x4] sm:$0xf]  ;;  %v3108_v43 = vld [vmem:[#allocation3] sm:$0xf]  ;;  %v3177_v38 = vld [vmem:[#allocation3 + $0x8] sm:$0xf] }
 0x4c9   : > { %v3115_v59 = vld [vmem:[#allocation3] sm:$0xff]  ;;  %v3183_v61 = vld [vmem:[#allocation3 + $0x8] sm:$0xf] }
 0x4ca   : > { %3089 = vrot.lane.b32.xlu1 %v3087_v11, %s3677_s29  ;;  %3158 = vrot.lane.b32.xlu0 %v3156_v29, %s3678_s16  ;;  %v3101_v53 = vld [vmem:[#allocation3] sm:$0xf]  ;;  %v3124_v22 = vld [vmem:[#allocation3 + $0x4] sm:$0xf] }
 0x4cb   : > { %v3131_v17 = vld [vmem:[#allocation3 + $0x4] sm:$0xf] }
 0x4ce   : > { %3096 = vrot.lane.b32.xlu1 %v3094_v12, %s3679_s17  ;;  %3146 = vrot.lane.b32.xlu0 %v3144_v49, %s3680_s18 }
 0x4d2   : > { %3152 = vrot.lane.b32.xlu1 %v3150_v45, %s3681_s19  ;;  %3117 = vrot.lane.b32.xlu0 %v3115_v59, %s5997_s1  ;;  %s3688_s1 = smov 47  }
 0x4d6   : > { %3110 = vrot.lane.b32.xlu1 %v3108_v43, %s3682_s25  ;;  %3103 = vrot.lane.b32.xlu0 %v3101_v53, %s3683_s5 }
 0x4da   : > { %3173 = vrot.lane.b32.xlu1 %v3171_v48, %s3684_s20  ;;  %3167 = vrot.lane.b32.xlu0 %v3165_v51, %s3685_s22 }
 0x4de   : > { %3179 = vrot.lane.b32.xlu1 %v3177_v38, %s3686_s28  ;;  %3126 = vrot.lane.b32.xlu0 %v3124_v22, %s3687_s4 }
 0x4e2   : > { %3185 = vrot.lane.b32.xlu1 %v3183_v61, %s3688_s1  ;;  %3133 = vrot.lane.b32.xlu0 %v3131_v17, %s3689_s6 }
 0x538   : > { %v3141_v63 = vpop.permute.xlu1 %3140  ;;  %v3083_v21 = vpop.permute.xlu0 %3082 }
 0x539   : > { %3143 = vst.msk [vmem:[%s5803_s14 + $0x4] sm:$0xf] %vm3085_vm0, %v3141_v63  ;;  %3086 = vst.msk [vmem:[%s5803_s14] sm:$0xf] %vm3085_vm0, %v3083_v21 }
 0x53c   : > { %v3090_v47 = vpop.permute.xlu1 %3089  ;;  %v3159_v7 = vpop.permute.xlu0 %3158 }
 0x53d   : > { %3093 = vst.msk [vmem:[%s5803_s14] sm:$0xf] %vm3092_vm1, %v3090_v47  ;;  %v3160_v14 = vrot.slane %v3159_v7, 4 }
 0x53f   : > { %v3162_v44 = vsel %vm3161_vm3, %v3159_v7, %v3160_v14 }
 0x540   : > { %v3097_v50 = vpop.permute.xlu1 %3096  ;;  %v3147_v42 = vpop.permute.xlu0 %3146 }
 0x541   : > { %3100 = vst.msk [vmem:[%s5803_s14] sm:$0xf] %vm3099_vm2, %v3097_v50 }
 0x542   : > { %3149 = vst.msk [vmem:[%s5803_s14 + $0x4] sm:$0xf] %vm3092_vm1, %v3147_v42 }
 0x544   : > { %v3153_v37 = vpop.permute.xlu1 %3152  ;;  %v3118_v35 = vpop.permute.xlu0 %3117 }
 0x545   : > { %3155 = vst.msk [vmem:[%s5803_s14 + $0x4] sm:$0xf] %vm3099_vm2, %v3153_v37  ;;  %v3119_v26 = vrot.slane %v3118_v35, 4 }
 0x546   : > { %3164 = vst.msk [vmem:[%s5803_s14 + $0x4] sm:$0xf] %vm3106_vm4, %v3162_v44 }
 0x547   : > { %v3120_v57 = vsel %vm1239_vm9, %v3118_v35, %v3119_v26 }
 0x548   : > { %v3111_v4 = vpop.permute.xlu1 %3110  ;;  %v3104_v52 = vpop.permute.xlu0 %3103 }
 0x549   : > { %3107 = vst.msk [vmem:[%s5803_s14] sm:$0xf] %vm3106_vm4, %v3104_v52 }
 0x54a   : > { %3114 = vst.msk [vmem:[%s5803_s14] sm:$0xf] %vm3113_vm5, %v3111_v4 }
 0x54b   : > { %3123 = vst.msk [vmem:[%s5803_s14] sm:$0xf] %vm3122_vm6, %v3120_v57 }
 0x54c   : > { %v3174_v31 = vpop.permute.xlu1 %3173  ;;  %v3168_v24 = vpop.permute.xlu0 %3167 }
 0x54d   : > { %3170 = vst.msk [vmem:[%s5803_s14 + $0x4] sm:$0xf] %vm3113_vm5, %v3168_v24 }
 0x54e   : > { %3176 = vst.msk [vmem:[%s5803_s14 + $0x4] sm:$0xf] %vm3122_vm6, %v3174_v31 }
 0x550   : > { %v3180_v10 = vpop.permute.xlu1 %3179  ;;  %v3127_v33 = vpop.permute.xlu0 %3126 }
 0x551   : > { %3182 = vst.msk [vmem:[%s5803_s14 + $0x4] sm:$0xf] %vm3129_vm7, %v3180_v10  ;;  %3130 = vst.msk [vmem:[%s5803_s14] sm:$0xf] %vm3129_vm7, %v3127_v33 }
 0x554   : > { %v3186_v23 = vpop.permute.xlu1 %3185  ;;  %v3134_v40 = vpop.permute.xlu0 %3133 }
 0x555   : > { %3188 = vst.msk [vmem:[%s5803_s14 + $0x4] sm:$0xf] %vm3136_vm8, %v3186_v23  ;;  %3137 = vst.msk [vmem:[%s5803_s14] sm:$0xf] %vm3136_vm8, %v3134_v40 }
 0x556 PF: > { %s6015_s13 = sld [smem:[#allocation7_spill]] }
 0x55c   : > { %s14_s12 = sadd.s32 1, %s6015_s13  }
 0x55d   : > { %p11_p1 = scmp.ge.s32.totalorder %s14_s12, 4  }
 0x55f   :  { %13 = sbr.rel (!%p11_p1) target bundleno = 5 (0x5), region = 76 }
 0x564   :  { %3210 = vsyncpa [#allocation5], 1 }
 0x565   :  { %3212 = vsyncpa [#allocation5 + $0x1], 1 }

</bundles_post_ra>
